<compile_context>
chip_gen: v7x
topology: tpu7x:2x2x1
jax: 0.10.0
libtpu: 0.0.40
codegen_flags: <defaults>
</compile_context>

<pallas_src>
import functools

import jax
import jax.numpy as jnp
from jax.experimental import pallas as pl
from jax.experimental.pallas import tpu as pltpu


# ----------------------------------------------------------------------------
# Small synthetic config (production defaults are huge: 1536/1024 dims etc.)
# Feature dims chosen as multiples of 128 so every output store is lane-dense.
# ----------------------------------------------------------------------------
CFG = dict(
    add_pos_embed=True,
    input_embedding_dim=128,   # lane-dense
    hidden_size=128,           # lane-dense
    max_seq_len=32,
    action_dim=8,
    action_horizon=16,         # H * A = 128 -> lane-dense decoder output
    max_state_dim=64,
    noise_beta_alpha=1.5,
    noise_beta_beta=1.0,
    noise_s=0.999,
    num_timestep_buckets=1000,
    max_num_embodiments=4,
    vl_seq_len=16,
)


def _mm(x, w):
    """MXU matmul: bf16 operands, f32 accumulation (bf16-native on v6e/v7x)."""
    return jnp.dot(x.astype(jnp.bfloat16), w.astype(jnp.bfloat16),
                   preferred_element_type=jnp.float32)


# ----------------------------------------------------------------------------
# Kernel 1: fused state encoder + multi-embodiment action encoder
#   state (1,S) -> relu(se1) -> se2 -> state_features (1,emb)
#   noisy (H,A) -> ae1 -> concat tau -> swish(ae2) -> ae3 -> +pos -> (H,emb)
#   output sa_embs = concat([state_features, action_features]) : (1+H, emb)
# Per-category weights are selected inside the index_maps via the
# scalar-prefetched embodiment ids (including the biases).
# ----------------------------------------------------------------------------
def _encoder_kernel(cids_ref, st_ref, act_ref, tau_ref, pos_ref,
                    se1w, se1b, se2w, se2b,
                    ae1w, ae1b, ae2w, ae2b, ae3w, ae3b,
                    o_ref):
    del cids_ref  # consumed only by the index_maps (scalar prefetch)
    # --- state encoder ---
    st = st_ref[0]                                        # (1, S)
    h = jnp.maximum(_mm(st, se1w[0]) + se1b[0], 0.0)      # (1, hs)
    state_feat = _mm(h, se2w[0]) + se2b[0]                # (1, emb)
    # --- action encoder ---
    a = act_ref[0]                                        # (H, A)
    a_emb = _mm(a, ae1w[0]) + ae1b[0]                     # (H, emb)
    x = jnp.concatenate([a_emb, tau_ref[0]], axis=-1)     # (H, 2*emb)
    x = _mm(x, ae2w[0]) + ae2b[0]
    x = x * jax.nn.sigmoid(x)                             # swish
    x = _mm(x, ae3w[0]) + ae3b[0]
    x = x + pos_ref[...]                                  # positional embedding
    o_ref[0] = jnp.concatenate([state_feat, x], axis=0).astype(o_ref.dtype)


def fused_encoder(params, state, noisy, tau_emb, pos_emb, cat_ids):
    B, H, A = noisy.shape
    S = state.shape[-1]
    emb = tau_emb.shape[-1]
    hs = params["se1_W"].shape[-1]
    T = 1 + H
    grid_spec = pltpu.PrefetchScalarGridSpec(
        num_scalar_prefetch=1,
        grid=(B,),
        in_specs=[
            pl.BlockSpec((1, 1, S), lambda i, c: (i, 0, 0)),
            pl.BlockSpec((1, H, A), lambda i, c: (i, 0, 0)),
            pl.BlockSpec((1, H, emb), lambda i, c: (i, 0, 0)),
            pl.BlockSpec((H, emb), lambda i, c: (0, 0)),
            pl.BlockSpec((1, S, hs), lambda i, c: (c[i], 0, 0)),
            pl.BlockSpec((1, 1, hs), lambda i, c: (c[i], 0, 0)),
            pl.BlockSpec((1, hs, emb), lambda i, c: (c[i], 0, 0)),
            pl.BlockSpec((1, 1, emb), lambda i, c: (c[i], 0, 0)),
            pl.BlockSpec((1, A, emb), lambda i, c: (c[i], 0, 0)),
            pl.BlockSpec((1, 1, emb), lambda i, c: (c[i], 0, 0)),
            pl.BlockSpec((1, 2 * emb, emb), lambda i, c: (c[i], 0, 0)),
            pl.BlockSpec((1, 1, emb), lambda i, c: (c[i], 0, 0)),
            pl.BlockSpec((1, emb, emb), lambda i, c: (c[i], 0, 0)),
            pl.BlockSpec((1, 1, emb), lambda i, c: (c[i], 0, 0)),
        ],
        out_specs=pl.BlockSpec((1, T, emb), lambda i, c: (i, 0, 0)),
    )
    return pl.pallas_call(
        _encoder_kernel,
        out_shape=jax.ShapeDtypeStruct((B, T, emb), jnp.float32),
        grid_spec=grid_spec,
        compiler_params=pltpu.CompilerParams(
            dimension_semantics=("parallel",)),
    )(cat_ids.astype(jnp.int32), state, noisy, tau_emb, pos_emb,
      params["se1_W"], params["se1_b"], params["se2_W"], params["se2_b"],
      params["ae1_W"], params["ae1_b"], params["ae2_W"], params["ae2_b"],
      params["ae3_W"], params["ae3_b"])


# ----------------------------------------------------------------------------
# Kernel 2: fused DiT block stand-in (single launch, whole batch).
# TODO(synk): DiT(**diffusion_model_cfg) source was not provided; this is a
# single cross-attention + MLP transformer block with matching I/O shapes.
# Shared projections operate on the flat (B*T, D) matrix; only the masked
# attention is done per batch element (static Python loop, B known at trace).
# ----------------------------------------------------------------------------
def _dit_kernel(sa_ref, vl_ref, mask_ref, tsin_ref,
                win_w, win_b, wt_w, wt_b, wq_w, wq_b,
                wkv_w, wkv_b, wo_w, wo_b, wm1_w, wm1_b, wm2_w, wm2_b,
                o_ref, *, B, T, Tv):
    hs = wq_w.shape[-1]
    f32 = jnp.float32
    bf16 = jnp.bfloat16

    h = _mm(sa_ref[...], win_w[...]) + win_b[...]          # (B*T, hs)
    te = _mm(tsin_ref[...], wt_w[...]) + wt_b[...]         # (B*T, hs)
    te = te * jax.nn.sigmoid(te)                           # swish
    h = h + te
    q = _mm(h, wq_w[...]) + wq_b[...]                      # (B*T, hs)
    kv = _mm(vl_ref[...], wkv_w[...]) + wkv_b[...]         # (B*Tv, 2*hs)
    k = kv[:, :hs]
    v = kv[:, hs:]
    mask = mask_ref[...]                                   # (B, Tv)
    scale = 1.0 / (hs ** 0.5)

    attn_parts = []
    for b in range(B):                                     # B is static
        qb = q[b * T:(b + 1) * T, :]                       # (T, hs)
        kb = k[b * Tv:(b + 1) * Tv, :]                     # (Tv, hs)
        vb = v[b * Tv:(b + 1) * Tv, :]
        s = jax.lax.dot_general(
            qb.astype(bf16), kb.astype(bf16),
            dimension_numbers=(((1,), (1,)), ((), ())),
            preferred_element_type=f32) * scale            # (T, Tv)
        mb = mask[b:b + 1, :]                              # (1, Tv)
        s = jnp.where(mb > 0.5, s, jnp.float32(-1e30))     # scores stay f32
        s = s - jnp.max(s, axis=-1, keepdims=True)
        p = jnp.exp(s)
        p = p * pl.reciprocal(jnp.sum(p, axis=-1, keepdims=True), approx=True)
        attn_parts.append(
            jnp.dot(p.astype(bf16), vb.astype(bf16),
                    preferred_element_type=f32))           # (T, hs)
    attn = jnp.concatenate(attn_parts, axis=0)             # (B*T, hs)

    h = h + _mm(attn, wo_w[...]) + wo_b[...]
    m = jnp.maximum(_mm(h, wm1_w[...]) + wm1_b[...], 0.0)
    h = h + _mm(m, wm2_w[...]) + wm2_b[...]
    o_ref[...] = h.astype(o_ref.dtype)


def fused_dit(params, sa_flat, vl_flat, vl_mask, tsin_flat, *, B, T, Tv):
    hs = params["Wq_W"].shape[-1]
    kernel = functools.partial(_dit_kernel, B=B, T=T, Tv=Tv)
    args = (sa_flat, vl_flat, vl_mask, tsin_flat,
            params["Win_W"], params["Win_b"], params["Wt_W"], params["Wt_b"],
            params["Wq_W"], params["Wq_b"], params["Wkv_W"], params["Wkv_b"],
            params["Wo_W"], params["Wo_b"], params["Wm1_W"], params["Wm1_b"],
            params["Wm2_W"], params["Wm2_b"])
    vmem = pltpu.MemorySpace.VMEM
    return pl.pallas_call(
        kernel,
        out_shape=jax.ShapeDtypeStruct((B * T, hs), jnp.float32),
        in_specs=[pl.BlockSpec(memory_space=vmem) for _ in args],
        out_specs=pl.BlockSpec(memory_space=vmem),
    )(*args)


# ----------------------------------------------------------------------------
# Kernel 3: fused adaptive action decoder + masked squared-error map.
#   x (1, 17*hs) -> relu(ad1) -> ad2 -> pred (1, H*A)
#   err = (pred - velocity)^2 * mask   (lane-dense, H*A = 128)
# The scalar loss = sum(err) / max(sum(mask), 1) is trivial JAX glue.
# At production hs=1024 the ad1_W block (~68 MiB f32) must be K-tiled
# (tk % 128 == 0, f32 accumulator, K axis "arbitrary") to fit VMEM.
# ----------------------------------------------------------------------------
def _decoder_kernel(cids_ref, x_ref, vel_ref, mask_ref,
                    ad1w, ad1b, ad2w, ad2b, err_ref):
    del cids_ref
    x = x_ref[0]                                           # (1, 17*hs)
    h = jnp.maximum(_mm(x, ad1w[0]) + ad1b[0], 0.0)        # (1, mid)
    pred = _mm(h, ad2w[0]) + ad2b[0]                       # (1, H*A)
    d = pred - vel_ref[0]
    err_ref[0] = (d * d * mask_ref[0]).astype(err_ref.dtype)


def fused_decoder(params, x_dec, vel, msk, cat_ids):
    B, _, K = x_dec.shape
    C, _, mid = params["ad1_W"].shape
    HA = params["ad2_W"].shape[-1]
    grid_spec = pltpu.PrefetchScalarGridSpec(
        num_scalar_prefetch=1,
        grid=(B,),
        in_specs=[
            pl.BlockSpec((1, 1, K), lambda i, c: (i, 0, 0)),
            pl.BlockSpec((1, 1, HA), lambda i, c: (i, 0, 0)),
            pl.BlockSpec((1, 1, HA), lambda i, c: (i, 0, 0)),
            pl.BlockSpec((1, K, mid), lambda i, c: (c[i], 0, 0)),
            pl.BlockSpec((1, 1, mid), lambda i, c: (c[i], 0, 0)),
            pl.BlockSpec((1, mid, HA), lambda i, c: (c[i], 0, 0)),
            pl.BlockSpec((1, 1, HA), lambda i, c: (c[i], 0, 0)),
        ],
        out_specs=pl.BlockSpec((1, 1, HA), lambda i, c: (i, 0, 0)),
    )
    return pl.pallas_call(
        _decoder_kernel,
        out_shape=jax.ShapeDtypeStruct((B, 1, HA), jnp.float32),
        grid_spec=grid_spec,
        compiler_params=pltpu.CompilerParams(
            dimension_semantics=("parallel",)),
    )(cat_ids.astype(jnp.int32), x_dec, vel, msk,
      params["ad1_W"], params["ad1_b"], params["ad2_W"], params["ad2_b"])


# ----------------------------------------------------------------------------
# JAX glue (matches the torch reference semantics)
# ----------------------------------------------------------------------------
def sinusoidal_pos_encoding(timesteps, dim):
    """timesteps: (..., T) float -> (..., T, dim)."""
    half = dim // 2
    exponent = -jnp.arange(half, dtype=jnp.float32) * (jnp.log(10000.0) / half)
    freqs = timesteps[..., None].astype(jnp.float32) * jnp.exp(exponent)
    return jnp.concatenate([jnp.sin(freqs), jnp.cos(freqs)], axis=-1)


def flowmatching_forward(params, cfg, backbone_features, backbone_attn_mask,
                         state, actions, action_mask, embodiment_id, rng):
    B, H, A = actions.shape
    emb = cfg["input_embedding_dim"]
    hs = cfg["hidden_size"]
    Tv = backbone_features.shape[1]
    T = 1 + H
    cat_ids = embodiment_id.astype(jnp.int32)

    # --- flow-matching noising (stochastic glue; matches torch semantics) ---
    k_noise, k_time = jax.random.split(rng)
    noise = jax.random.normal(k_noise, actions.shape, actions.dtype)
    beta_sample = jax.random.beta(
        k_time, cfg["noise_beta_alpha"], cfg["noise_beta_beta"], (B,)
    ).astype(actions.dtype)
    t = (cfg["noise_s"] - beta_sample) / cfg["noise_s"]          # (B,)
    t3 = t[:, None, None]
    noisy_trajectory = (1.0 - t3) * noise + t3 * actions
    velocity = actions - noise
    t_disc = (t * cfg["num_timestep_buckets"]).astype(jnp.int32)

    # --- sinusoidal encodings (tiny glue) ---
    tau = jnp.broadcast_to(t_disc.astype(jnp.float32)[:, None], (B, H))
    tau_emb = sinusoidal_pos_encoding(tau, emb)                  # (B, H, emb)
    tsin = sinusoidal_pos_encoding(
        t_disc.astype(jnp.float32)[:, None], hs)                 # (B, 1, hs)
    tsin_flat = jnp.broadcast_to(tsin, (B, T, hs)).reshape(B * T, hs)

    if cfg["add_pos_embed"]:
        pos_emb = params["pos_emb"][:H]                          # (H, emb)
    else:
        pos_emb = jnp.zeros((H, emb), jnp.float32)

    # --- Kernel 1: fused state + action encoders -> sa_embs (B, 17, emb) ---
    sa_embs = fused_encoder(params, state, noisy_trajectory, tau_emb,
                            pos_emb, cat_ids)

    # --- Kernel 2: fused DiT block -> (B*17, hs) ---
    sa_flat = sa_embs.reshape(B * T, emb)
    vl_flat = backbone_features.reshape(B * Tv, emb)
    vl_mask = backbone_attn_mask.astype(jnp.float32)             # (B, Tv)
    model_flat = fused_dit(params, sa_flat, vl_flat, vl_mask, tsin_flat,
                           B=B, T=T, Tv=Tv)

    # --- Kernel 3: adaptive decoder + masked squared error ---
    x_dec = model_flat.reshape(B, 1, T * hs)
    vel = velocity[:, :H, :].reshape(B, 1, H * A)
    msk = action_mask[:, :H, :].astype(jnp.float32).reshape(B, 1, H * A)
    err = fused_decoder(params, x_dec, vel, msk, cat_ids)        # (B, 1, H*A)

    # guarded masked-MSE (all-zero mask would otherwise produce NaN)
    loss = jnp.sum(err) / jnp.maximum(jnp.sum(msk), 1.0)
    return loss


# ----------------------------------------------------------------------------
# Deterministic parameter init (shapes follow the module's __init__;
# biases stored with an explicit length-1 row so category selection can be a
# (1, 1, D) block inside the kernels)
# ----------------------------------------------------------------------------
def init_params(key, cfg):
    hs = cfg["hidden_size"]
    emb = cfg["input_embedding_dim"]
    C = cfg["max_num_embodiments"]
    A = cfg["action_dim"]
    H = cfg["action_horizon"]
    S = cfg["max_state_dim"]
    T = 1 + H

    keys = iter(jax.random.split(key, 32))

    def w(*shape):
        return 0.02 * jax.random.normal(next(keys), shape, jnp.float32)

    z = lambda *shape: jnp.zeros(shape, jnp.float32)
    p = {}
    # state_encoder: CategorySpecificMLP(S -> hs -> emb)
    p["se1_W"], p["se1_b"] = w(C, S, hs), z(C, 1, hs)
    p["se2_W"], p["se2_b"] = w(C, hs, emb), z(C, 1, emb)
    # action_encoder: MultiEmbodimentActionEncoder(A, emb, C)
    p["ae1_W"], p["ae1_b"] = w(C, A, emb), z(C, 1, emb)
    p["ae2_W"], p["ae2_b"] = w(C, 2 * emb, emb), z(C, 1, emb)
    p["ae3_W"], p["ae3_b"] = w(C, emb, emb), z(C, 1, emb)
    # positional embedding
    p["pos_emb"] = 0.02 * jax.random.normal(
        next(keys), (cfg["max_seq_len"], emb), jnp.float32)
    # DiT stand-in (shared across batch); K/V fused into one lane-dense proj
    p["Win_W"], p["Win_b"] = w(emb, hs), z(1, hs)
    p["Wt_W"], p["Wt_b"] = w(hs, hs), z(1, hs)
    p["Wq_W"], p["Wq_b"] = w(hs, hs), z(1, hs)
    p["Wkv_W"], p["Wkv_b"] = w(emb, 2 * hs), z(1, 2 * hs)
    p["Wo_W"], p["Wo_b"] = w(hs, hs), z(1, hs)
    p["Wm1_W"], p["Wm1_b"] = w(hs, 2 * hs), z(1, 2 * hs)
    p["Wm2_W"], p["Wm2_b"] = w(2 * hs, hs), z(1, hs)
    # action_decoder_adaptive: (17*hs) -> mid(hs) -> (H*A)
    p["ad1_W"], p["ad1_b"] = w(C, T * hs, hs), z(C, 1, hs)
    p["ad2_W"], p["ad2_b"] = w(C, hs, H * A), z(C, 1, H * A)
    return p


# ----------------------------------------------------------------------------
if __name__ == "__main__":
    key = jax.random.PRNGKey(0)
    k_params, k_data, k_noise = jax.random.split(key, 3)
    params = init_params(k_params, CFG)

    B = 2
    kd = jax.random.split(k_data, 4)
    backbone_features = jax.random.normal(
        kd[0], (B, CFG["vl_seq_len"], CFG["input_embedding_dim"]), jnp.float32)
    backbone_attn_mask = jnp.concatenate(
        [jnp.ones((B, CFG["vl_seq_len"] - 2), jnp.float32),
         jnp.zeros((B, 2), jnp.float32)], axis=1)
    state = jax.random.normal(kd[1], (B, 1, CFG["max_state_dim"]), jnp.float32)
    actions = jax.random.normal(
        kd[2], (B, CFG["action_horizon"], CFG["action_dim"]), jnp.float32)
    action_mask = jnp.ones((B, CFG["action_horizon"], CFG["action_dim"]),
                           jnp.float32)
    embodiment_id = jnp.array([0, 2], jnp.int32)

    @jax.jit
    def run(bf, bm, st, ac, am, eid, rng):
        return flowmatching_forward(params, CFG, bf, bm, st, ac, am, eid, rng)

    loss = run(backbone_features, backbone_attn_mask, state, actions,
               action_mask, embodiment_id, k_noise)
    loss = jax.block_until_ready(loss)
    assert jnp.isfinite(loss), f"loss is not finite: {loss}"
    print("KERNEL_OK")
</pallas_src>

<mosaic_0001>
module attributes {stable_mosaic.version = 11 : i64} {
  func.func @_encoder_kernel(%arg0: i32, %arg1: memref<2xi32, #tpu.memory_space<smem>>, %arg2: memref<1x1x64xf32, #tpu.memory_space<vmem>>, %arg3: memref<1x16x8xf32, #tpu.memory_space<vmem>>, %arg4: memref<1x16x128xf32, #tpu.memory_space<vmem>>, %arg5: memref<16x128xf32, #tpu.memory_space<vmem>>, %arg6: memref<1x64x128xf32, #tpu.memory_space<vmem>>, %arg7: memref<1x1x128xf32, #tpu.memory_space<vmem>>, %arg8: memref<1x128x128xf32, #tpu.memory_space<vmem>>, %arg9: memref<1x1x128xf32, #tpu.memory_space<vmem>>, %arg10: memref<1x8x128xf32, #tpu.memory_space<vmem>>, %arg11: memref<1x1x128xf32, #tpu.memory_space<vmem>>, %arg12: memref<1x256x128xf32, #tpu.memory_space<vmem>>, %arg13: memref<1x1x128xf32, #tpu.memory_space<vmem>>, %arg14: memref<1x128x128xf32, #tpu.memory_space<vmem>>, %arg15: memref<1x1x128xf32, #tpu.memory_space<vmem>>, %arg16: memref<1x17x128xf32, #tpu.memory_space<vmem>>) attributes {dimension_semantics = [#tpu.dimension_semantics<parallel>], iteration_bounds = array<i64: 2>, scalar_prefetch = 1 : i64, scratch_operands = 0 : i64, tpu.core_type = #tpu.core_type<tc>, window_params = [{transform_indices = @transform_0, window_bounds = array<i64: 1, 1, 64>}, {transform_indices = @transform_1, window_bounds = array<i64: 1, 16, 8>}, {transform_indices = @transform_2, window_bounds = array<i64: 1, 16, 128>}, {pipeline_mode = #tpu.pipeline_mode<synchronous>, transform_indices = @transform_3, window_bounds = array<i64: 16, 128>}, {transform_indices = @transform_4, window_bounds = array<i64: 1, 64, 128>}, {transform_indices = @transform_5, window_bounds = array<i64: 1, 1, 128>}, {transform_indices = @transform_6, window_bounds = array<i64: 1, 128, 128>}, {transform_indices = @transform_7, window_bounds = array<i64: 1, 1, 128>}, {transform_indices = @transform_8, window_bounds = array<i64: 1, 8, 128>}, {transform_indices = @transform_9, window_bounds = array<i64: 1, 1, 128>}, {transform_indices = @transform_10, window_bounds = array<i64: 1, 256, 128>}, {transform_indices = @transform_11, window_bounds = array<i64: 1, 1, 128>}, {transform_indices = @transform_12, window_bounds = array<i64: 1, 128, 128>}, {transform_indices = @transform_13, window_bounds = array<i64: 1, 1, 128>}, {transform_indices = @transform_14, window_bounds = array<i64: 1, 17, 128>}]} {
    %c0 = arith.constant 0 : index
    %c0_0 = arith.constant 0 : index
    %c0_1 = arith.constant 0 : index
    %0 = vector.load %arg2[%c0, %c0_0, %c0_1] : memref<1x1x64xf32, #tpu.memory_space<vmem>>, vector<1x1x64xf32>
    %1 = vector.shape_cast %0 : vector<1x1x64xf32> to vector<1x64xf32>
    %c0_2 = arith.constant 0 : index
    %c0_3 = arith.constant 0 : index
    %c0_4 = arith.constant 0 : index
    %2 = vector.load %arg6[%c0_2, %c0_3, %c0_4] : memref<1x64x128xf32, #tpu.memory_space<vmem>>, vector<1x64x128xf32>
    %3 = vector.shape_cast %2 : vector<1x64x128xf32> to vector<64x128xf32>
    %4 = arith.truncf %1 : vector<1x64xf32> to vector<1x64xbf16>
    %5 = arith.truncf %3 : vector<64x128xf32> to vector<64x128xbf16>
    %cst = arith.constant dense<0.000000e+00> : vector<1x128xf32>
    %6 = tpu.matmul %4, %5, %cst {dimension_numbers = #tpu.dot_dimension_numbers<[1], [0], [0], [1], [0, 0, 1, 1], [], []>} : vector<1x64xbf16>, vector<64x128xbf16>, vector<1x128xf32> -> vector<1x128xf32>
    %c0_5 = arith.constant 0 : index
    %c0_6 = arith.constant 0 : index
    %c0_7 = arith.constant 0 : index
    %7 = vector.load %arg7[%c0_5, %c0_6, %c0_7] : memref<1x1x128xf32, #tpu.memory_space<vmem>>, vector<1x1x128xf32>
    %8 = vector.shape_cast %7 : vector<1x1x128xf32> to vector<1x128xf32>
    %9 = arith.addf %6, %8 : vector<1x128xf32>
    %cst_8 = arith.constant 0.000000e+00 : f32
    %10 = vector.broadcast %cst_8 : f32 to vector<1x128xf32>
    %11 = arith.maximumf %9, %10 : vector<1x128xf32>
    %c0_9 = arith.constant 0 : index
    %c0_10 = arith.constant 0 : index
    %c0_11 = arith.constant 0 : index
    %12 = vector.load %arg8[%c0_9, %c0_10, %c0_11] : memref<1x128x128xf32, #tpu.memory_space<vmem>>, vector<1x128x128xf32>
    %13 = vector.shape_cast %12 : vector<1x128x128xf32> to vector<128x128xf32>
    %14 = arith.truncf %11 : vector<1x128xf32> to vector<1x128xbf16>
    %15 = arith.truncf %13 : vector<128x128xf32> to vector<128x128xbf16>
    %cst_12 = arith.constant dense<0.000000e+00> : vector<1x128xf32>
    %16 = tpu.matmul %14, %15, %cst_12 {dimension_numbers = #tpu.dot_dimension_numbers<[1], [0], [0], [1], [0, 0, 1, 1], [], []>} : vector<1x128xbf16>, vector<128x128xbf16>, vector<1x128xf32> -> vector<1x128xf32>
    %c0_13 = arith.constant 0 : index
    %c0_14 = arith.constant 0 : index
    %c0_15 = arith.constant 0 : index
    %17 = vector.load %arg9[%c0_13, %c0_14, %c0_15] : memref<1x1x128xf32, #tpu.memory_space<vmem>>, vector<1x1x128xf32>
    %18 = vector.shape_cast %17 : vector<1x1x128xf32> to vector<1x128xf32>
    %19 = arith.addf %16, %18 : vector<1x128xf32>
    %c0_16 = arith.constant 0 : index
    %c0_17 = arith.constant 0 : index
    %c0_18 = arith.constant 0 : index
    %20 = vector.load %arg3[%c0_16, %c0_17, %c0_18] : memref<1x16x8xf32, #tpu.memory_space<vmem>>, vector<1x16x8xf32>
    %21 = vector.shape_cast %20 : vector<1x16x8xf32> to vector<16x8xf32>
    %c0_19 = arith.constant 0 : index
    %c0_20 = arith.constant 0 : index
    %c0_21 = arith.constant 0 : index
    %22 = vector.load %arg10[%c0_19, %c0_20, %c0_21] : memref<1x8x128xf32, #tpu.memory_space<vmem>>, vector<1x8x128xf32>
    %23 = vector.shape_cast %22 : vector<1x8x128xf32> to vector<8x128xf32>
    %24 = arith.truncf %21 : vector<16x8xf32> to vector<16x8xbf16>
    %25 = arith.truncf %23 : vector<8x128xf32> to vector<8x128xbf16>
    %cst_22 = arith.constant dense<0.000000e+00> : vector<16x128xf32>
    %26 = tpu.matmul %24, %25, %cst_22 {dimension_numbers = #tpu.dot_dimension_numbers<[1], [0], [0], [1], [0, 0, 1, 1], [], []>} : vector<16x8xbf16>, vector<8x128xbf16>, vector<16x128xf32> -> vector<16x128xf32>
    %c0_23 = arith.constant 0 : index
    %c0_24 = arith.constant 0 : index
    %c0_25 = arith.constant 0 : index
    %27 = vector.load %arg11[%c0_23, %c0_24, %c0_25] : memref<1x1x128xf32, #tpu.memory_space<vmem>>, vector<1x1x128xf32>
    %28 = vector.shape_cast %27 : vector<1x1x128xf32> to vector<1x128xf32>
    %29 = vector.broadcast %28 : vector<1x128xf32> to vector<16x128xf32>
    %30 = arith.addf %26, %29 : vector<16x128xf32>
    %c0_26 = arith.constant 0 : index
    %c0_27 = arith.constant 0 : index
    %c0_28 = arith.constant 0 : index
    %31 = vector.load %arg4[%c0_26, %c0_27, %c0_28] : memref<1x16x128xf32, #tpu.memory_space<vmem>>, vector<1x16x128xf32>
    %32 = vector.shape_cast %31 : vector<1x16x128xf32> to vector<16x128xf32>
    %33 = tpu.concatenate %30, %32 in 1 : vector<16x128xf32>, vector<16x128xf32> -> vector<16x256xf32>
    %c0_29 = arith.constant 0 : index
    %c0_30 = arith.constant 0 : index
    %c0_31 = arith.constant 0 : index
    %34 = vector.load %arg12[%c0_29, %c0_30, %c0_31] : memref<1x256x128xf32, #tpu.memory_space<vmem>>, vector<1x256x128xf32>
    %35 = vector.shape_cast %34 : vector<1x256x128xf32> to vector<256x128xf32>
    %36 = arith.truncf %33 : vector<16x256xf32> to vector<16x256xbf16>
    %37 = arith.truncf %35 : vector<256x128xf32> to vector<256x128xbf16>
    %cst_32 = arith.constant dense<0.000000e+00> : vector<16x128xf32>
    %38 = tpu.matmul %36, %37, %cst_32 {dimension_numbers = #tpu.dot_dimension_numbers<[1], [0], [0], [1], [0, 0, 1, 1], [], []>} : vector<16x256xbf16>, vector<256x128xbf16>, vector<16x128xf32> -> vector<16x128xf32>
    %c0_33 = arith.constant 0 : index
    %c0_34 = arith.constant 0 : index
    %c0_35 = arith.constant 0 : index
    %39 = vector.load %arg13[%c0_33, %c0_34, %c0_35] : memref<1x1x128xf32, #tpu.memory_space<vmem>>, vector<1x1x128xf32>
    %40 = vector.shape_cast %39 : vector<1x1x128xf32> to vector<1x128xf32>
    %41 = vector.broadcast %40 : vector<1x128xf32> to vector<16x128xf32>
    %42 = arith.addf %38, %41 : vector<16x128xf32>
    %43 = arith.negf %42 : vector<16x128xf32>
    %44 = math.exp %43 : vector<16x128xf32>
    %cst_36 = arith.constant 1.000000e+00 : f32
    %45 = vector.broadcast %cst_36 : f32 to vector<16x128xf32>
    %46 = arith.addf %45, %44 : vector<16x128xf32>
    %47 = arith.divf %45, %46 : vector<16x128xf32>
    %48 = arith.mulf %42, %47 : vector<16x128xf32>
    %c0_37 = arith.constant 0 : index
    %c0_38 = arith.constant 0 : index
    %c0_39 = arith.constant 0 : index
    %49 = vector.load %arg14[%c0_37, %c0_38, %c0_39] : memref<1x128x128xf32, #tpu.memory_space<vmem>>, vector<1x128x128xf32>
    %50 = vector.shape_cast %49 : vector<1x128x128xf32> to vector<128x128xf32>
    %51 = arith.truncf %48 : vector<16x128xf32> to vector<16x128xbf16>
    %52 = arith.truncf %50 : vector<128x128xf32> to vector<128x128xbf16>
    %cst_40 = arith.constant dense<0.000000e+00> : vector<16x128xf32>
    %53 = tpu.matmul %51, %52, %cst_40 {dimension_numbers = #tpu.dot_dimension_numbers<[1], [0], [0], [1], [0, 0, 1, 1], [], []>} : vector<16x128xbf16>, vector<128x128xbf16>, vector<16x128xf32> -> vector<16x128xf32>
    %c0_41 = arith.constant 0 : index
    %c0_42 = arith.constant 0 : index
    %c0_43 = arith.constant 0 : index
    %54 = vector.load %arg15[%c0_41, %c0_42, %c0_43] : memref<1x1x128xf32, #tpu.memory_space<vmem>>, vector<1x1x128xf32>
    %55 = vector.shape_cast %54 : vector<1x1x128xf32> to vector<1x128xf32>
    %56 = vector.broadcast %55 : vector<1x128xf32> to vector<16x128xf32>
    %57 = arith.addf %53, %56 : vector<16x128xf32>
    %c0_44 = arith.constant 0 : index
    %c0_45 = arith.constant 0 : index
    %58 = vector.load %arg5[%c0_44, %c0_45] : memref<16x128xf32, #tpu.memory_space<vmem>>, vector<16x128xf32>
    %59 = arith.addf %57, %58 : vector<16x128xf32>
    %60 = tpu.concatenate %19, %59 in 0 : vector<1x128xf32>, vector<16x128xf32> -> vector<17x128xf32>
    %c0_46 = arith.constant 0 : index
    %c0_47 = arith.constant 0 : index
    %c0_48 = arith.constant 0 : index
    %61 = vector.load %arg16[%c0_46, %c0_47, %c0_48] : memref<1x17x128xf32, #tpu.memory_space<vmem>>, vector<1x17x128xf32>
    %62 = vector.shape_cast %61 : vector<1x17x128xf32> to vector<17x128xf32>
    %63 = vector.shape_cast %60 : vector<17x128xf32> to vector<1x17x128xf32>
    tpu.vector_store %arg16[%c0_46, %c0_47, %c0_48], %63 {strides = array<i32>} : memref<1x17x128xf32, #tpu.memory_space<vmem>>, vector<1x17x128xf32>,
    return
  }
  func.func @transform_0(%arg0: i32, %arg1: memref<2xi32, #tpu.memory_space<smem>>) -> (i32, i32, i32) {
    %c0_i32 = arith.constant 0 : i32
    %c0_i32_0 = arith.constant 0 : i32
    %c0_i32_1 = arith.constant 0 : i32
    return %arg0, %c0_i32, %c0_i32_0 : i32, i32, i32
  }
  func.func @transform_1(%arg0: i32, %arg1: memref<2xi32, #tpu.memory_space<smem>>) -> (i32, i32, i32) {
    %c0_i32 = arith.constant 0 : i32
    %c0_i32_0 = arith.constant 0 : i32
    %c0_i32_1 = arith.constant 0 : i32
    return %arg0, %c0_i32, %c0_i32_0 : i32, i32, i32
  }
  func.func @transform_2(%arg0: i32, %arg1: memref<2xi32, #tpu.memory_space<smem>>) -> (i32, i32, i32) {
    %c0_i32 = arith.constant 0 : i32
    %c0_i32_0 = arith.constant 0 : i32
    %c0_i32_1 = arith.constant 0 : i32
    return %arg0, %c0_i32, %c0_i32_0 : i32, i32, i32
  }
  func.func @transform_3(%arg0: i32, %arg1: memref<2xi32, #tpu.memory_space<smem>>) -> (i32, i32) {
    %c0_i32 = arith.constant 0 : i32
    %c0_i32_0 = arith.constant 0 : i32
    %c0_i32_1 = arith.constant 0 : i32
    return %c0_i32, %c0_i32_0 : i32, i32
  }
  func.func @transform_4(%arg0: i32, %arg1: memref<2xi32, #tpu.memory_space<smem>>) -> (i32, i32, i32) {
    %0 = arith.index_cast %arg0 : i32 to index
    %1 = memref.load %arg1[%0] : memref<2xi32, #tpu.memory_space<smem>>
    %c0_i32 = arith.constant 0 : i32
    %c0_i32_0 = arith.constant 0 : i32
    %c0_i32_1 = arith.constant 0 : i32
    return %1, %c0_i32, %c0_i32_0 : i32, i32, i32
  }
  func.func @transform_5(%arg0: i32, %arg1: memref<2xi32, #tpu.memory_space<smem>>) -> (i32, i32, i32) {
    %0 = arith.index_cast %arg0 : i32 to index
    %1 = memref.load %arg1[%0] : memref<2xi32, #tpu.memory_space<smem>>
    %c0_i32 = arith.constant 0 : i32
    %c0_i32_0 = arith.constant 0 : i32
    %c0_i32_1 = arith.constant 0 : i32
    return %1, %c0_i32, %c0_i32_0 : i32, i32, i32
  }
  func.func @transform_6(%arg0: i32, %arg1: memref<2xi32, #tpu.memory_space<smem>>) -> (i32, i32, i32) {
    %0 = arith.index_cast %arg0 : i32 to index
    %1 = memref.load %arg1[%0] : memref<2xi32, #tpu.memory_space<smem>>
    %c0_i32 = arith.constant 0 : i32
    %c0_i32_0 = arith.constant 0 : i32
    %c0_i32_1 = arith.constant 0 : i32
    return %1, %c0_i32, %c0_i32_0 : i32, i32, i32
  }
  func.func @transform_7(%arg0: i32, %arg1: memref<2xi32, #tpu.memory_space<smem>>) -> (i32, i32, i32) {
    %0 = arith.index_cast %arg0 : i32 to index
    %1 = memref.load %arg1[%0] : memref<2xi32, #tpu.memory_space<smem>>
    %c0_i32 = arith.constant 0 : i32
    %c0_i32_0 = arith.constant 0 : i32
    %c0_i32_1 = arith.constant 0 : i32
    return %1, %c0_i32, %c0_i32_0 : i32, i32, i32
  }
  func.func @transform_8(%arg0: i32, %arg1: memref<2xi32, #tpu.memory_space<smem>>) -> (i32, i32, i32) {
    %0 = arith.index_cast %arg0 : i32 to index
    %1 = memref.load %arg1[%0] : memref<2xi32, #tpu.memory_space<smem>>
    %c0_i32 = arith.constant 0 : i32
    %c0_i32_0 = arith.constant 0 : i32
    %c0_i32_1 = arith.constant 0 : i32
    return %1, %c0_i32, %c0_i32_0 : i32, i32, i32
  }
  func.func @transform_9(%arg0: i32, %arg1: memref<2xi32, #tpu.memory_space<smem>>) -> (i32, i32, i32) {
    %0 = arith.index_cast %arg0 : i32 to index
    %1 = memref.load %arg1[%0] : memref<2xi32, #tpu.memory_space<smem>>
    %c0_i32 = arith.constant 0 : i32
    %c0_i32_0 = arith.constant 0 : i32
    %c0_i32_1 = arith.constant 0 : i32
    return %1, %c0_i32, %c0_i32_0 : i32, i32, i32
  }
  func.func @transform_10(%arg0: i32, %arg1: memref<2xi32, #tpu.memory_space<smem>>) -> (i32, i32, i32) {
    %0 = arith.index_cast %arg0 : i32 to index
    %1 = memref.load %arg1[%0] : memref<2xi32, #tpu.memory_space<smem>>
    %c0_i32 = arith.constant 0 : i32
    %c0_i32_0 = arith.constant 0 : i32
    %c0_i32_1 = arith.constant 0 : i32
    return %1, %c0_i32, %c0_i32_0 : i32, i32, i32
  }
  func.func @transform_11(%arg0: i32, %arg1: memref<2xi32, #tpu.memory_space<smem>>) -> (i32, i32, i32) {
    %0 = arith.index_cast %arg0 : i32 to index
    %1 = memref.load %arg1[%0] : memref<2xi32, #tpu.memory_space<smem>>
    %c0_i32 = arith.constant 0 : i32
    %c0_i32_0 = arith.constant 0 : i32
    %c0_i32_1 = arith.constant 0 : i32
    return %1, %c0_i32, %c0_i32_0 : i32, i32, i32
  }
  func.func @transform_12(%arg0: i32, %arg1: memref<2xi32, #tpu.memory_space<smem>>) -> (i32, i32, i32) {
    %0 = arith.index_cast %arg0 : i32 to index
    %1 = memref.load %arg1[%0] : memref<2xi32, #tpu.memory_space<smem>>
    %c0_i32 = arith.constant 0 : i32
    %c0_i32_0 = arith.constant 0 : i32
    %c0_i32_1 = arith.constant 0 : i32
    return %1, %c0_i32, %c0_i32_0 : i32, i32, i32
  }
  func.func @transform_13(%arg0: i32, %arg1: memref<2xi32, #tpu.memory_space<smem>>) -> (i32, i32, i32) {
    %0 = arith.index_cast %arg0 : i32 to index
    %1 = memref.load %arg1[%0] : memref<2xi32, #tpu.memory_space<smem>>
    %c0_i32 = arith.constant 0 : i32
    %c0_i32_0 = arith.constant 0 : i32
    %c0_i32_1 = arith.constant 0 : i32
    return %1, %c0_i32, %c0_i32_0 : i32, i32, i32
  }
  func.func @transform_14(%arg0: i32, %arg1: memref<2xi32, #tpu.memory_space<smem>>) -> (i32, i32, i32) {
    %c0_i32 = arith.constant 0 : i32
    %c0_i32_0 = arith.constant 0 : i32
    %c0_i32_1 = arith.constant 0 : i32
    return %arg0, %c0_i32, %c0_i32_0 : i32, i32, i32
  }
}

module attributes {stable_mosaic.version = 11 : i64} {
  func.func @_dit_kernel(%arg0: memref<34x128xf32, #tpu.memory_space<vmem>>, %arg1: memref<32x128xf32, #tpu.memory_space<vmem>>, %arg2: memref<2x16xf32, #tpu.memory_space<vmem>>, %arg3: memref<34x128xf32, #tpu.memory_space<vmem>>, %arg4: memref<128x128xf32, #tpu.memory_space<vmem>>, %arg5: memref<1x128xf32, #tpu.memory_space<vmem>>, %arg6: memref<128x128xf32, #tpu.memory_space<vmem>>, %arg7: memref<1x128xf32, #tpu.memory_space<vmem>>, %arg8: memref<128x128xf32, #tpu.memory_space<vmem>>, %arg9: memref<1x128xf32, #tpu.memory_space<vmem>>, %arg10: memref<128x256xf32, #tpu.memory_space<vmem>>, %arg11: memref<1x256xf32, #tpu.memory_space<vmem>>, %arg12: memref<128x128xf32, #tpu.memory_space<vmem>>, %arg13: memref<1x128xf32, #tpu.memory_space<vmem>>, %arg14: memref<128x256xf32, #tpu.memory_space<vmem>>, %arg15: memref<1x256xf32, #tpu.memory_space<vmem>>, %arg16: memref<256x128xf32, #tpu.memory_space<vmem>>, %arg17: memref<1x128xf32, #tpu.memory_space<vmem>>, %arg18: memref<34x128xf32, #tpu.memory_space<vmem>>) attributes {dimension_semantics = [], scalar_prefetch = 0 : i64, scratch_operands = 0 : i64, tpu.core_type = #tpu.core_type<tc>} {
    %c0 = arith.constant 0 : index
    %c0_0 = arith.constant 0 : index
    %0 = vector.load %arg0[%c0, %c0_0] : memref<34x128xf32, #tpu.memory_space<vmem>>, vector<34x128xf32>
    %c0_1 = arith.constant 0 : index
    %c0_2 = arith.constant 0 : index
    %1 = vector.load %arg4[%c0_1, %c0_2] : memref<128x128xf32, #tpu.memory_space<vmem>>, vector<128x128xf32>
    %2 = arith.truncf %0 : vector<34x128xf32> to vector<34x128xbf16>
    %3 = arith.truncf %1 : vector<128x128xf32> to vector<128x128xbf16>
    %cst = arith.constant dense<0.000000e+00> : vector<34x128xf32>
    %4 = tpu.matmul %2, %3, %cst {dimension_numbers = #tpu.dot_dimension_numbers<[1], [0], [0], [1], [0, 0, 1, 1], [], []>} : vector<34x128xbf16>, vector<128x128xbf16>, vector<34x128xf32> -> vector<34x128xf32>
    %c0_3 = arith.constant 0 : index
    %c0_4 = arith.constant 0 : index
    %5 = vector.load %arg5[%c0_3, %c0_4] : memref<1x128xf32, #tpu.memory_space<vmem>>, vector<1x128xf32>
    %6 = vector.broadcast %5 : vector<1x128xf32> to vector<34x128xf32>
    %7 = arith.addf %4, %6 : vector<34x128xf32>
    %c0_5 = arith.constant 0 : index
    %c0_6 = arith.constant 0 : index
    %8 = vector.load %arg3[%c0_5, %c0_6] : memref<34x128xf32, #tpu.memory_space<vmem>>, vector<34x128xf32>
    %c0_7 = arith.constant 0 : index
    %c0_8 = arith.constant 0 : index
    %9 = vector.load %arg6[%c0_7, %c0_8] : memref<128x128xf32, #tpu.memory_space<vmem>>, vector<128x128xf32>
    %10 = arith.truncf %8 : vector<34x128xf32> to vector<34x128xbf16>
    %11 = arith.truncf %9 : vector<128x128xf32> to vector<128x128xbf16>
    %cst_9 = arith.constant dense<0.000000e+00> : vector<34x128xf32>
    %12 = tpu.matmul %10, %11, %cst_9 {dimension_numbers = #tpu.dot_dimension_numbers<[1], [0], [0], [1], [0, 0, 1, 1], [], []>} : vector<34x128xbf16>, vector<128x128xbf16>, vector<34x128xf32> -> vector<34x128xf32>
    %c0_10 = arith.constant 0 : index
    %c0_11 = arith.constant 0 : index
    %13 = vector.load %arg7[%c0_10, %c0_11] : memref<1x128xf32, #tpu.memory_space<vmem>>, vector<1x128xf32>
    %14 = vector.broadcast %13 : vector<1x128xf32> to vector<34x128xf32>
    %15 = arith.addf %12, %14 : vector<34x128xf32>
    %16 = arith.negf %15 : vector<34x128xf32>
    %17 = math.exp %16 : vector<34x128xf32>
    %cst_12 = arith.constant 1.000000e+00 : f32
    %18 = vector.broadcast %cst_12 : f32 to vector<34x128xf32>
    %19 = arith.addf %18, %17 : vector<34x128xf32>
    %20 = arith.divf %18, %19 : vector<34x128xf32>
    %21 = arith.mulf %15, %20 : vector<34x128xf32>
    %22 = arith.addf %7, %21 : vector<34x128xf32>
    %c0_13 = arith.constant 0 : index
    %c0_14 = arith.constant 0 : index
    %23 = vector.load %arg8[%c0_13, %c0_14] : memref<128x128xf32, #tpu.memory_space<vmem>>, vector<128x128xf32>
    %24 = arith.truncf %22 : vector<34x128xf32> to vector<34x128xbf16>
    %25 = arith.truncf %23 : vector<128x128xf32> to vector<128x128xbf16>
    %cst_15 = arith.constant dense<0.000000e+00> : vector<34x128xf32>
    %26 = tpu.matmul %24, %25, %cst_15 {dimension_numbers = #tpu.dot_dimension_numbers<[1], [0], [0], [1], [0, 0, 1, 1], [], []>} : vector<34x128xbf16>, vector<128x128xbf16>, vector<34x128xf32> -> vector<34x128xf32>
    %c0_16 = arith.constant 0 : index
    %c0_17 = arith.constant 0 : index
    %27 = vector.load %arg9[%c0_16, %c0_17] : memref<1x128xf32, #tpu.memory_space<vmem>>, vector<1x128xf32>
    %28 = vector.broadcast %27 : vector<1x128xf32> to vector<34x128xf32>
    %29 = arith.addf %26, %28 : vector<34x128xf32>
    %c0_18 = arith.constant 0 : index
    %c0_19 = arith.constant 0 : index
    %30 = vector.load %arg1[%c0_18, %c0_19] : memref<32x128xf32, #tpu.memory_space<vmem>>, vector<32x128xf32>
    %c0_20 = arith.constant 0 : index
    %c0_21 = arith.constant 0 : index
    %31 = vector.load %arg10[%c0_20, %c0_21] : memref<128x256xf32, #tpu.memory_space<vmem>>, vector<128x256xf32>
    %32 = arith.truncf %30 : vector<32x128xf32> to vector<32x128xbf16>
    %33 = arith.truncf %31 : vector<128x256xf32> to vector<128x256xbf16>
    %cst_22 = arith.constant dense<0.000000e+00> : vector<32x256xf32>
    %34 = tpu.matmul %32, %33, %cst_22 {dimension_numbers = #tpu.dot_dimension_numbers<[1], [0], [0], [1], [0, 0, 1, 1], [], []>} : vector<32x128xbf16>, vector<128x256xbf16>, vector<32x256xf32> -> vector<32x256xf32>
    %c0_23 = arith.constant 0 : index
    %c0_24 = arith.constant 0 : index
    %35 = vector.load %arg11[%c0_23, %c0_24] : memref<1x256xf32, #tpu.memory_space<vmem>>, vector<1x256xf32>
    %36 = vector.broadcast %35 : vector<1x256xf32> to vector<32x256xf32>
    %37 = arith.addf %34, %36 : vector<32x256xf32>
    %38 = vector.extract_strided_slice %37 {offsets = [0, 0], sizes = [32, 128], strides = [1, 1]} : vector<32x256xf32> to vector<32x128xf32>
    %39 = vector.extract_strided_slice %37 {offsets = [0, 128], sizes = [32, 128], strides = [1, 1]} : vector<32x256xf32> to vector<32x128xf32>
    %c0_25 = arith.constant 0 : index
    %c0_26 = arith.constant 0 : index
    %40 = vector.load %arg2[%c0_25, %c0_26] : memref<2x16xf32, #tpu.memory_space<vmem>>, vector<2x16xf32>
    %41 = vector.extract_strided_slice %29 {offsets = [0, 0], sizes = [17, 128], strides = [1, 1]} : vector<34x128xf32> to vector<17x128xf32>
    %42 = vector.extract_strided_slice %38 {offsets = [0, 0], sizes = [16, 128], strides = [1, 1]} : vector<32x128xf32> to vector<16x128xf32>
    %43 = vector.extract_strided_slice %39 {offsets = [0, 0], sizes = [16, 128], strides = [1, 1]} : vector<32x128xf32> to vector<16x128xf32>
    %44 = arith.truncf %41 : vector<17x128xf32> to vector<17x128xbf16>
    %45 = arith.truncf %42 : vector<16x128xf32> to vector<16x128xbf16>
    %cst_27 = arith.constant dense<0.000000e+00> : vector<17x16xf32>
    %46 = tpu.matmul %44, %45, %cst_27 {dimension_numbers = #tpu.dot_dimension_numbers<[1], [1], [0], [0], [0, 0, 1, 0], [], []>} : vector<17x128xbf16>, vector<16x128xbf16>, vector<17x16xf32> -> vector<17x16xf32>
    %cst_28 = arith.constant 0.0883883461 : f32
    %47 = vector.broadcast %cst_28 : f32 to vector<17x16xf32>
    %48 = arith.mulf %46, %47 : vector<17x16xf32>
    %49 = vector.extract_strided_slice %40 {offsets = [0, 0], sizes = [1, 16], strides = [1, 1]} : vector<2x16xf32> to vector<1x16xf32>
    %cst_29 = arith.constant 5.000000e-01 : f32
    %50 = vector.broadcast %cst_29 : f32 to vector<1x16xf32>
    %51 = arith.cmpf ogt, %49, %50 : vector<1x16xf32>
    %cst_30 = arith.constant -1.000000e+30 : f32
    %52 = vector.shape_cast %51 : vector<1x16xi1> to vector<1x16xi1>
    %53 = vector.broadcast %52 : vector<1x16xi1> to vector<17x16xi1>
    %54 = vector.broadcast %cst_30 : f32 to vector<17x16xf32>
    %55 = arith.select %53, %48, %54 : vector<17x16xi1>, vector<17x16xf32>
    %cst_31 = arith.constant dense<0xFF800000> : vector<17xf32>
    %56 = vector.multi_reduction <maximumf>, %55, %cst_31 [1] : vector<17x16xf32> to vector<17xf32>
    %57 = vector.shape_cast %56 : vector<17xf32> to vector<17x1xf32>
    %58 = vector.broadcast %57 : vector<17x1xf32> to vector<17x16xf32>
    %59 = arith.subf %55, %58 : vector<17x16xf32>
    %60 = math.exp %59 : vector<17x16xf32>
    %cst_32 = arith.constant dense<0.000000e+00> : vector<17xf32>
    %61 = vector.multi_reduction <add>, %60, %cst_32 [1] : vector<17x16xf32> to vector<17xf32>
    %62 = vector.shape_cast %61 : vector<17xf32> to vector<17x1xf32>
    %63 = tpu.reciprocal %62 {approx = true} : vector<17x1xf32> -> vector<17x1xf32>
    %64 = vector.broadcast %63 : vector<17x1xf32> to vector<17x16xf32>
    %65 = arith.mulf %60, %64 : vector<17x16xf32>
    %66 = arith.truncf %65 : vector<17x16xf32> to vector<17x16xbf16>
    %67 = arith.truncf %43 : vector<16x128xf32> to vector<16x128xbf16>
    %cst_33 = arith.constant dense<0.000000e+00> : vector<17x128xf32>
    %68 = tpu.matmul %66, %67, %cst_33 {dimension_numbers = #tpu.dot_dimension_numbers<[1], [0], [0], [1], [0, 0, 1, 1], [], []>} : vector<17x16xbf16>, vector<16x128xbf16>, vector<17x128xf32> -> vector<17x128xf32>
    %69 = vector.extract_strided_slice %29 {offsets = [17, 0], sizes = [17, 128], strides = [1, 1]} : vector<34x128xf32> to vector<17x128xf32>
    %70 = vector.extract_strided_slice %38 {offsets = [16, 0], sizes = [16, 128], strides = [1, 1]} : vector<32x128xf32> to vector<16x128xf32>
    %71 = vector.extract_strided_slice %39 {offsets = [16, 0], sizes = [16, 128], strides = [1, 1]} : vector<32x128xf32> to vector<16x128xf32>
    %72 = arith.truncf %69 : vector<17x128xf32> to vector<17x128xbf16>
    %73 = arith.truncf %70 : vector<16x128xf32> to vector<16x128xbf16>
    %cst_34 = arith.constant dense<0.000000e+00> : vector<17x16xf32>
    %74 = tpu.matmul %72, %73, %cst_34 {dimension_numbers = #tpu.dot_dimension_numbers<[1], [1], [0], [0], [0, 0, 1, 0], [], []>} : vector<17x128xbf16>, vector<16x128xbf16>, vector<17x16xf32> -> vector<17x16xf32>
    %cst_35 = arith.constant 0.0883883461 : f32
    %75 = vector.broadcast %cst_35 : f32 to vector<17x16xf32>
    %76 = arith.mulf %74, %75 : vector<17x16xf32>
    %77 = vector.extract_strided_slice %40 {offsets = [1, 0], sizes = [1, 16], strides = [1, 1]} : vector<2x16xf32> to vector<1x16xf32>
    %cst_36 = arith.constant 5.000000e-01 : f32
    %78 = vector.broadcast %cst_36 : f32 to vector<1x16xf32>
    %79 = arith.cmpf ogt, %77, %78 : vector<1x16xf32>
    %cst_37 = arith.constant -1.000000e+30 : f32
    %80 = vector.shape_cast %79 : vector<1x16xi1> to vector<1x16xi1>
    %81 = vector.broadcast %80 : vector<1x16xi1> to vector<17x16xi1>
    %82 = vector.broadcast %cst_37 : f32 to vector<17x16xf32>
    %83 = arith.select %81, %76, %82 : vector<17x16xi1>, vector<17x16xf32>
    %cst_38 = arith.constant dense<0xFF800000> : vector<17xf32>
    %84 = vector.multi_reduction <maximumf>, %83, %cst_38 [1] : vector<17x16xf32> to vector<17xf32>
    %85 = vector.shape_cast %84 : vector<17xf32> to vector<17x1xf32>
    %86 = vector.broadcast %85 : vector<17x1xf32> to vector<17x16xf32>
    %87 = arith.subf %83, %86 : vector<17x16xf32>
    %88 = math.exp %87 : vector<17x16xf32>
    %cst_39 = arith.constant dense<0.000000e+00> : vector<17xf32>
    %89 = vector.multi_reduction <add>, %88, %cst_39 [1] : vector<17x16xf32> to vector<17xf32>
    %90 = vector.shape_cast %89 : vector<17xf32> to vector<17x1xf32>
    %91 = tpu.reciprocal %90 {approx = true} : vector<17x1xf32> -> vector<17x1xf32>
    %92 = vector.broadcast %91 : vector<17x1xf32> to vector<17x16xf32>
    %93 = arith.mulf %88, %92 : vector<17x16xf32>
    %94 = arith.truncf %93 : vector<17x16xf32> to vector<17x16xbf16>
    %95 = arith.truncf %71 : vector<16x128xf32> to vector<16x128xbf16>
    %cst_40 = arith.constant dense<0.000000e+00> : vector<17x128xf32>
    %96 = tpu.matmul %94, %95, %cst_40 {dimension_numbers = #tpu.dot_dimension_numbers<[1], [0], [0], [1], [0, 0, 1, 1], [], []>} : vector<17x16xbf16>, vector<16x128xbf16>, vector<17x128xf32> -> vector<17x128xf32>
    %97 = tpu.concatenate %68, %96 in 0 : vector<17x128xf32>, vector<17x128xf32> -> vector<34x128xf32>
    %c0_41 = arith.constant 0 : index
    %c0_42 = arith.constant 0 : index
    %98 = vector.load %arg12[%c0_41, %c0_42] : memref<128x128xf32, #tpu.memory_space<vmem>>, vector<128x128xf32>
    %99 = arith.truncf %97 : vector<34x128xf32> to vector<34x128xbf16>
    %100 = arith.truncf %98 : vector<128x128xf32> to vector<128x128xbf16>
    %cst_43 = arith.constant dense<0.000000e+00> : vector<34x128xf32>
    %101 = tpu.matmul %99, %100, %cst_43 {dimension_numbers = #tpu.dot_dimension_numbers<[1], [0], [0], [1], [0, 0, 1, 1], [], []>} : vector<34x128xbf16>, vector<128x128xbf16>, vector<34x128xf32> -> vector<34x128xf32>
    %102 = arith.addf %22, %101 : vector<34x128xf32>
    %c0_44 = arith.constant 0 : index
    %c0_45 = arith.constant 0 : index
    %103 = vector.load %arg13[%c0_44, %c0_45] : memref<1x128xf32, #tpu.memory_space<vmem>>, vector<1x128xf32>
    %104 = vector.broadcast %103 : vector<1x128xf32> to vector<34x128xf32>
    %105 = arith.addf %102, %104 : vector<34x128xf32>
    %c0_46 = arith.constant 0 : index
    %c0_47 = arith.constant 0 : index
    %106 = vector.load %arg14[%c0_46, %c0_47] : memref<128x256xf32, #tpu.memory_space<vmem>>, vector<128x256xf32>
    %107 = arith.truncf %105 : vector<34x128xf32> to vector<34x128xbf16>
    %108 = arith.truncf %106 : vector<128x256xf32> to vector<128x256xbf16>
    %cst_48 = arith.constant dense<0.000000e+00> : vector<34x256xf32>
    %109 = tpu.matmul %107, %108, %cst_48 {dimension_numbers = #tpu.dot_dimension_numbers<[1], [0], [0], [1], [0, 0, 1, 1], [], []>} : vector<34x128xbf16>, vector<128x256xbf16>, vector<34x256xf32> -> vector<34x256xf32>
    %c0_49 = arith.constant 0 : index
    %c0_50 = arith.constant 0 : index
    %110 = vector.load %arg15[%c0_49, %c0_50] : memref<1x256xf32, #tpu.memory_space<vmem>>, vector<1x256xf32>
    %111 = vector.broadcast %110 : vector<1x256xf32> to vector<34x256xf32>
    %112 = arith.addf %109, %111 : vector<34x256xf32>
    %cst_51 = arith.constant 0.000000e+00 : f32
    %113 = vector.broadcast %cst_51 : f32 to vector<34x256xf32>
    %114 = arith.maximumf %112, %113 : vector<34x256xf32>
    %c0_52 = arith.constant 0 : index
    %c0_53 = arith.constant 0 : index
    %115 = vector.load %arg16[%c0_52, %c0_53] : memref<256x128xf32, #tpu.memory_space<vmem>>, vector<256x128xf32>
    %116 = arith.truncf %114 : vector<34x256xf32> to vector<34x256xbf16>
    %117 = arith.truncf %115 : vector<256x128xf32> to vector<256x128xbf16>
    %cst_54 = arith.constant dense<0.000000e+00> : vector<34x128xf32>
    %118 = tpu.matmul %116, %117, %cst_54 {dimension_numbers = #tpu.dot_dimension_numbers<[1], [0], [0], [1], [0, 0, 1, 1], [], []>} : vector<34x256xbf16>, vector<256x128xbf16>, vector<34x128xf32> -> vector<34x128xf32>
    %119 = arith.addf %105, %118 : vector<34x128xf32>
    %c0_55 = arith.constant 0 : index
    %c0_56 = arith.constant 0 : index
    %120 = vector.load %arg17[%c0_55, %c0_56] : memref<1x128xf32, #tpu.memory_space<vmem>>, vector<1x128xf32>
    %121 = vector.broadcast %120 : vector<1x128xf32> to vector<34x128xf32>
    %122 = arith.addf %119, %121 : vector<34x128xf32>
    %c0_57 = arith.constant 0 : index
    %c0_58 = arith.constant 0 : index
    %123 = vector.load %arg18[%c0_57, %c0_58] : memref<34x128xf32, #tpu.memory_space<vmem>>, vector<34x128xf32>
    tpu.vector_store %arg18[%c0_57, %c0_58], %122 {strides = array<i32>} : memref<34x128xf32, #tpu.memory_space<vmem>>, vector<34x128xf32>,
    return
  }
}

module attributes {stable_mosaic.version = 11 : i64} {
  func.func @_decoder_kernel(%arg0: i32, %arg1: memref<2xi32, #tpu.memory_space<smem>>, %arg2: memref<1x1x2176xf32, #tpu.memory_space<vmem>>, %arg3: memref<1x1x128xf32, #tpu.memory_space<vmem>>, %arg4: memref<1x1x128xf32, #tpu.memory_space<vmem>>, %arg5: memref<1x2176x128xf32, #tpu.memory_space<vmem>>, %arg6: memref<1x1x128xf32, #tpu.memory_space<vmem>>, %arg7: memref<1x128x128xf32, #tpu.memory_space<vmem>>, %arg8: memref<1x1x128xf32, #tpu.memory_space<vmem>>, %arg9: memref<1x1x128xf32, #tpu.memory_space<vmem>>) attributes {dimension_semantics = [#tpu.dimension_semantics<parallel>], iteration_bounds = array<i64: 2>, scalar_prefetch = 1 : i64, scratch_operands = 0 : i64, tpu.core_type = #tpu.core_type<tc>, window_params = [{transform_indices = @transform_0, window_bounds = array<i64: 1, 1, 2176>}, {transform_indices = @transform_1, window_bounds = array<i64: 1, 1, 128>}, {transform_indices = @transform_2, window_bounds = array<i64: 1, 1, 128>}, {transform_indices = @transform_3, window_bounds = array<i64: 1, 2176, 128>}, {transform_indices = @transform_4, window_bounds = array<i64: 1, 1, 128>}, {transform_indices = @transform_5, window_bounds = array<i64: 1, 128, 128>}, {transform_indices = @transform_6, window_bounds = array<i64: 1, 1, 128>}, {transform_indices = @transform_7, window_bounds = array<i64: 1, 1, 128>}]} {
    %c0 = arith.constant 0 : index
    %c0_0 = arith.constant 0 : index
    %c0_1 = arith.constant 0 : index
    %0 = vector.load %arg2[%c0, %c0_0, %c0_1] : memref<1x1x2176xf32, #tpu.memory_space<vmem>>, vector<1x1x2176xf32>
    %1 = vector.shape_cast %0 : vector<1x1x2176xf32> to vector<1x2176xf32>
    %c0_2 = arith.constant 0 : index
    %c0_3 = arith.constant 0 : index
    %c0_4 = arith.constant 0 : index
    %2 = vector.load %arg5[%c0_2, %c0_3, %c0_4] : memref<1x2176x128xf32, #tpu.memory_space<vmem>>, vector<1x2176x128xf32>
    %3 = vector.shape_cast %2 : vector<1x2176x128xf32> to vector<2176x128xf32>
    %4 = arith.truncf %1 : vector<1x2176xf32> to vector<1x2176xbf16>
    %5 = arith.truncf %3 : vector<2176x128xf32> to vector<2176x128xbf16>
    %cst = arith.constant dense<0.000000e+00> : vector<1x128xf32>
    %6 = tpu.matmul %4, %5, %cst {dimension_numbers = #tpu.dot_dimension_numbers<[1], [0], [0], [1], [0, 0, 1, 1], [], []>} : vector<1x2176xbf16>, vector<2176x128xbf16>, vector<1x128xf32> -> vector<1x128xf32>
    %c0_5 = arith.constant 0 : index
    %c0_6 = arith.constant 0 : index
    %c0_7 = arith.constant 0 : index
    %7 = vector.load %arg6[%c0_5, %c0_6, %c0_7] : memref<1x1x128xf32, #tpu.memory_space<vmem>>, vector<1x1x128xf32>
    %8 = vector.shape_cast %7 : vector<1x1x128xf32> to vector<1x128xf32>
    %9 = arith.addf %6, %8 : vector<1x128xf32>
    %cst_8 = arith.constant 0.000000e+00 : f32
    %10 = vector.broadcast %cst_8 : f32 to vector<1x128xf32>
    %11 = arith.maximumf %9, %10 : vector<1x128xf32>
    %c0_9 = arith.constant 0 : index
    %c0_10 = arith.constant 0 : index
    %c0_11 = arith.constant 0 : index
    %12 = vector.load %arg7[%c0_9, %c0_10, %c0_11] : memref<1x128x128xf32, #tpu.memory_space<vmem>>, vector<1x128x128xf32>
    %13 = vector.shape_cast %12 : vector<1x128x128xf32> to vector<128x128xf32>
    %14 = arith.truncf %11 : vector<1x128xf32> to vector<1x128xbf16>
    %15 = arith.truncf %13 : vector<128x128xf32> to vector<128x128xbf16>
    %cst_12 = arith.constant dense<0.000000e+00> : vector<1x128xf32>
    %16 = tpu.matmul %14, %15, %cst_12 {dimension_numbers = #tpu.dot_dimension_numbers<[1], [0], [0], [1], [0, 0, 1, 1], [], []>} : vector<1x128xbf16>, vector<128x128xbf16>, vector<1x128xf32> -> vector<1x128xf32>
    %c0_13 = arith.constant 0 : index
    %c0_14 = arith.constant 0 : index
    %c0_15 = arith.constant 0 : index
    %17 = vector.load %arg8[%c0_13, %c0_14, %c0_15] : memref<1x1x128xf32, #tpu.memory_space<vmem>>, vector<1x1x128xf32>
    %18 = vector.shape_cast %17 : vector<1x1x128xf32> to vector<1x128xf32>
    %19 = arith.addf %16, %18 : vector<1x128xf32>
    %c0_16 = arith.constant 0 : index
    %c0_17 = arith.constant 0 : index
    %c0_18 = arith.constant 0 : index
    %20 = vector.load %arg3[%c0_16, %c0_17, %c0_18] : memref<1x1x128xf32, #tpu.memory_space<vmem>>, vector<1x1x128xf32>
    %21 = vector.shape_cast %20 : vector<1x1x128xf32> to vector<1x128xf32>
    %22 = arith.subf %19, %21 : vector<1x128xf32>
    %23 = arith.mulf %22, %22 : vector<1x128xf32>
    %c0_19 = arith.constant 0 : index
    %c0_20 = arith.constant 0 : index
    %c0_21 = arith.constant 0 : index
    %24 = vector.load %arg4[%c0_19, %c0_20, %c0_21] : memref<1x1x128xf32, #tpu.memory_space<vmem>>, vector<1x1x128xf32>
    %25 = vector.shape_cast %24 : vector<1x1x128xf32> to vector<1x128xf32>
    %26 = arith.mulf %23, %25 : vector<1x128xf32>
    %c0_22 = arith.constant 0 : index
    %c0_23 = arith.constant 0 : index
    %c0_24 = arith.constant 0 : index
    %27 = vector.load %arg9[%c0_22, %c0_23, %c0_24] : memref<1x1x128xf32, #tpu.memory_space<vmem>>, vector<1x1x128xf32>
    %28 = vector.shape_cast %27 : vector<1x1x128xf32> to vector<1x128xf32>
    %29 = vector.shape_cast %26 : vector<1x128xf32> to vector<1x1x128xf32>
    tpu.vector_store %arg9[%c0_22, %c0_23, %c0_24], %29 {strides = array<i32>} : memref<1x1x128xf32, #tpu.memory_space<vmem>>, vector<1x1x128xf32>,
    return
  }
  func.func @transform_0(%arg0: i32, %arg1: memref<2xi32, #tpu.memory_space<smem>>) -> (i32, i32, i32) {
    %c0_i32 = arith.constant 0 : i32
    %c0_i32_0 = arith.constant 0 : i32
    %c0_i32_1 = arith.constant 0 : i32
    return %arg0, %c0_i32, %c0_i32_0 : i32, i32, i32
  }
  func.func @transform_1(%arg0: i32, %arg1: memref<2xi32, #tpu.memory_space<smem>>) -> (i32, i32, i32) {
    %c0_i32 = arith.constant 0 : i32
    %c0_i32_0 = arith.constant 0 : i32
    %c0_i32_1 = arith.constant 0 : i32
    return %arg0, %c0_i32, %c0_i32_0 : i32, i32, i32
  }
  func.func @transform_2(%arg0: i32, %arg1: memref<2xi32, #tpu.memory_space<smem>>) -> (i32, i32, i32) {
    %c0_i32 = arith.constant 0 : i32
    %c0_i32_0 = arith.constant 0 : i32
    %c0_i32_1 = arith.constant 0 : i32
    return %arg0, %c0_i32, %c0_i32_0 : i32, i32, i32
  }
  func.func @transform_3(%arg0: i32, %arg1: memref<2xi32, #tpu.memory_space<smem>>) -> (i32, i32, i32) {
    %0 = arith.index_cast %arg0 : i32 to index
    %1 = memref.load %arg1[%0] : memref<2xi32, #tpu.memory_space<smem>>
    %c0_i32 = arith.constant 0 : i32
    %c0_i32_0 = arith.constant 0 : i32
    %c0_i32_1 = arith.constant 0 : i32
    return %1, %c0_i32, %c0_i32_0 : i32, i32, i32
  }
  func.func @transform_4(%arg0: i32, %arg1: memref<2xi32, #tpu.memory_space<smem>>) -> (i32, i32, i32) {
    %0 = arith.index_cast %arg0 : i32 to index
    %1 = memref.load %arg1[%0] : memref<2xi32, #tpu.memory_space<smem>>
    %c0_i32 = arith.constant 0 : i32
    %c0_i32_0 = arith.constant 0 : i32
    %c0_i32_1 = arith.constant 0 : i32
    return %1, %c0_i32, %c0_i32_0 : i32, i32, i32
  }
  func.func @transform_5(%arg0: i32, %arg1: memref<2xi32, #tpu.memory_space<smem>>) -> (i32, i32, i32) {
    %0 = arith.index_cast %arg0 : i32 to index
    %1 = memref.load %arg1[%0] : memref<2xi32, #tpu.memory_space<smem>>
    %c0_i32 = arith.constant 0 : i32
    %c0_i32_0 = arith.constant 0 : i32
    %c0_i32_1 = arith.constant 0 : i32
    return %1, %c0_i32, %c0_i32_0 : i32, i32, i32
  }
  func.func @transform_6(%arg0: i32, %arg1: memref<2xi32, #tpu.memory_space<smem>>) -> (i32, i32, i32) {
    %0 = arith.index_cast %arg0 : i32 to index
    %1 = memref.load %arg1[%0] : memref<2xi32, #tpu.memory_space<smem>>
    %c0_i32 = arith.constant 0 : i32
    %c0_i32_0 = arith.constant 0 : i32
    %c0_i32_1 = arith.constant 0 : i32
    return %1, %c0_i32, %c0_i32_0 : i32, i32, i32
  }
  func.func @transform_7(%arg0: i32, %arg1: memref<2xi32, #tpu.memory_space<smem>>) -> (i32, i32, i32) {
    %c0_i32 = arith.constant 0 : i32
    %c0_i32_0 = arith.constant 0 : i32
    %c0_i32_1 = arith.constant 0 : i32
    return %arg0, %c0_i32, %c0_i32_0 : i32, i32, i32
  }
}

</mosaic_0001>

<bundles_post_ra>
// kernel: run.3
= control target key start
LH: loop header
LB: loop body
LE: loop exit
PB: predicated region body
PF: predicated region fallthrough
CT: control target
= control target key end

     0   :  { %s2536_s0 = inlined_call_operand.hbm [shape: s32[2], index: 0, kind: input, shape index: {}]   ;;  %s2537_s1 = inlined_call_operand.hbm [shape: f32[2,1,64], index: 1, kind: input, shape index: {}]   ;;  %s2538_s2 = inlined_call_operand.vmem [shape: f32[2,16,8], index: 2, kind: input, shape index: {}]   ;;  %s2539_s3 = inlined_call_operand.vmem [shape: f32[2,16,128], index: 3, kind: input, shape index: {}]   ;;  %s2540_s4 = inlined_call_operand.hbm [shape: f32[16,128], index: 4, kind: input, shape index: {}]   ;;  %s2541_s5 = inlined_call_operand.vmem [shape: f32[4,64,128], index: 5, kind: input, shape index: {}]   ;;  %s2542_s6 = inlined_call_operand.vmem [shape: f32[4,1,128], index: 6, kind: input, shape index: {}, may-alias: {6,8,10,12,14}]   ;;  %s2543_s7 = inlined_call_operand.vmem [shape: f32[4,128,128], index: 7, kind: input, shape index: {}]   ;;  %s2544_s8 = inlined_call_operand.vmem [shape: f32[4,1,128], index: 8, kind: input, shape index: {}, may-alias: {6,8,10,12,14}]   ;;  %s2545_s9 = inlined_call_operand.hbm [shape: f32[4,8,128], index: 9, kind: input, shape index: {}]   ;;  %s2546_s10 = inlined_call_operand.vmem [shape: f32[4,1,128], index: 10, kind: input, shape index: {}, may-alias: {6,8,10,12,14}]   ;;  %s2547_s11 = inlined_call_operand.vmem [shape: f32[4,256,128], index: 11, kind: input, shape index: {}]   ;;  %s2548_s12 = inlined_call_operand.vmem [shape: f32[4,1,128], index: 12, kind: input, shape index: {}, may-alias: {6,8,10,12,14}]   ;;  %s2549_s13 = inlined_call_operand.hbm [shape: f32[4,128,128], index: 13, kind: input, shape index: {}]   ;;  %s2550_s14 = inlined_call_operand.vmem [shape: f32[4,1,128], index: 14, kind: input, shape index: {}, may-alias: {6,8,10,12,14}]   ;;  %s2551_s15 = inlined_call_operand.vmem [shape: f32[2,17,128], index: 15, kind: output, shape index: {}]  }
   0x1   :  { %2562 = sst [smem:[#allocation24_spill]] %s2537_s1  ;;  %s1693_s20 = scalar_lea.hbm %s2536_s0, 16 }
   0x2   :  { %2563 = sst [smem:[#allocation25_spill]] %s2538_s2  ;;  %p1694_p0 = scmp.ne.s32.totalorder %s2536_s0, %s1693_s20 }
   0x3   :  { %2564 = sst [smem:[#allocation26_spill]] %s2539_s3  ;;  %p1697_p1 = scmp.lt.u32.totalorder %s1693_s20, %s2536_s0 }
   0x4   :  { %2565 = sst [smem:[#allocation27_spill]] %s2542_s6 }
   0x5   :  { %2566 = sst [smem:[#allocation28_spill]] %s2543_s7  ;;  %p1699_p2 = pnand %p1697_p1, %p1694_p0 }
   0x6   :  { %2567 = sst [smem:[#allocation29_spill]] %s2544_s8 }
   0x7   :  { %2568 = sst [smem:[#allocation30_spill]] %s2546_s10 }
   0x8   :  { %2569 = sst [smem:[#allocation31_spill]] %s2547_s11 }
   0x9   :  { %2570 = sst [smem:[#allocation32_spill]] %s2548_s12 }
   0xa   :  { %2571 = sst [smem:[#allocation33_spill]] %s2550_s14 }
   0xb   :  { %2572 = sst [smem:[#allocation34_spill]] %s2551_s15 }
   0xc   :  { %1702 = shalt.err (!%p1699_p2)  }
   0xd   :  { %s1919_s25 = smov [#allocation3]  }
   0xe   :  { %21 = dma.hbm_to_smem %s2536_s0, 16, %s1919_s25, [#allocation2] }
   0xf   :  { %1861 = dma.done.wait [#allocation2], 16 }
  0x10   :  { %1862 = vsyncadd [#allocation2], 4294967280 }
  0x11   :  { %23 = sfence }
  0x12   :  { %24 = vsyncpa [#allocation5], 0 }
  0x13   :  { %26 = vsyncpa [#allocation5 + $0x1], 0 }
  0x14   :  { %27 = vsyncpa [#allocation7], 0  ;;  %s2020_s28 = smov 0   ;;  %s2022_s29 = smov 0  }
  0x15   :  { %s2024_s30 = smov 0   ;;  %s2026_s16 = smov 0  }
  0x16   :  { %s2028_s17 = smov 0   ;;  %s2030_s18 = smov 0  }
  0x17   :  { %s2032_s19 = smov 0   ;;  %s2034_s0 = smov 0  }
  0x18   :  { %s2036_s20 = smov 0   ;;  %s2038_s21 = smov 0  }
  0x19 LB: > { %2573 = sst [smem:[#allocation19_spill]] %s1901_s18  ;;  %s2069_s22 = sadd.s32 4294967295, %s1917_s21   ;;  %s1917_s21 = sphi %s2038_s21, %s2615_s21   ;;  %s1913_s20 = sphi %s2036_s20, %s2619_s20   ;;  %s1909_s0 = sphi %s2034_s0, %s2626_s0   ;;  %s1905_s19 = sphi %s2032_s19, %s2625_s19   ;;  %s1901_s18 = sphi %s2030_s18, %s2617_s18   ;;  %s1897_s17 = sphi %s2028_s17, %s2624_s17   ;;  %s1893_s16 = sphi %s2026_s16, %s2623_s16   ;;  %s1889_s30 = sphi %s2024_s30, %s2622_s30   ;;  %s1885_s29 = sphi %s2022_s29, %s2621_s29   ;;  %s1881_s28 = sphi %s2020_s28, %s2620_s28  }
  0x1a   : > { %2574 = sst [smem:[#allocation20_spill]] %s1913_s20  ;;  %s2072_s23 = sadd.s32 1, %s1917_s21  }
  0x1b   : > { %2575 = sst [smem:[#allocation21_spill]] %s2072_s23  ;;  %s37_s24 = ssub.s32 %s1917_s21, %s2072_s23 }
  0x1c   : > { %s40_s25 = sadd.s32 1, %s1913_s20  ;;  %p38_p3 = scmp.eq.s32.totalorder %s37_s24, 0 }
  0x1d   : > { %p47_p4 = scmp.ne.s32.totalorder %s1913_s20, %s1909_s0  ;;  %p2557_p5 = scmp.eq.s32.totalorder %s1917_s21, 0 }
  0x1e   : > { %p53_p6 = scmp.ne.s32.totalorder %s1909_s0, %s1905_s19  ;;  %p2556_p8 = scmp.eq.s32.totalorder %s2069_s22, 0 }
  0x1f   : > { %s2082_s26 = scalar_select %p38_p3, %s1913_s20, %s40_s25  }
  0x20   : > { %p2086_p7 = por %p2557_p5, %p47_p4  ;;  %s2092_s15 = sld [smem:[#allocation3 + %s2072_s23]] }
  0x21   : > { %2576 = sst [smem:[#allocation22_spill]] %s2082_s26  ;;  %p2099_p9 = por %p2556_p8, %p53_p6 }
  0x22   : > { %s2095_s8 = sld [smem:[#allocation3 + %s2072_s23]]  ;;  %p2555_p10 = scmp.lt.s32.totalorder %s1917_s21, 2 }
  0x23   : > { %s2578_s24 = scalar_select %p2099_p9, 1, 0 }
  0x24   : > { %s469_s19 = sand.u32 1, %s1917_s21   ;;  %s471_s25 = sand.u32 1, %s1913_s20  }
  0x25   : > { %s1422_s26 = sshll.u32 %s1917_s21, 4  ;;  %s472_s14 = scalar_lea.vmem [#allocation4], %s471_s25 }
  0x26   : > { %s479_s12 = sshll.u32 %s472_s14, 4  ;;  %s2579_s1 = sld [smem:[#allocation24_spill]]  ;;  %s2112_s12 = int_to_ptr.vmem [resolvable:$true] %s479_s12 }
  0x27   : > { %p2118_p11 = pnand %p2555_p10, %p2086_p7  ;;  %s2122_s14 = scalar_lea.sflag [#allocation5], %s469_s19 }
  0x29   : > { %p1705_p13 = pneg %p2118_p11 }
  0x2c   : > { %s2110_s3 = scalar_lea.hbm %s2579_s1, %s1422_s26  ;;  %s1708_s26 = scalar_lea.hbm %s2579_s1, 32 }
  0x2d   : > { %s1703_s25 = scalar_lea.hbm %s2110_s3, 16  ;;  %p1709_p2 = scmp.lt.u32.totalorder %s2110_s3, %s2579_s1 }
  0x2e   : > { %p1704_p12 = scmp.ne.s32.totalorder %s2110_s3, %s1703_s25  ;;  %p1710_p3 = scmp.lt.u32.totalorder %s1708_s26, %s1703_s25 }
  0x2f   : > { %p1712_p6 = scmp.lt.u32.totalorder %s1703_s25, %s2110_s3 }
  0x30   : > { %p1706_p0 = pnand %p1705_p13, %p1704_p12  ;;  %p1711_p4 = por %p1710_p3, %p1709_p2 }
  0x32   : > { %p1707_p1 = pneg %p1706_p0  ;;  %p1713_p7 = por %p1712_p6, %p1711_p4 }
  0x34   : > { %p1714_p10 = pnand %p1713_p7, %p1707_p1 }
  0x36   : > { %1717 = shalt.err (!%p1714_p10)
}
  0x37   : > { %s1718_s19 = scalar_lea.vmem %s2112_s12, 16  ;;  %s1920_s6 = smov [#allocation4]  }
  0x38   : > { %p1719_p12 = scmp.ne.s32.totalorder %s2112_s12, %s1718_s19  ;;  %s1723_s10 = sshll.u32 %s1920_s6, 4  ;;  %s1724_s10 = int_to_ptr.vmem [resolvable:$false] %s1723_s10 }
  0x39   : > { %s1725_s20 = scalar_lea.vmem %s1724_s10, 32  ;;  %p1726_p5 = scmp.lt.s32.totalorder %s2112_s12, %s1724_s10 }
  0x3a   : > { %p1721_p0 = pnand %p1719_p12, %p1705_p13  ;;  %p1727_p2 = scmp.lt.s32.totalorder %s1725_s20, %s1718_s19 }
  0x3c   : > { %p1722_p8 = pneg %p1721_p0  ;;  %p1728_p3 = por %p1727_p2, %p1726_p5 }
  0x3e   : > { %p1729_p4 = pnand %p1728_p3, %p1722_p8 }
  0x40   : > { %1732 = shalt.err (!%p1729_p4)
}
  0x41   : > { %1585 = dma.hbm_to_vmem [thread:$0]  (!%p2118_p11), %s2110_s3, 16, %s2112_s12, %s2122_s14  }
  0x42   : > { %s248_s25 = sld [smem:[#allocation3 + %s1917_s21]]  ;;  %s253_s26 = sadd.s32 1, %s1901_s18 }
  0x43   : > { %p260_p5 = scmp.ne.s32.totalorder %s1901_s18, %s1897_s17  ;;  %p266_p8 = scmp.ne.s32.totalorder %s1897_s17, %s1893_s16 }
  0x44   : > { %s540_s23 = sand.u32 1, %s1901_s18   ;;  %p1419_p10 = scmp.ge.s32.totalorder %s1917_s21, 1 }
  0x45   : > { %p2581_p13 = scmp.eq.s32.totalorder %s1917_s21, 0  ;;  %p2583_p6 = scmp.eq.s32.totalorder %s2069_s22, 0 }
  0x46   : > { %s1423_s12 = sshll.u32 %s540_s23, 3  ;;  %p443_p7 = scmp.lt.s32.totalorder %s1917_s21, 3 }
  0x47   : > { %p2160_p1 = por %p260_p5, %p2581_p13  ;;  %p2166_p11 = por %p266_p8, %p2583_p6 }
  0x48   : > { %p2585_p12 = scmp.lt.s32.totalorder %s1917_s21, 2  ;;  %s250_s19 = ssub.s32 %s248_s25, %s2092_s15 }
  0x49   : > { %s2584_s3 = scalar_select %p2166_p11, 1, 0 }
  0x4a   : > { %p2175_p0 = pnand %p2585_p12, %p2160_p1  ;;  %s542_s6 = scalar_lea.vmem [#allocation8], %s1423_s12 }
  0x4b   : > { %s550_s10 = sshll.u32 %s542_s6, 4  ;;  %p251_p2 = scmp.eq.s32.totalorder %s250_s19, 0  ;;  %s2180_s10 = int_to_ptr.vmem [resolvable:$true] %s550_s10 }
  0x4c   : > { %s1567_s20 = scalar_select %p2160_p1, [#allocation3], [#allocation10] }
  0x4d   : > { %s2185_s1 = scalar_select %p251_p2, %s1901_s18, %s253_s26  }
  0x4e   : > { %s1568_s23 = scalar_select %p2160_p1, %s1917_s21, 0 }
  0x4f   : > { %2587 = sst [smem:[#allocation23_spill]] %s2185_s1  ;;  %p2588_p3 = pmov %p2585_p12 }
  0x50   : > { %p2196_p5 = pnand %p1419_p10, %p443_p7  ;;  %s1921_s12 = smov [#allocation6]  }
  0x51   : > { %s2628_s20 = smov (!%p2588_p3, %s1567_s20), [#allocation12]  ;;  %p2589_p4 = pmov %p2588_p3 }
  0x52   : > { %s2590_s15 = scalar_select %p2196_p5, 1, 0 }
  0x53   : > { %s2630_s23 = smov (!%p2589_p4, %s1568_s23), 0  ;;  %p1578_p8 = pneg %p2196_p5 }
  0x54   : > { %s543_s25 = sld [smem:[%s2628_s20 + %s2630_s23]]  ;;  %s455_s19 = sshll.u32 %s1921_s12, 4  ;;  %s2202_s19 = int_to_ptr.vmem [resolvable:$true] %s455_s19 }
  0x55   : > { %p2591_p13 = pmov %p2583_p6  ;;  %p1735_p1 = pneg %p2175_p0 }
  0x56   : > { %s1738_s12 = scalar_lea.hbm %s2545_s9, 512 }
  0x57   : > { %p2206_p6 = pnand %p1578_p8, %p2591_p13 }
  0x5a   : > { %s1424_s27 = sshll.u32 %s543_s25, 7 }
  0x5b   : > { %s548_s18 = scalar_lea.hbm %s2545_s9, %s1424_s27 }
  0x5c   : > { %s1733_s2 = scalar_lea.hbm %s548_s18, 128  ;;  %p1739_p2 = scmp.lt.u32.totalorder %s548_s18, %s2545_s9 }
  0x5d   : > { %p1734_p10 = scmp.ne.s32.totalorder %s548_s18, %s1733_s2  ;;  %p1740_p3 = scmp.lt.u32.totalorder %s1738_s12, %s1733_s2 }
  0x5e   : > { %p1742_p8 = scmp.lt.u32.totalorder %s1733_s2, %s548_s18 }
  0x5f   : > { %p1736_p7 = pnand %p1735_p1, %p1734_p10  ;;  %p1741_p4 = por %p1740_p3, %p1739_p2 }
  0x61   : > { %p1737_p12 = pneg %p1736_p7  ;;  %p1743_p13 = por %p1742_p8, %p1741_p4 }
  0x63   : > { %p1744_p11 = pnand %p1743_p13, %p1737_p12 }
  0x65   : > { %1747 = shalt.err (!%p1744_p11)
}
  0x66   : > { %s1748_s1 = scalar_lea.vmem %s2180_s10, 128  ;;  %s1922_s25 = smov [#allocation8]  }
  0x67   : > { %p1749_p10 = scmp.ne.s32.totalorder %s2180_s10, %s1748_s1  ;;  %s1753_s27 = sshll.u32 %s1922_s25, 4  ;;  %s1754_s27 = int_to_ptr.vmem [resolvable:$false] %s1753_s27 }
  0x68   : > { %s1755_s7 = scalar_lea.vmem %s1754_s27, 256  ;;  %p1756_p5 = scmp.lt.s32.totalorder %s2180_s10, %s1754_s27 }
  0x69   : > { %p1751_p7 = pnand %p1749_p10, %p1735_p1  ;;  %p1757_p2 = scmp.lt.s32.totalorder %s1755_s7, %s1748_s1 }
  0x6b   : > { %p1752_p9 = pneg %p1751_p7  ;;  %p1758_p3 = por %p1757_p2, %p1756_p5 }
  0x6d   : > { %p1759_p4 = pnand %p1758_p3, %p1752_p9 }
  0x6f   : > { %1762 = shalt.err (!%p1759_p4)
}
  0x70   : > { %1590 = dma.hbm_to_vmem [thread:$0]  (!%p2175_p0), %s548_s18, 128, %s2180_s10, %s2122_s14  }
  0x71   : > { %s1763_s6 = scalar_lea.hbm %s2540_s4, 256  ;;  %p1765_p1 = pneg %p2206_p6 }
  0x72   : > { %p1764_p11 = scmp.ne.s32.totalorder %s2540_s4, %s1763_s6  ;;  %p1770_p9 = scmp.lt.u32.totalorder %s1763_s6, %s2540_s4 }
  0x74   : > { %p1766_p12 = pnand %p1765_p1, %p1764_p11 }
  0x76   : > { %p1767_p5 = pneg %p1766_p12 }
  0x78   : > { %p1772_p8 = pnand %p1770_p9, %p1767_p5 }
  0x7a   : > { %1775 = shalt.err (!%p1772_p8)
}
  0x7b   : > { %s1776_s18 = scalar_lea.vmem %s2202_s19, 256  ;;  %p1784_p7 = scmp.lt.s32.totalorder %s2202_s19, %s2202_s19 }
  0x7c   : > { %p1777_p0 = scmp.ne.s32.totalorder %s2202_s19, %s1776_s18  ;;  %p1785_p2 = scmp.lt.s32.totalorder %s1776_s18, %s1776_s18 }
  0x7e   : > { %p1779_p13 = pnand %p1777_p0, %p1765_p1  ;;  %p1786_p3 = por %p1785_p2, %p1784_p7 }
  0x80   : > { %p1780_p10 = pneg %p1779_p13 }
  0x82   : > { %p1787_p4 = pnand %p1786_p3, %p1780_p10 }
  0x84   : > { %1790 = shalt.err (!%p1787_p4)
}
  0x85   : > { %s1923_s16 = smov 128   ;;  %s1924_s10 = smov 8  }
  0x86   : > { %1581 = dma.hbm_to_vmem [thread:$0]  (!%p2206_p6), %s2540_s4, 256, %s2202_s19, [#allocation7], %s1923_s16, %s1923_s16, %s1924_s10  }
  0x87   : > { %s360_s7 = sld [smem:[#allocation3 + %s1917_s21]]  ;;  %p372_p11 = scmp.ne.s32.totalorder %s1889_s30, %s1885_s29 }
  0x88   : > { %p378_p1 = scmp.ne.s32.totalorder %s1885_s29, %s1881_s28  ;;  %p2593_p12 = scmp.eq.s32.totalorder %s1917_s21, 0 }
  0x89   : > { %p2594_p9 = scmp.eq.s32.totalorder %s2069_s22, 0  ;;  %s585_s26 = sand.u32 1, %s1889_s30  }
  0x8a   : > { %p374_p5 = por %p372_p11, %p2593_p12  ;;  %s365_s20 = sadd.s32 1, %s1889_s30 }
  0x8b   : > { %p2267_p8 = por %p378_p1, %p2594_p9  ;;  %s1425_s23 = sshll.u32 %s585_s26, 7 }
  0x8c   : > { %s1570_s11 = scalar_select %p374_p5, [#allocation3], [#allocation11] }
  0x8d   : > { %s362_s6 = ssub.s32 %s360_s7, %s2095_s8  ;;  %p2596_p6 = scmp.lt.s32.totalorder %s1917_s21, 2 }
  0x8e   : > { %p363_p0 = scmp.eq.s32.totalorder %s362_s6, 0  ;;  %s587_s18 = scalar_lea.vmem [#allocation9], %s1425_s23 }
  0x8f   : > { %s1571_s12 = scalar_select %p374_p5, %s1917_s21, 0 }
  0x90   : > { %s2276_s1 = scalar_select %p363_p0, %s1889_s30, %s365_s20  }
  0x91   : > { %s2632_s11 = smov (!%p2596_p6, %s1570_s11), [#allocation13]  ;;  %p2597_p13 = pmov %p2596_p6 }
  0x92   : > { %p2598_p10 = pmov %p2596_p6  ;;  %s595_s8 = sshll.u32 %s587_s18, 4  ;;  %s2288_s8 = int_to_ptr.vmem [resolvable:$true] %s595_s8 }
  0x93   : > { %s2634_s12 = smov (!%p2597_p13, %s1571_s12), 0  ;;  %s1796_s20 = scalar_lea.hbm %s2549_s13, 8192 }
  0x94   : > { %p2284_p7 = pnand %p2598_p10, %p374_p5  ;;  %s588_s19 = sld [smem:[%s2632_s11 + %s2634_s12]] }
  0x96   : > { %p1793_p3 = pneg %p2284_p7 }
  0x9a   : > { %s1452_s25 = sshll.u32 %s588_s19, 11 }
  0x9b   : > { %s2293_s26 = scalar_lea.hbm %s2549_s13, %s1452_s25 }
  0x9c   : > { %s1791_s21 = scalar_lea.hbm %s2293_s26, 2048  ;;  %p1797_p1 = scmp.lt.u32.totalorder %s2293_s26, %s2549_s13 }
  0x9d   : > { %p1792_p2 = scmp.ne.s32.totalorder %s2293_s26, %s1791_s21  ;;  %p1798_p12 = scmp.lt.u32.totalorder %s1796_s20, %s1791_s21 }
  0x9e   : > { %p1800_p9 = scmp.lt.u32.totalorder %s1791_s21, %s2293_s26 }
  0x9f   : > { %p1794_p4 = pnand %p1793_p3, %p1792_p2  ;;  %p1799_p5 = por %p1798_p12, %p1797_p1 }
  0xa1   : > { %p1795_p11 = pneg %p1794_p4  ;;  %p1801_p0 = por %p1800_p9, %p1799_p5 }
  0xa3   : > { %p1802_p6 = pnand %p1801_p0, %p1795_p11 }
  0xa5   : > { %1805 = shalt.err (!%p1802_p6)
}
  0xa6   : > { %s1806_s19 = scalar_lea.vmem %s2288_s8, 2048  ;;  %s1925_s18 = smov [#allocation9]  }
  0xa7   : > { %p1807_p13 = scmp.ne.s32.totalorder %s2288_s8, %s1806_s19  ;;  %s1811_s25 = sshll.u32 %s1925_s18, 4  ;;  %s1812_s25 = int_to_ptr.vmem [resolvable:$false] %s1811_s25 }
  0xa8   : > { %s1813_s27 = scalar_lea.vmem %s1812_s25, 4096  ;;  %p1814_p4 = scmp.lt.s32.totalorder %s2288_s8, %s1812_s25 }
  0xa9   : > { %p1809_p10 = pnand %p1807_p13, %p1793_p3  ;;  %p1815_p1 = scmp.lt.s32.totalorder %s1813_s27, %s1806_s19 }
  0xab   : > { %p1810_p2 = pneg %p1809_p10  ;;  %p1816_p12 = por %p1815_p1, %p1814_p4 }
  0xad   : > { %p1817_p5 = pnand %p1816_p12, %p1810_p2 }
  0xaf   : > { %1820 = shalt.err (!%p1817_p5)
}
  0xb0   : > { %1595 = dma.hbm_to_vmem [thread:$0]  (!%p2284_p7), %s2293_s26, 2048, %s2288_s8, %s2122_s14, %s1923_s16, %s1923_s16, %s1924_s10  }
  0xb1   : > { %p2600_p3 = scmp.ne.s32.totalorder %s2590_s15, 0 }
  0xb2   : > { %s617_s7 = sand.u32 (!%p2600_p3), 1, %s2069_s22   ;;  %s619_s21 = sand.u32 (!%p2600_p3), 1, %s1909_s0  }
  0xb3   : > { %615 = sbr.rel (%p2600_p3) target bundleno = 924 (0x39c), region = 76  ;;  %s618_s11 = scalar_lea.sflag (!%p2600_p3), [#allocation5], %s617_s7 }
  0xb4   : > { %s2328_s6 = scalar_lea.vmem (!%p2600_p3), [#allocation4], %s619_s21  ;;  %p2601_p11 = scmp.ne.s32.totalorder (!%p2600_p3), %s2578_s24, 0 }
  0xba   : > { %1864 = dma.done.wait (%p2601_p11), %s618_s11, 16  }
  0xbb   : > { %1866 = vsyncadd (%p2601_p11), %s618_s11, 4294967280  ;;  %p2602_p9 = scmp.eq.s32.totalorder %s2069_s22, 0 }
  0xbd   : > { %1868 = dma.done.wait (%p2602_p9), [#allocation7], 256   ;;  %p2603_p7 = pmov %p2602_p9 }
  0xbe   : > { %s631_s14 = sand.u32 1, %s1897_s17   ;;  %p2604_p0 = scmp.ne.s32.totalorder %s2584_s3, 0 }
  0xbf   : > { %1870 = vsyncadd (%p2603_p7), [#allocation7], 4294967040  ;;  %s2339_s15 = sshll.u32 %s631_s14, 3 }
  0xc0   : > { %s633_s16 = scalar_lea.vmem [#allocation8], %s2339_s15 }
  0xc1   : > { %1872 = dma.done.wait (%p2604_p0), %s618_s11, 128  }
  0xc2   : > { %1874 = vsyncadd (%p2604_p0), %s618_s11, 4294967168  ;;  %s640_s24 = sand.u32 1, %s1885_s29  }
  0xc3   : > { %s1431_s10 = sshll.u32 %s640_s24, 7 }
  0xc4   : > { %s2347_s28 = scalar_lea.vmem [#allocation9], %s1431_s10 }
  0xc5   : > { %1876 = dma.done.wait (%p2267_p8), %s618_s11, 2048  }
  0xc6   : > { %1878 = vsyncadd (%p2267_p8), %s618_s11, 4294965248  ;;  %v1926_v0 = vmov 0.0   ;;  %s754_s8 = sld [smem:[#allocation3 + %s2069_s22]]  ;;  %vm1927_vm0 = vmmov 0   ;;  %p744_p10 = scmp.lt.s32.totalorder %s2069_s22, 1  ;;  %v936_v20 = vld [vmem:[%s633_s16] sm:$0xff] }
  0xc7   : > { %1505 = vmatprep.subr.bf16.mxu0 %v1926_v0  ;;  %1513 = vmatprep.mubr.msk.bf16.mxu0 %vm1927_vm0, %v1926_v0  ;;  %s766_s3 = sld [smem:[#allocation3 + %s2069_s22]]  ;;  %v808_v23 = vld [vmem:[%s2328_s6] sm:$0x1]  ;;  %v938_v26 = vpack.c.bf16 %v936_v20, %v936_v20  ;;  %vm950_vm1 = vcmask 1043456   ;;  %vm823_vm2 = vcmask 523264   ;;  %vm946_vm3 = vcmask 64512  }
  0xc8   : > { %1517 = vmatprep.subr.bf16.mxu1 %v1926_v0  ;;  %1533 = vmatprep.mubr.msk.bf16.mxu1 %vm1927_vm0, %v1926_v0  ;;  %s784_s26 = sld [smem:[#allocation3 + %s2069_s22]]  ;;  %v817_v29 = vpack.c.bf16 %v808_v23, %v808_v23  ;;  %vm1188_vm4 = vcmask 1040384  }
  0xc9   : > { %s2605_s27 = sld [smem:[#allocation28_spill]]  ;;  %s2606_s10 = sld [smem:[#allocation31_spill]]  ;;  %v952_v33 = vsel %vm950_vm1, %v938_v26, 0 }
  0xca   : > { %s2382_s11 = scalar_select %p744_p10, %s2069_s22, 1 }
  0xcb   : > { %s2608_s23 = sld [smem:[#allocation26_spill]] }
  0xcc   : > { %p755_p6 = scmp.lt.s32.totalorder %s754_s8, 3  ;;  %s1453_s15 = sshll.u32 %s2382_s11, 4 }
  0xcd   : > { %p767_p8 = scmp.lt.s32.totalorder %s766_s3, 3  ;;  %s779_s18 = sld [smem:[#allocation3 + %s2069_s22]] }
  0xce   : > { %s2636_s8 = smov (!%p755_p6, %s754_s8), 3  ;;  %p785_p13 = scmp.lt.s32.totalorder %s784_s26, 3 }
  0xcf   : > { %s2638_s3 = smov (!%p767_p8, %s766_s3), 3  ;;  %s1455_s2 = sshll.u32 %s2636_s8, 6 }
  0xd0   : > { %s759_s12 = scalar_lea.vmem %s2541_s5, %s1455_s2  ;;  %s1456_s19 = sshll.u32 %s2638_s3, 7 }
  0xd1   : > { %v809_v1 = vld [vmem:[%s759_s12] sm:$0xff]  ;;  %v810_v2 = vld [vmem:[%s759_s12 + $0x8] sm:$0xff]  ;;  %v811_v3 = vld [vmem:[%s759_s12 + $0x10] sm:$0xff]  ;;  %s2368_s7 = scalar_lea.vmem %s2605_s27, %s1456_s19  ;;  %s2640_s26 = smov (!%p785_p13, %s784_s26), 3 }
  0xd2   : > { %v818_v4 = vpack.c.bf16 %v810_v2, %v809_v1  ;;  %v812_v5 = vld [vmem:[%s759_s12 + $0x18] sm:$0xff]  ;;  %v868_v6 = vld [vmem:[%s2368_s7] sm:$0xff]  ;;  %v869_v8 = vld [vmem:[%s2368_s7 + $0x8] sm:$0xff]  ;;  %s1457_s21 = sshll.u32 %s2640_s26, 8  ;;  %s2607_s3 = sld [smem:[#allocation25_spill]] }
  0xd3   : > { %v819_v7 = vpack.c.bf16 %v812_v5, %v811_v3  ;;  %v870_v9 = vld [vmem:[%s2368_s7 + $0x10] sm:$0xff]  ;;  %v871_v10 = vld [vmem:[%s2368_s7 + $0x18] sm:$0xff]  ;;  %v813_v11 = vld [vmem:[%s759_s12 + $0x20] sm:$0xff]  ;;  %v885_v13 = vpack.c.bf16 %v869_v8, %v868_v6  ;;  %s2389_s8 = scalar_lea.vmem %s2606_s10, %s1457_s21  ;;  %s761_s19 = sld [smem:[#allocation3 + %s2069_s22]] }
  0xd4   : > { %1506 = vmatpush3.bf16.msra.mxu0 %v818_v4  ;;  %v814_v12 = vld [vmem:[%s759_s12 + $0x28] sm:$0xff]  ;;  %v886_v14 = vpack.c.bf16 %v871_v10, %v870_v9  ;;  %v872_v16 = vld [vmem:[%s2368_s7 + $0x20] sm:$0xff]  ;;  %v815_v18 = vld [vmem:[%s759_s12 + $0x30] sm:$0xff]  ;;  %p780_p4 = scmp.lt.s32.totalorder %s779_s18, 3  ;;  %s2610_s10 = sld [smem:[#allocation30_spill]] }
  0xd5   : > { %1507 = vmatprep.subr.bf16.mxu0 %v1926_v0  ;;  %1518 = vmatpush3.bf16.msra.mxu1 %v885_v13  ;;  %v820_v15 = vpack.c.bf16 %v814_v12, %v813_v11  ;;  %v873_v17 = vld [vmem:[%s2368_s7 + $0x28] sm:$0xff]  ;;  %v816_v19 = vld [vmem:[%s759_s12 + $0x38] sm:$0xff]  ;;  %v874_v24 = vld [vmem:[%s2368_s7 + $0x30] sm:$0xff]  ;;  %s753_s12 = scalar_lea.vmem %s2608_s23, %s1453_s15  ;;  %s773_s2 = sld [smem:[#allocation3 + %s2069_s22]] }
  0xd6   : > { %1519 = vmatprep.subr.bf16.mxu1 %v1926_v0  ;;  %v887_v21 = vpack.c.bf16 %v873_v17, %v872_v16  ;;  %v821_v22 = vpack.c.bf16 %v816_v19, %v815_v18  ;;  %v875_v25 = vld [vmem:[%s2368_s7 + $0x38] sm:$0xff]  ;;  %v1013_v27 = vld [vmem:[%s2389_s8 + $0x80] sm:$0xff]  ;;  %v1014_v28 = vld [vmem:[%s2389_s8 + $0x88] sm:$0xff]  ;;  %s2644_s18 = smov (!%p780_p4, %s779_s18), 3  ;;  %s2613_s27 = sld [smem:[#allocation29_spill]] }
  0xd7   : > { %v888_v30 = vpack.c.bf16 %v875_v25, %v874_v24  ;;  %v876_v31 = vld [vmem:[%s2368_s7 + $0x40] sm:$0xff]  ;;  %v877_v32 = vld [vmem:[%s2368_s7 + $0x48] sm:$0xff]  ;;  %v1039_v34 = vpack.c.bf16 %v1014_v28, %v1013_v27  ;;  %v878_v38 = vld [vmem:[%s2368_s7 + $0x50] sm:$0xff]  ;;  %s2614_s24 = sld [smem:[#allocation34_spill]] }
  0xd8   : > { %1508 = vmatpush3.bf16.msra.mxu0 %v819_v7  ;;  %s748_s26 = scalar_lea.vmem %s2607_s3, %s1453_s15  ;;  %v889_v36 = vpack.c.bf16 %v877_v32, %v876_v31  ;;  %v879_v39 = vld [vmem:[%s2368_s7 + $0x58] sm:$0xff]  ;;  %v997_v40 = vld [vmem:[%s2389_s8] sm:$0xff]  ;;  %v998_v41 = vld [vmem:[%s2389_s8 + $0x8] sm:$0xff]  ;;  %s791_s15 = sld [smem:[#allocation3 + %s2069_s22]] }
  0xd9   : > { %1509 = vmatprep.subr.bf16.mxu0 %v1926_v0  ;;  %1520 = vmatpush3.bf16.msra.mxu1 %v886_v14  ;;  %v934_v35 = vld [vmem:[%s748_s26] sm:$0xff]  ;;  %v935_v37 = vld [vmem:[%s748_s26 + $0x8] sm:$0xff]  ;;  %v1015_v42 = vld [vmem:[%s2389_s8 + $0x90] sm:$0xff]  ;;  %v890_v45 = vpack.c.bf16 %v879_v39, %v878_v38  ;;  %v1031_v46 = vpack.c.bf16 %v998_v41, %v997_v40  ;;  %p762_p2 = scmp.lt.s32.totalorder %s761_s19, 3  ;;  %s2611_s3 = sld [smem:[#allocation32_spill]] }
  0xda   : > { %1521 = vmatprep.subr.bf16.mxu1 %v1926_v0  ;;  %v1016_v43 = vld [vmem:[%s2389_s8 + $0x98] sm:$0xff]  ;;  %v937_v44 = vpack.c.bf16 %v935_v37, %v934_v35  ;;  %v999_v48 = vld [vmem:[%s2389_s8 + $0x10] sm:$0xff]  ;;  %v1017_v50 = vld [vmem:[%s2389_s8 + $0xa0] sm:$0xff] }
  0xdb   : > { %v1040_v47 = vpack.c.bf16 %v1016_v43, %v1015_v42  ;;  %v1000_v49 = vld [vmem:[%s2389_s8 + $0x18] sm:$0xff]  ;;  %v1018_v51 = vld [vmem:[%s2389_s8 + $0xa8] sm:$0xff]  ;;  %v1001_v54 = vld [vmem:[%s2389_s8 + $0x20] sm:$0xff]  ;;  %s2642_s19 = smov (!%p762_p2, %s761_s19), 3  ;;  %p774_p5 = scmp.lt.s32.totalorder %s773_s2, 3 }
  0xdc   : > { %1510 = vmatpush3.bf16.msra.mxu0 %v820_v15  ;;  %v1032_v52 = vpack.c.bf16 %v1000_v49, %v999_v48  ;;  %v1041_v53 = vpack.c.bf16 %v1018_v51, %v1017_v50  ;;  %v1002_v55 = vld [vmem:[%s2389_s8 + $0x28] sm:$0xff]  ;;  %v1019_v56 = vld [vmem:[%s2389_s8 + $0xb0] sm:$0xff]  ;;  %v1020_v57 = vld [vmem:[%s2389_s8 + $0xb8] sm:$0xff] }
  0xdd   : > { %1511 = vmatprep.subr.bf16.mxu0 %v1926_v0  ;;  %1522 = vmatpush3.bf16.msra.mxu1 %v887_v21  ;;  %v1033_v58 = vpack.c.bf16 %v1002_v55, %v1001_v54  ;;  %v1042_v59 = vpack.c.bf16 %v1020_v57, %v1019_v56  ;;  %v1003_v60 = vld [vmem:[%s2389_s8 + $0x30] sm:$0xff]  ;;  %v1004_v61 = vld [vmem:[%s2389_s8 + $0x38] sm:$0xff]  ;;  %v1021_v62 = vld [vmem:[%s2389_s8 + $0xc0] sm:$0xff]  ;;  %s2650_s2 = smov (!%p774_p5, %s773_s2), 3 }
  0xde   : > { %1523 = vmatprep.subr.bf16.mxu1 %v1926_v0  ;;  %v1022_v63 = vld [vmem:[%s2389_s8 + $0xc8] sm:$0xff]  ;;  %v1034_v1 = vpack.c.bf16 %v1004_v61, %v1003_v60  ;;  %v880_v3 = vld [vmem:[%s2368_s7 + $0x60] sm:$0xff]  ;;  %v1023_v9 = vld [vmem:[%s2389_s8 + $0xd0] sm:$0xff]  ;;  %p792_p1 = scmp.lt.s32.totalorder %s791_s15, 3 }
  0xdf   : > { %v1043_v2 = vpack.c.bf16 %v1022_v63, %v1021_v62  ;;  %v881_v4 = vld [vmem:[%s2368_s7 + $0x68] sm:$0xff]  ;;  %v1005_v5 = vld [vmem:[%s2389_s8 + $0x40] sm:$0xff]  ;;  %v1024_v10 = vld [vmem:[%s2389_s8 + $0xd8] sm:$0xff] }
  0xe0   : > { %1512 = vmatpush3.bf16.msra.mxu0 %v821_v22  ;;  %v891_v6 = vpack.c.bf16 %v881_v4, %v880_v3  ;;  %v1006_v7 = vld [vmem:[%s2389_s8 + $0x48] sm:$0xff]  ;;  %v1044_v11 = vpack.c.bf16 %v1024_v10, %v1023_v9  ;;  %v882_v12 = vld [vmem:[%s2368_s7 + $0x70] sm:$0xff]  ;;  %v883_v13 = vld [vmem:[%s2368_s7 + $0x78] sm:$0xff]  ;;  %s2609_s7 = sld [smem:[#allocation27_spill]]  ;;  %s2646_s15 = smov (!%p792_p1, %s791_s15), 3 }
  0xe1   : > { %1537 = vmatprep.subr.bf16.mxu0 %v1926_v0  ;;  %1524 = vmatpush3.bf16.msra.mxu1 %v888_v30  ;;  %v1035_v8 = vpack.c.bf16 %v1006_v7, %v1005_v5  ;;  %v1007_v14 = vld [vmem:[%s2389_s8 + $0x50] sm:$0xff]  ;;  %v892_v15 = vpack.c.bf16 %v883_v13, %v882_v12  ;;  %v1008_v16 = vld [vmem:[%s2389_s8 + $0x58] sm:$0xff]  ;;  %v1025_v18 = vld [vmem:[%s2389_s8 + $0xe0] sm:$0xff]  ;;  %s794_s26 = scalar_lea.vmem %s2611_s3, %s2646_s15 }
  0xe2   : > { %1525 = vmatprep.subr.bf16.mxu1 %v1926_v0  ;;  %v1036_v17 = vpack.c.bf16 %v1008_v16, %v1007_v14  ;;  %v1026_v19 = vld [vmem:[%s2389_s8 + $0xe8] sm:$0xff]  ;;  %v1009_v21 = vld [vmem:[%s2389_s8 + $0x60] sm:$0xff]  ;;  %v1027_v24 = vld [vmem:[%s2389_s8 + $0xf0] sm:$0xff] }
  0xe3   : > { %1514 = vmatmul.mubr.msk.bf16.vlgmr.msra.gmra.mrb[0].mxu0 %vm823_vm2, %v817_v29  ;;  %v1045_v20 = vpack.c.bf16 %v1026_v19, %v1025_v18  ;;  %v1010_v22 = vld [vmem:[%s2389_s8 + $0x68] sm:$0xff]  ;;  %v1028_v25 = vld [vmem:[%s2389_s8 + $0xf8] sm:$0xff]  ;;  %v1011_v27 = vld [vmem:[%s2389_s8 + $0x70] sm:$0xff] }
  0xe4   : > { %1538 = vmatpush3.bf16.msra.mxu0 %v952_v33  ;;  %1539 = vmatprep.mubr.msk.bf16.mxu0 %vm1927_vm0, %v1926_v0  ;;  %v1037_v23 = vpack.c.bf16 %v1010_v22, %v1009_v21  ;;  %v1046_v26 = vpack.c.bf16 %v1028_v25, %v1027_v24  ;;  %v1012_v28 = vld [vmem:[%s2389_s8 + $0x78] sm:$0xff]  ;;  %v995_v30 = vld [vmem:[%s753_s12] sm:$0xff]  ;;  %v996_v31 = vld [vmem:[%s753_s12 + $0x8] sm:$0xff]  ;;  %s782_s8 = scalar_lea.vmem %s2610_s10, %s2644_s18  ;;  %s2612_s12 = sld [smem:[#allocation33_spill]] }
  0xe5   : > { %1474 = vmatprep.subr.bf16.mxu0 %v1039_v34  ;;  %1526 = vmatpush3.bf16.msra.mxu1 %v889_v36  ;;  %v1038_v29 = vpack.c.bf16 %v1012_v28, %v1011_v27  ;;  %v1030_v32 = vpack.c.bf16 %v996_v31, %v995_v30  ;;  %v1444_v41 = vld [vmem:[%s782_s8] ss:$0 sm:$0xff]  ;;  %v1109_v49 = vld [vmem:[%s2347_s28] sm:$0xff]  ;;  %v1110_v50 = vld [vmem:[%s2347_s28 + $0x8] sm:$0xff] }
  0xe6   : > { %1527 = vmatprep.subr.bf16.mxu1 %v1926_v0  ;;  %s764_s21 = scalar_lea.vmem %s2609_s7, %s2642_s19  ;;  %v1126_v51 = vpack.c.bf16 %v1110_v50, %v1109_v49  ;;  %v1113_v55 = vld [vmem:[%s2347_s28 + $0x20] sm:$0xff]  ;;  %v1114_v56 = vld [vmem:[%s2347_s28 + $0x28] sm:$0xff]  ;;  %v1123_v7 = vld [vmem:[%s2347_s28 + $0x70] sm:$0xff]  ;;  %s776_s7 = scalar_lea.vmem %s2613_s27, %s2650_s2 }
  0xe7   : > { %v822_v33 = vld [vmem:[%s764_s21] sm:$0x1]  ;;  %v1128_v57 = vpack.c.bf16 %v1114_v56, %v1113_v55  ;;  %v1117_v61 = vld [vmem:[%s2347_s28 + $0x40] sm:$0xff]  ;;  %v1118_v62 = vld [vmem:[%s2347_s28 + $0x48] sm:$0xff]  ;;  %s1563_s21 = smul.u32 24, %s2382_s11 }
  0xe8   : > { %v1130_v63 = vpack.c.bf16 %v1118_v62, %v1117_v61  ;;  %v1121_v4 = vld [vmem:[%s2347_s28 + $0x60] sm:$0xff]  ;;  %v1122_v5 = vld [vmem:[%s2347_s28 + $0x68] sm:$0xff] }
  0xe9   : > { %1528 = vmatpush3.bf16.msra.mxu1 %v890_v45  ;;  %s806_s10 = scalar_lea.vmem %s2614_s24, %s1563_s21 }
  0xea   : > { %1529 = vmatprep.subr.bf16.mxu1 %v1926_v0 }
  0xeb   : > { %1540 = vmatmul.mubr.msk.bf16.vlgmr.msra.gmra.mrb[4].mxu0 %vm946_vm3, %v937_v44 }
  0xec   : > { %1475 = vmatpush3.bf16.msra.mxu0 %v1031_v46  ;;  %1086 = vmatprep.mubr.bf16.mxu0 %v1030_v32 }
  0xed   : > { %1476 = vmatprep.subr.bf16.mxu0 %v1040_v47  ;;  %1530 = vmatpush3.bf16.msra.mxu1 %v891_v6  ;;  %v1132_v6 = vpack.c.bf16 %v1122_v5, %v1121_v4 }
  0xee   : > { %1531 = vmatprep.subr.bf16.mxu1 %v1926_v0 }
  0xf0   : > { %1477 = vmatpush3.bf16.msra.mxu0 %v1032_v52  ;;  %v1111_v52 = vld [vmem:[%s2347_s28 + $0x10] sm:$0xff] }
  0xf1   : > { %1478 = vmatprep.subr.bf16.mxu0 %v1041_v53  ;;  %1532 = vmatpush3.bf16.msra.mxu1 %v892_v15  ;;  %v1112_v53 = vld [vmem:[%s2347_s28 + $0x18] sm:$0xff] }
  0xf2   : > { %1543 = vmatprep.subr.bf16.mxu1 %v1926_v0  ;;  %v1127_v54 = vpack.c.bf16 %v1112_v53, %v1111_v52  ;;  %v1446_v15 = vld [vmem:[%s794_s26] ss:$0 sm:$0xff] }
  0xf4   : > { %1479 = vmatpush3.bf16.msra.mxu0 %v1033_v58  ;;  %v1115_v58 = vld [vmem:[%s2347_s28 + $0x30] sm:$0xff] }
  0xf5   : > { %1480 = vmatprep.subr.bf16.mxu0 %v1042_v59  ;;  %v1116_v59 = vld [vmem:[%s2347_s28 + $0x38] sm:$0xff] }
  0xf6   : > { %v1129_v60 = vpack.c.bf16 %v1116_v59, %v1115_v58 }
  0xf8   : > { %1481 = vmatpush3.bf16.msra.mxu0 %v1034_v1  ;;  %v1119_v1 = vld [vmem:[%s2347_s28 + $0x50] sm:$0xff] }
  0xf9   : > { %1482 = vmatprep.subr.bf16.mxu0 %v1043_v2  ;;  %v1120_v2 = vld [vmem:[%s2347_s28 + $0x58] sm:$0xff] }
  0xfa   : > { %v1131_v3 = vpack.c.bf16 %v1120_v2, %v1119_v1 }
  0xfc   : > { %1483 = vmatpush3.bf16.msra.mxu0 %v1035_v8  ;;  %v1124_v8 = vld [vmem:[%s2347_s28 + $0x78] sm:$0xff]  ;;  %s797_s28 = sld [smem:[#allocation3 + %s2069_s22]] }
  0xfd   : > { %1484 = vmatprep.subr.bf16.mxu0 %v1044_v11  ;;  %v1133_v9 = vpack.c.bf16 %v1124_v8, %v1123_v7 }
 0x100   : > { %1485 = vmatpush3.bf16.msra.mxu0 %v1036_v17 }
 0x101   : > { %1486 = vmatprep.subr.bf16.mxu0 %v1045_v20 }
 0x102   : > { %p798_p12 = scmp.lt.s32.totalorder %s797_s28, 3 }
 0x104   : > { %1487 = vmatpush3.bf16.msra.mxu0 %v1037_v23  ;;  %s2648_s28 = smov (!%p798_p12, %s797_s28), 3 }
 0x105   : > { %1488 = vmatprep.subr.bf16.mxu0 %v1046_v26  ;;  %s800_s19 = scalar_lea.vmem %s2612_s12, %s2648_s28 }
 0x108   : > { %1489 = vmatpush3.bf16.msra.mxu0 %v1038_v29 }
 0x1b6   : > { %v861_v34 = vpop.f32.mrb[0].mxu0 }
 0x1b7   : > { %v862_v35 = vadd.f32 %v861_v34, %v822_v33  ;;  %v1515_v36 = vpop.f32.mrb[1].mxu0  ;;  %v1449_v33 = vld [vmem:[%s800_s19] ss:$0 sm:$0xff] }
 0x1b8   : > { %v864_v37 = vpop.f32.mrb[2].mxu0 }
 0x1b9   : > { %v867_v38 = vmax.f32 %v862_v35, 0.0  ;;  %v1516_v39 = vpop.f32.mrb[3].mxu0  ;;  %v1182_v35 = vld [vmem:[#allocation6] sm:$0xff] }
 0x1bb   : > { %v884_v40 = vpack.c.bf16 %v867_v38, %v867_v38  ;;  %v893_v38 = vld [vmem:[%s776_s7] sm:$0x1] }
 0x1bd   : > { %1534 = vmatmul.mubr.bf16.vlgmr.msra.gmra.mrb[0].mxu1 %v884_v40  ;;  %v1183_v40 = vld [vmem:[#allocation6 + $0x8] sm:$0xff] }
 0x1be   : > { %v988_v42 = vpop.f32.mrb[4].mxu0  ;;  %1559 = vmatprep.mubr.msk.bf16.mxu1 %vm1927_vm0, %v1926_v0  ;;  %1544 = vmatpush3.bf16.msra.mxu1 %v1126_v51 }
 0x1bf   : > { %v1541_v43 = vpop.f32.mrb[5].mxu0  ;;  %v989_v45 = vadd.f32 %v1444_v41, %v988_v42  ;;  %1545 = vmatprep.subr.bf16.mxu1 %v1926_v0 }
 0x1c0   : > { %v991_v44 = vpop.f32.mrb[6].mxu0 }
 0x1c1   : > { %v992_v46 = vadd.f32 %v1444_v41, %v991_v44  ;;  %v1542_v47 = vpop.f32.mrb[7].mxu0 }
 0x1c2   : > { %1546 = vmatpush3.bf16.msra.mxu1 %v1127_v54 }
 0x1c3   : > { %v1029_v48 = vpack.c.bf16 %v992_v46, %v989_v45  ;;  %1547 = vmatprep.subr.bf16.mxu1 %v1926_v0 }
 0x1c5   : > { %1087 = vmatmul.mubr.bf16.vlgmr.msra.gmra.mrb[8].mxu0 %v1029_v48 }
 0x1c6   : > { %1548 = vmatpush3.bf16.msra.mxu1 %v1128_v57 }
 0x1c7   : > { %1549 = vmatprep.subr.bf16.mxu1 %v1926_v0 }
 0x1ca   : > { %1550 = vmatpush3.bf16.msra.mxu1 %v1129_v60 }
 0x1cb   : > { %1551 = vmatprep.subr.bf16.mxu1 %v1926_v0 }
 0x1ce   : > { %1552 = vmatpush3.bf16.msra.mxu1 %v1130_v63 }
 0x1cf   : > { %1553 = vmatprep.subr.bf16.mxu1 %v1926_v0 }
 0x1d2   : > { %1554 = vmatpush3.bf16.msra.mxu1 %v1131_v3 }
 0x1d3   : > { %1555 = vmatprep.subr.bf16.mxu1 %v1926_v0 }
 0x1d6   : > { %1556 = vmatpush3.bf16.msra.mxu1 %v1132_v6 }
 0x1d7   : > { %1557 = vmatprep.subr.bf16.mxu1 %v1926_v0 }
 0x1da   : > { %1558 = vmatpush3.bf16.msra.mxu1 %v1133_v9 }
 0x290   : > { %v928_v10 = vpop.f32.mrb[0].mxu1 }
 0x291   : > { %v1535_v11 = vpop.f32.mrb[1].mxu1  ;;  %v929_v44 = vadd.f32 %v928_v10, %v893_v38 }
 0x292   : > { %v931_v12 = vpop.f32.mrb[2].mxu1 }
 0x293   : > { %v1536_v13 = vpop.f32.mrb[3].mxu1 }
 0x298   : > { %v1490_v14 = vpop.f32.mrb[8].mxu0 }
 0x299   : > { %v1491_v16 = vpop.f32.mrb[9].mxu0 }
 0x29a   : > { %v1492_v17 = vadd.f32 %v1491_v16, %v1490_v14  ;;  %v1493_v0 = vpop.f32.mrb[10].mxu0 }
 0x29b   : > { %v1494_v18 = vpop.f32.mrb[11].mxu0 }
 0x29c   : > { %v1089_v19 = vadd.f32 %v1492_v17, %v1446_v15  ;;  %v1495_v20 = vadd.f32 %v1494_v18, %v1493_v0 }
 0x29e   : > { %v1447_v21 = vmul.f32 -1.442695, %v1089_v19  ;;  %v1092_v22 = vadd.f32 %v1495_v20, %v1446_v15 }
 0x2a0   : > { %1685 = vpow2.f32 %v1447_v21  ;;  %v1448_v23 = vmul.f32 -1.442695, %v1092_v22 }
 0x2a2   : > { %1687 = vpow2.f32 %v1448_v23 }
 0x2aa   : > { %v1686_v24 = vpop.eup %1685 }
 0x2ab   : > { %v1101_v25 = vadd.f32 1.0, %v1686_v24 }
 0x2ac   : > { %v1688_v26 = vpop.eup %1687 }
 0x2ad   : > { %1689 = vrcp.f32 %v1101_v25  ;;  %v1102_v27 = vadd.f32 1.0, %v1688_v26 }
 0x2af   : > { %1691 = vrcp.f32 %v1102_v27 }
 0x2b7   : > { %v1690_v28 = vpop.eup %1689 }
 0x2b8   : > { %v1107_v30 = vmul.f32 %v1690_v28, %v1089_v19 }
 0x2b9   : > { %v1692_v29 = vpop.eup %1691 }
 0x2ba   : > { %v1108_v31 = vmul.f32 %v1692_v29, %v1092_v22 }
 0x2bc   : > { %v1125_v32 = vpack.c.bf16 %v1108_v31, %v1107_v30 }
 0x2be   : > { %1560 = vmatmul.mubr.bf16.vlgmr.msra.gmra.mrb[4].mxu1 %v1125_v32 }
 0x391   : > { %v1175_v34 = vpop.f32.mrb[4].mxu1 }
 0x392   : > { %v1176_v36 = vadd.f32 %v1449_v33, %v1175_v34  ;;  %v1561_v37 = vpop.f32.mrb[5].mxu1 }
 0x393   : > { %v1178_v39 = vpop.f32.mrb[6].mxu1 }
 0x394   : > { %v1184_v41 = vadd.f32 %v1182_v35, %v1176_v36  ;;  %v1179_v42 = vadd.f32 %v1449_v33, %v1178_v39  ;;  %v1562_v43 = vpop.f32.mrb[7].mxu1 }
 0x396   : > { %v1189_v45 = vrot.slane %v1184_v41, 7  ;;  %v1185_v46 = vadd.f32 %v1183_v40, %v1179_v42 }
 0x398   : > { %v1195_v47 = vsel %vm1188_vm4, %v929_v44, %v1189_v45  ;;  %v1190_v48 = vrot.slane %v1185_v46, 7 }
 0x399   : > { %1196 = vst [vmem:[%s806_s10] sm:$0xff] %v1195_v47 }
 0x39a   : > { %v1191_v49 = vsel %vm1188_vm4, %v1189_v45, %v1190_v48  ;;  %1198 = vst [vmem:[%s806_s10 + $0x10] sm:$0x1] %v1190_v48 }
 0x39b   : > { %1197 = vst [vmem:[%s806_s10 + $0x8] sm:$0xff] %v1191_v49 }
 0x39c PF: > { %s2615_s21 = sld [smem:[#allocation21_spill]]  ;;  %s2616_s11 = sld [smem:[#allocation19_spill]] }
 0x39d   : > { %s2617_s18 = sld [smem:[#allocation23_spill]]  ;;  %s2618_s8 = sld [smem:[#allocation20_spill]] }
 0x39e   : > { %s2619_s20 = sld [smem:[#allocation22_spill]]  ;;  %s2620_s28 = smov %s1885_s29 }
 0x39f   : > { %s2621_s29 = smov %s1889_s30  ;;  %s2622_s30 = smov %s2276_s1 }
 0x3a0   : > { %s2623_s16 = smov %s1897_s17  ;;  %s2625_s19 = smov %s1909_s0 }
 0x3a2   : > { %p30_p3 = scmp.ge.s32.totalorder %s2615_s21, 4   ;;  %s2624_s17 = smov %s2616_s11 }
 0x3a3   : > { %s2626_s0 = smov %s2618_s8 }
 0x3a4   :  { %32 = sbr.rel (!%p30_p3) target bundleno = 25 (0x19), region = 172 }
 0x3ab   :  { %1220 = vsyncpa [#allocation5], 1 }
 0x3ac   :  { %1222 = vsyncpa [#allocation5 + $0x1], 1 }
 0x3ad   :  { %1223 = vsyncpa [#allocation7], 1 }

// kernel: run.4
= control target key start
LH: loop header
LB: loop body
LE: loop exit
PB: predicated region body
PF: predicated region fallthrough
CT: control target
= control target key end

     0   :  { %v1511_v0 = vmov 0.0   ;;  %vm1512_vm0 = vmmov 0   ;;  %vm659_vm1 = vsmask.f32 7424  ;;  %vm571_vm4 = vcmask 122880   ;;  %s2398_s6 = inlined_call_operand.vmem [shape: f32[128,128], index: 6, kind: input, shape index: {}]   ;;  %s2399_s4 = inlined_call_operand.vmem [shape: f32[128,128], index: 4, kind: input, shape index: {}]   ;;  %s2400_s3 = inlined_call_operand.vmem [shape: f32[34,128], index: 3, kind: input, shape index: {}]   ;;  %s2401_s0 = inlined_call_operand.vmem [shape: f32[34,128], index: 0, kind: input, shape index: {}]   ;;  %s2402_s8 = inlined_call_operand.vmem [shape: f32[128,128], index: 8, kind: input, shape index: {}]   ;;  %s2403_s10 = inlined_call_operand.vmem [shape: f32[128,256], index: 10, kind: input, shape index: {}]   ;;  %s2404_s1 = inlined_call_operand.vmem [shape: f32[32,128], index: 1, kind: input, shape index: {}]   ;;  %s2405_s7 = inlined_call_operand.vmem [shape: f32[1,128], index: 7, kind: input, shape index: {}, may-alias: {5,7,9,13,17}]   ;;  %s2406_s5 = inlined_call_operand.vmem [shape: f32[1,128], index: 5, kind: input, shape index: {}, may-alias: {5,7,9,13,17}]   ;;  %s2407_s11 = inlined_call_operand.vmem [shape: f32[1,256], index: 11, kind: input, shape index: {}, may-alias: {11,15}]   ;;  %s2408_s9 = inlined_call_operand.vmem [shape: f32[1,128], index: 9, kind: input, shape index: {}, may-alias: {5,7,9,13,17}]   ;;  %s2409_s2 = inlined_call_operand.vmem [shape: f32[2,16], index: 2, kind: input, shape index: {}]   ;;  %s2410_s12 = inlined_call_operand.vmem [shape: f32[128,128], index: 12, kind: input, shape index: {}]   ;;  %s2411_s14 = inlined_call_operand.vmem [shape: f32[128,256], index: 14, kind: input, shape index: {}]   ;;  %s2412_s16 = inlined_call_operand.vmem [shape: f32[256,128], index: 16, kind: input, shape index: {}]   ;;  %s2413_s13 = inlined_call_operand.vmem [shape: f32[1,128], index: 13, kind: input, shape index: {}, may-alias: {5,7,9,13,17}]   ;;  %s2414_s15 = inlined_call_operand.vmem [shape: f32[1,256], index: 15, kind: input, shape index: {}, may-alias: {11,15}]   ;;  %s2415_s17 = inlined_call_operand.vmem [shape: f32[1,128], index: 17, kind: input, shape index: {}, may-alias: {5,7,9,13,17}]   ;;  %s2416_s18 = inlined_call_operand.vmem [shape: f32[34,128], index: 18, kind: output, shape index: {}]  }
   0x1   :  { %2420 = sst [smem:[#allocation2_spill]] %s2398_s6  ;;  %1340 = vmatprep.subr.bf16.mxu1 %v1511_v0  ;;  %1312 = vmatprep.subr.bf16.mxu0 %v1511_v0  ;;  %v60_v52 = vld [vmem:[%s2401_s0] sm:$0xff]  ;;  %v61_v53 = vld [vmem:[%s2401_s0 + $0x8] sm:$0xff]  ;;  %v62_v58 = vld [vmem:[%s2401_s0 + $0x10] sm:$0xff]  ;;  %vm564_vm5 = vcmask 130048   ;;  %vm828_vm7 = vcmask 1040384  }
   0x2   :  { %2421 = sst [smem:[#allocation3_spill]] %s2399_s4  ;;  %s2423_s29 = sld [smem:[#allocation2_spill]]  ;;  %1356 = vmatprep.mubr.msk.bf16.mxu1 %vm1512_vm0, %v1511_v0  ;;  %1328 = vmatprep.mubr.msk.bf16.mxu0 %vm1512_vm0, %v1511_v0  ;;  %v81_v56 = vpack.c.bf16 %v61_v53, %v60_v52  ;;  %v63_v59 = vld [vmem:[%s2401_s0 + $0x18] sm:$0xff]  ;;  %v64_v63 = vld [vmem:[%s2401_s0 + $0x20] sm:$0x3] }
   0x3   :  { %2422 = sst [smem:[#allocation4_spill]] %s2400_s3  ;;  %s2424_s27 = sld [smem:[#allocation3_spill]]  ;;  %v82_v61 = vpack.c.bf16 %v63_v59, %v62_v58  ;;  %v400_v53 = vld [vmem:[%s2403_s10 + $0x80] sm:$0xff] }
   0x4   :  { %s2425_s23 = sld [smem:[#allocation4_spill]]  ;;  %v404_v59 = vld [vmem:[%s2403_s10 + $0xa0] sm:$0xff] }
   0x8   :  { %v160_v1 = vld [vmem:[%s2423_s29] sm:$0xff]  ;;  %v161_v2 = vld [vmem:[%s2423_s29 + $0x8] sm:$0xff]  ;;  %v162_v3 = vld [vmem:[%s2423_s29 + $0x10] sm:$0xff] }
   0x9   :  { %v179_v4 = vpack.c.bf16 %v161_v2, %v160_v1  ;;  %v163_v5 = vld [vmem:[%s2423_s29 + $0x18] sm:$0xff]  ;;  %v164_v7 = vld [vmem:[%s2423_s29 + $0x20] sm:$0xff]  ;;  %v165_v8 = vld [vmem:[%s2423_s29 + $0x28] sm:$0xff]  ;;  %v83_v1 = vpack.c.bf16 %v64_v63, %v64_v63 }
   0xa   :  { %v180_v6 = vpack.c.bf16 %v163_v5, %v162_v3  ;;  %v65_v9 = vld [vmem:[%s2424_s27] sm:$0xff]  ;;  %v66_v10 = vld [vmem:[%s2424_s27 + $0x8] sm:$0xff]  ;;  %v67_v12 = vld [vmem:[%s2424_s27 + $0x10] sm:$0xff]  ;;  %v181_v14 = vpack.c.bf16 %v165_v8, %v164_v7 }
   0xb   :  { %1341 = vmatpush3.bf16.msra.mxu1 %v179_v4  ;;  %v84_v11 = vpack.c.bf16 %v66_v10, %v65_v9  ;;  %v68_v13 = vld [vmem:[%s2424_s27 + $0x18] sm:$0xff]  ;;  %v166_v15 = vld [vmem:[%s2423_s29 + $0x30] sm:$0xff]  ;;  %v69_v18 = vld [vmem:[%s2424_s27 + $0x20] sm:$0xff] }
   0xc   :  { %1342 = vmatprep.subr.bf16.mxu1 %v1511_v0  ;;  %v167_v16 = vld [vmem:[%s2423_s29 + $0x38] sm:$0xff]  ;;  %v85_v17 = vpack.c.bf16 %v68_v13, %v67_v12  ;;  %v70_v19 = vld [vmem:[%s2424_s27 + $0x28] sm:$0xff]  ;;  %v168_v21 = vld [vmem:[%s2423_s29 + $0x40] sm:$0xff] }
   0xd   :  { %1313 = vmatpush3.bf16.msra.mxu0 %v84_v11  ;;  %v182_v20 = vpack.c.bf16 %v167_v16, %v166_v15  ;;  %v169_v22 = vld [vmem:[%s2423_s29 + $0x48] sm:$0xff]  ;;  %v86_v23 = vpack.c.bf16 %v70_v19, %v69_v18  ;;  %v71_v24 = vld [vmem:[%s2424_s27 + $0x30] sm:$0xff]  ;;  %v72_v25 = vld [vmem:[%s2424_s27 + $0x38] sm:$0xff] }
   0xe   :  { %1314 = vmatprep.subr.bf16.mxu0 %v1511_v0  ;;  %v183_v26 = vpack.c.bf16 %v169_v22, %v168_v21  ;;  %v170_v27 = vld [vmem:[%s2423_s29 + $0x50] sm:$0xff]  ;;  %v171_v28 = vld [vmem:[%s2423_s29 + $0x58] sm:$0xff]  ;;  %v87_v29 = vpack.c.bf16 %v72_v25, %v71_v24  ;;  %v73_v30 = vld [vmem:[%s2424_s27 + $0x40] sm:$0xff] }
   0xf   :  { %1343 = vmatpush3.bf16.msra.mxu1 %v180_v6  ;;  %v74_v31 = vld [vmem:[%s2424_s27 + $0x48] sm:$0xff]  ;;  %v184_v32 = vpack.c.bf16 %v171_v28, %v170_v27  ;;  %v172_v33 = vld [vmem:[%s2423_s29 + $0x60] sm:$0xff]  ;;  %v75_v36 = vld [vmem:[%s2424_s27 + $0x50] sm:$0xff] }
  0x10   :  { %1344 = vmatprep.subr.bf16.mxu1 %v1511_v0  ;;  %v173_v34 = vld [vmem:[%s2423_s29 + $0x68] sm:$0xff]  ;;  %v88_v35 = vpack.c.bf16 %v74_v31, %v73_v30  ;;  %v76_v37 = vld [vmem:[%s2424_s27 + $0x58] sm:$0xff]  ;;  %v174_v39 = vld [vmem:[%s2423_s29 + $0x70] sm:$0xff] }
  0x11   :  { %1315 = vmatpush3.bf16.msra.mxu0 %v85_v17  ;;  %v185_v38 = vpack.c.bf16 %v173_v34, %v172_v33  ;;  %v175_v40 = vld [vmem:[%s2423_s29 + $0x78] sm:$0xff]  ;;  %v89_v41 = vpack.c.bf16 %v76_v37, %v75_v36  ;;  %v77_v42 = vld [vmem:[%s2424_s27 + $0x60] sm:$0xff]  ;;  %v78_v43 = vld [vmem:[%s2424_s27 + $0x68] sm:$0xff] }
  0x12   :  { %1316 = vmatprep.subr.bf16.mxu0 %v1511_v0  ;;  %v186_v44 = vpack.c.bf16 %v175_v40, %v174_v39  ;;  %v155_v45 = vld [vmem:[%s2425_s23] sm:$0xff]  ;;  %v156_v46 = vld [vmem:[%s2425_s23 + $0x8] sm:$0xff]  ;;  %v90_v47 = vpack.c.bf16 %v78_v43, %v77_v42  ;;  %v79_v48 = vld [vmem:[%s2424_s27 + $0x70] sm:$0xff] }
  0x13   :  { %1345 = vmatpush3.bf16.msra.mxu1 %v181_v14  ;;  %v80_v49 = vld [vmem:[%s2424_s27 + $0x78] sm:$0xff]  ;;  %v176_v50 = vpack.c.bf16 %v156_v46, %v155_v45  ;;  %v157_v54 = vld [vmem:[%s2425_s23 + $0x10] sm:$0xff]  ;;  %v159_v60 = vld [vmem:[%s2425_s23 + $0x20] sm:$0x3] }
  0x14   :  { %1346 = vmatprep.subr.bf16.mxu1 %v1511_v0  ;;  %v91_v51 = vpack.c.bf16 %v80_v49, %v79_v48  ;;  %v158_v55 = vld [vmem:[%s2425_s23 + $0x18] sm:$0xff]  ;;  %v178_v62 = vpack.c.bf16 %v159_v60, %v159_v60  ;;  %v290_v2 = vld [vmem:[%s2402_s8] sm:$0xff]  ;;  %v291_v3 = vld [vmem:[%s2402_s8 + $0x8] sm:$0xff] }
  0x15   :  { %1317 = vmatpush3.bf16.msra.mxu0 %v86_v23  ;;  %v177_v57 = vpack.c.bf16 %v158_v55, %v157_v54  ;;  %v309_v4 = vpack.c.bf16 %v291_v3, %v290_v2  ;;  %v292_v5 = vld [vmem:[%s2402_s8 + $0x10] sm:$0xff]  ;;  %v293_v6 = vld [vmem:[%s2402_s8 + $0x18] sm:$0xff]  ;;  %v294_v8 = vld [vmem:[%s2402_s8 + $0x20] sm:$0xff] }
  0x16   :  { %1318 = vmatprep.subr.bf16.mxu0 %v1511_v0  ;;  %v310_v7 = vpack.c.bf16 %v293_v6, %v292_v5  ;;  %v295_v9 = vld [vmem:[%s2402_s8 + $0x28] sm:$0xff]  ;;  %v296_v11 = vld [vmem:[%s2402_s8 + $0x30] sm:$0xff]  ;;  %v297_v12 = vld [vmem:[%s2402_s8 + $0x38] sm:$0xff] }
  0x17   :  { %1347 = vmatpush3.bf16.msra.mxu1 %v182_v20  ;;  %v311_v10 = vpack.c.bf16 %v295_v9, %v294_v8  ;;  %v312_v13 = vpack.c.bf16 %v297_v12, %v296_v11  ;;  %v298_v14 = vld [vmem:[%s2402_s8 + $0x40] sm:$0xff]  ;;  %v299_v15 = vld [vmem:[%s2402_s8 + $0x48] sm:$0xff]  ;;  %v300_v17 = vld [vmem:[%s2402_s8 + $0x50] sm:$0xff]  ;;  %v1513_v11 = vmov 0  }
  0x18   :  { %1348 = vmatprep.subr.bf16.mxu1 %v1511_v0  ;;  %v313_v16 = vpack.c.bf16 %v299_v15, %v298_v14  ;;  %v301_v18 = vld [vmem:[%s2402_s8 + $0x58] sm:$0xff]  ;;  %v302_v20 = vld [vmem:[%s2402_s8 + $0x60] sm:$0xff]  ;;  %v303_v21 = vld [vmem:[%s2402_s8 + $0x68] sm:$0xff] }
  0x19   :  { %1319 = vmatpush3.bf16.msra.mxu0 %v87_v29  ;;  %v314_v19 = vpack.c.bf16 %v301_v18, %v300_v17  ;;  %v315_v22 = vpack.c.bf16 %v303_v21, %v302_v20  ;;  %v304_v23 = vld [vmem:[%s2402_s8 + $0x70] sm:$0xff]  ;;  %v305_v24 = vld [vmem:[%s2402_s8 + $0x78] sm:$0xff]  ;;  %v384_v29 = vld [vmem:[%s2403_s10] sm:$0xff] }
  0x1a   :  { %1320 = vmatprep.subr.bf16.mxu0 %v1511_v0  ;;  %v316_v25 = vpack.c.bf16 %v305_v24, %v304_v23  ;;  %v387_v27 = vld [vmem:[%s2403_s10 + $0x18] sm:$0xff]  ;;  %v386_v30 = vld [vmem:[%s2403_s10 + $0x10] sm:$0xff]  ;;  %v408_v2 = vld [vmem:[%s2403_s10 + $0xc0] sm:$0xff] }
  0x1b   :  { %1349 = vmatpush3.bf16.msra.mxu1 %v183_v26  ;;  %v385_v26 = vld [vmem:[%s2403_s10 + $0x8] sm:$0xff]  ;;  %v1833_v31 = vpack.c.bf16 %v386_v30, %v384_v29  ;;  %v391_v33 = vld [vmem:[%s2403_s10 + $0x38] sm:$0xff]  ;;  %v390_v36 = vld [vmem:[%s2403_s10 + $0x30] sm:$0xff] }
  0x1c   :  { %1350 = vmatprep.subr.bf16.mxu1 %v1511_v0  ;;  %v419_v28 = vpack.c.bf16 %v387_v27, %v385_v26  ;;  %v395_v39 = vld [vmem:[%s2403_s10 + $0x58] sm:$0xff]  ;;  %v394_v42 = vld [vmem:[%s2403_s10 + $0x50] sm:$0xff]  ;;  %v413_v5 = vld [vmem:[%s2403_s10 + $0xe8] sm:$0xff] }
  0x1d   :  { %1321 = vmatpush3.bf16.msra.mxu0 %v88_v35  ;;  %v388_v35 = vld [vmem:[%s2403_s10 + $0x20] sm:$0xff]  ;;  %v399_v45 = vld [vmem:[%s2403_s10 + $0x78] sm:$0xff]  ;;  %v398_v48 = vld [vmem:[%s2403_s10 + $0x70] sm:$0xff] }
  0x1e   :  { %1322 = vmatprep.subr.bf16.mxu0 %v1511_v0  ;;  %v1850_v37 = vpack.c.bf16 %v390_v36, %v388_v35  ;;  %v402_v54 = vld [vmem:[%s2403_s10 + $0x90] sm:$0xff]  ;;  %v411_v63 = vld [vmem:[%s2403_s10 + $0xd8] sm:$0xff]  ;;  %v412_v8 = vld [vmem:[%s2403_s10 + $0xe0] sm:$0xff] }
  0x1f   :  { %1351 = vmatpush3.bf16.msra.mxu1 %v184_v32  ;;  %v389_v32 = vld [vmem:[%s2403_s10 + $0x28] sm:$0xff]  ;;  %v1904_v55 = vpack.c.bf16 %v402_v54, %v400_v53  ;;  %v406_v60 = vld [vmem:[%s2403_s10 + $0xb0] sm:$0xff]  ;;  %v415_v6 = vld [vmem:[%s2403_s10 + $0xf8] sm:$0xff] }
  0x20   :  { %1352 = vmatprep.subr.bf16.mxu1 %v1511_v0  ;;  %v1842_v34 = vpack.c.bf16 %v391_v33, %v389_v32  ;;  %v410_v3 = vld [vmem:[%s2403_s10 + $0xd0] sm:$0xff]  ;;  %v1209_v15 = vld [vmem:[%s2405_s7] ss:$0 sm:$0xff] }
  0x21   :  { %1323 = vmatpush3.bf16.msra.mxu0 %v89_v41  ;;  %v392_v41 = vld [vmem:[%s2403_s10 + $0x40] sm:$0xff]  ;;  %v414_v9 = vld [vmem:[%s2403_s10 + $0xf0] sm:$0xff] }
  0x22   :  { %1324 = vmatprep.subr.bf16.mxu0 %v1511_v0  ;;  %v1868_v43 = vpack.c.bf16 %v394_v42, %v392_v41  ;;  %v382_v12 = vld [vmem:[%s2404_s1 + $0x10] sm:$0xff] }
  0x23   :  { %1353 = vmatpush3.bf16.msra.mxu1 %v185_v38  ;;  %v393_v38 = vld [vmem:[%s2403_s10 + $0x48] sm:$0xff] }
  0x24   :  { %1354 = vmatprep.subr.bf16.mxu1 %v1511_v0  ;;  %v1860_v40 = vpack.c.bf16 %v395_v39, %v393_v38 }
  0x25   :  { %1325 = vmatpush3.bf16.msra.mxu0 %v90_v47  ;;  %v396_v47 = vld [vmem:[%s2403_s10 + $0x60] sm:$0xff] }
  0x26   :  { %1326 = vmatprep.subr.bf16.mxu0 %v1511_v0  ;;  %v1886_v49 = vpack.c.bf16 %v398_v48, %v396_v47 }
  0x27   :  { %1355 = vmatpush3.bf16.msra.mxu1 %v186_v44  ;;  %v397_v44 = vld [vmem:[%s2403_s10 + $0x68] sm:$0xff] }
  0x28   :  { %1448 = vmatprep.subr.bf16.mxu1 %v419_v28  ;;  %v1878_v46 = vpack.c.bf16 %v399_v45, %v397_v44 }
  0x29   :  { %1327 = vmatpush3.bf16.msra.mxu0 %v91_v51  ;;  %v403_v51 = vld [vmem:[%s2403_s10 + $0x98] sm:$0xff] }
  0x2a   :  { %1357 = vmatmul.mubr.bf16.vlgmr.msra.gmra.mrb[0].mxu1 %v176_v50  ;;  %1368 = vmatprep.subr.bf16.mxu0 %v1511_v0  ;;  %v401_v50 = vld [vmem:[%s2403_s10 + $0x88] sm:$0xff] }
  0x2b   :  { %1360 = vmatprep.mubr.msk.bf16.mxu1 %vm1512_vm0, %v1511_v0  ;;  %1456 = vmatpush1.bf16.msra.mxu1 %v1833_v31  ;;  %v1896_v52 = vpack.c.bf16 %v403_v51, %v401_v50 }
  0x2c   :  { %1329 = vmatmul.mubr.bf16.vlgmr.msra.gmra.mrb[0].mxu0 %v81_v56  ;;  %1449 = vmatprep.subr.bf16.mxu1 %v1842_v34  ;;  %v405_v56 = vld [vmem:[%s2403_s10 + $0xa8] sm:$0xff] }
  0x2d   :  { %1332 = vmatprep.mubr.msk.bf16.mxu0 %vm1512_vm0, %v1511_v0  ;;  %1369 = vmatpush3.bf16.msra.mxu0 %v309_v4  ;;  %v1940_v4 = vpack.c.bf16 %v410_v3, %v408_v2 }
  0x2e   :  { %1370 = vmatprep.subr.bf16.mxu0 %v1511_v0 }
  0x2f   :  { %1457 = vmatpush1.bf16.msra.mxu1 %v1850_v37 }
  0x30   :  { %1450 = vmatprep.subr.bf16.mxu1 %v1860_v40 }
  0x31   :  { %1371 = vmatpush3.bf16.msra.mxu0 %v310_v7  ;;  %v1950_v7 = vpack.c.bf16 %v415_v6, %v413_v5  ;;  %v1208_v5 = vld [vmem:[%s2406_s5] ss:$0 sm:$0xff] }
  0x32   :  { %1361 = vmatmul.mubr.bf16.gmra.mrb[4].mxu1 %v177_v57  ;;  %1372 = vmatprep.subr.bf16.mxu0 %v1511_v0  ;;  %v407_v57 = vld [vmem:[%s2403_s10 + $0xb8] sm:$0xff] }
  0x33   :  { %1364 = vmatprep.mubr.msk.bf16.mxu1 %vm1512_vm0, %v1511_v0  ;;  %1458 = vmatpush1.bf16.msra.mxu1 %v1868_v43  ;;  %v1914_v58 = vpack.c.bf16 %v407_v57, %v405_v56 }
  0x34   :  { %1333 = vmatmul.mubr.bf16.gmra.mrb[4].mxu0 %v82_v61  ;;  %1451 = vmatprep.subr.bf16.mxu1 %v1878_v46  ;;  %v1922_v61 = vpack.c.bf16 %v406_v60, %v404_v59 }
  0x35   :  { %1336 = vmatprep.mubr.msk.bf16.mxu0 %vm1512_vm0, %v1511_v0  ;;  %1373 = vmatpush3.bf16.msra.mxu0 %v311_v10  ;;  %v1958_v10 = vpack.c.bf16 %v414_v9, %v412_v8 }
  0x36   :  { %1374 = vmatprep.subr.bf16.mxu0 %v1511_v0 }
  0x37   :  { %1459 = vmatpush1.bf16.msra.mxu1 %v1886_v49 }
  0x38   :  { %1452 = vmatprep.subr.bf16.mxu1 %v1896_v52 }
  0x39   :  { %1375 = vmatpush3.bf16.msra.mxu0 %v312_v13  ;;  %v383_v13 = vld [vmem:[%s2404_s1 + $0x18] sm:$0xff] }
  0x3a   :  { %1365 = vmatmul.mubr.bf16.gmra.mrb[8].mxu1 %v178_v62  ;;  %1376 = vmatprep.subr.bf16.mxu0 %v1511_v0  ;;  %v409_v62 = vld [vmem:[%s2403_s10 + $0xc8] sm:$0xff]  ;;  %v417_v14 = vpack.c.bf16 %v383_v13, %v382_v12 }
  0x3b   :  { %1460 = vmatpush1.bf16.msra.mxu1 %v1904_v55  ;;  %488 = vmatprep.mubr.bf16.mxu1 %v1513_v11 }
  0x3c   :  { %1337 = vmatmul.mubr.bf16.gmra.mrb[8].mxu0 %v83_v1  ;;  %1453 = vmatprep.subr.bf16.mxu1 %v1914_v58  ;;  %v1932_v1 = vpack.c.bf16 %v411_v63, %v409_v62 }
  0x3d   :  { %1384 = vmatprep.mubr.msk.bf16.mxu0 %vm1512_vm0, %v1511_v0  ;;  %1377 = vmatpush3.bf16.msra.mxu0 %v313_v16 }
  0x3e   :  { %1378 = vmatprep.subr.bf16.mxu0 %v1511_v0 }
  0x3f   :  { %1461 = vmatpush1.bf16.msra.mxu1 %v1922_v61 }
  0x40   :  { %1454 = vmatprep.subr.bf16.mxu1 %v1932_v1 }
  0x41   :  { %1379 = vmatpush3.bf16.msra.mxu0 %v314_v19 }
  0x42   :  { %1380 = vmatprep.subr.bf16.mxu0 %v1511_v0 }
  0x43   :  { %1462 = vmatpush1.bf16.msra.mxu1 %v1940_v4 }
  0x44   :  { %1455 = vmatprep.subr.bf16.mxu1 %v1950_v7 }
  0x45   :  { %1381 = vmatpush3.bf16.msra.mxu0 %v315_v22 }
  0x46   :  { %1382 = vmatprep.subr.bf16.mxu0 %v1511_v0 }
  0x47   :  { %1463 = vmatpush1.bf16.msra.mxu1 %v1958_v10 }
  0x49   :  { %1383 = vmatpush3.bf16.msra.mxu0 %v316_v25 }
  0x4a   :  { %446 = vmatprep.subr.bf16.mxu0 %v419_v28  ;;  %489 = vmatmul.mubr.bf16.vlgmr.msra.gmra.mrb[12].mxu1 %v417_v14 }
  0xfd   :  { %v228_v16 = vpop.f32.mrb[0].mxu1 }
  0xfe   :  { %v229_v17 = vadd.f32 %v1209_v15, %v228_v16  ;;  %v1358_v18 = vpop.f32.mrb[1].mxu1 }
  0xff   :  { %v231_v19 = vpop.f32.mrb[2].mxu1  ;;  %v133_v24 = vpop.f32.mrb[0].mxu0 }
 0x100   :  { %v1210_v20 = vmul.f32 -1.442695, %v229_v17  ;;  %v232_v21 = vadd.f32 %v1209_v15, %v231_v19  ;;  %v1359_v22 = vpop.f32.mrb[3].mxu1  ;;  %v1330_v25 = vpop.f32.mrb[1].mxu0  ;;  %v134_v12 = vadd.f32 %v1208_v5, %v133_v24 }
 0x101   :  { %v136_v26 = vpop.f32.mrb[2].mxu0 }
 0x102   :  { %1467 = vpow2.f32 %v1210_v20  ;;  %v1211_v23 = vmul.f32 -1.442695, %v232_v21  ;;  %v1331_v28 = vpop.f32.mrb[3].mxu0  ;;  %v137_v20 = vadd.f32 %v1208_v5, %v136_v26 }
 0x104   :  { %1469 = vpow2.f32 %v1211_v23 }
 0x105   :  { %v236_v27 = vpop.f32.mrb[4].mxu1 }
 0x106   :  { %v237_v29 = vadd.f32 %v1209_v15, %v236_v27  ;;  %v1362_v30 = vpop.f32.mrb[5].mxu1 }
 0x107   :  { %v239_v32 = vpop.f32.mrb[6].mxu1  ;;  %v141_v39 = vpop.f32.mrb[4].mxu0 }
 0x108   :  { %v1212_v33 = vmul.f32 -1.442695, %v237_v29  ;;  %v240_v35 = vadd.f32 %v1209_v15, %v239_v32  ;;  %v1363_v36 = vpop.f32.mrb[7].mxu1  ;;  %v1334_v41 = vpop.f32.mrb[5].mxu0  ;;  %v142_v27 = vadd.f32 %v1208_v5, %v141_v39 }
 0x109   :  { %v144_v44 = vpop.f32.mrb[6].mxu0 }
 0x10a   :  { %1471 = vpow2.f32 %v1212_v33  ;;  %v1213_v38 = vmul.f32 -1.442695, %v240_v35  ;;  %v1335_v48 = vpop.f32.mrb[7].mxu0  ;;  %v145_v24 = vadd.f32 %v1208_v5, %v144_v44 }
 0x10b   :  { %v1215_v48 = vld [vmem:[%s2408_s9] ss:$0 sm:$0xff] }
 0x10c   :  { %v1468_v42 = vpop.eup %1467  ;;  %1473 = vpow2.f32 %v1213_v38 }
 0x10d   :  { %v265_v45 = vadd.f32 1.0, %v1468_v42  ;;  %v244_v47 = vpop.f32.mrb[8].mxu1 }
 0x10e   :  { %v1470_v50 = vpop.eup %1469  ;;  %v245_v51 = vadd.f32 %v1209_v15, %v244_v47  ;;  %v1366_v53 = vpop.f32.mrb[9].mxu1 }
 0x10f   :  { %1475 = vrcp.f32 %v265_v45  ;;  %v266_v54 = vadd.f32 1.0, %v1470_v50  ;;  %v247_v56 = vpop.f32.mrb[10].mxu1  ;;  %v149_v60 = vpop.f32.mrb[8].mxu0 }
 0x110   :  { %v1214_v57 = vmul.f32 -1.442695, %v245_v51  ;;  %v1367_v59 = vpop.f32.mrb[11].mxu1  ;;  %v1338_v62 = vpop.f32.mrb[9].mxu0  ;;  %v150_v33 = vadd.f32 %v1208_v5, %v149_v60 }
 0x111   :  { %1477 = vrcp.f32 %v266_v54  ;;  %v152_v2 = vpop.f32.mrb[10].mxu0 }
 0x112   :  { %1479 = vpow2.f32 %v1214_v57  ;;  %v1339_v6 = vpop.f32.mrb[11].mxu0 }
 0x114   :  { %v1472_v63 = vpop.eup %1471 }
 0x115   :  { %v267_v3 = vadd.f32 1.0, %v1472_v63 }
 0x116   :  { %v1474_v8 = vpop.eup %1473 }
 0x117   :  { %1481 = vrcp.f32 %v267_v3  ;;  %v268_v9 = vadd.f32 1.0, %v1474_v8 }
 0x119   :  { %v1476_v13 = vpop.eup %1475  ;;  %1483 = vrcp.f32 %v268_v9 }
 0x11a   :  { %v280_v14 = vmul.f32 %v1476_v13, %v229_v17 }
 0x11b   :  { %v1478_v15 = vpop.eup %1477 }
 0x11c   :  { %v1480_v16 = vpop.eup %1479  ;;  %v281_v18 = vmul.f32 %v1478_v15, %v232_v21  ;;  %v1975_v19 = vadd.f32 %v280_v14, %v134_v12 }
 0x11d   :  { %v269_v22 = vadd.f32 1.0, %v1480_v16 }
 0x11e   :  { %v1977_v23 = vadd.f32 %v281_v18, %v137_v20 }
 0x11f   :  { %1485 = vrcp.f32 %v269_v22 }
 0x120   :  { %v306_v25 = vpack.c.bf16 %v1977_v23, %v1975_v19 }
 0x121   :  { %v1482_v28 = vpop.eup %1481 }
 0x122   :  { %v282_v30 = vmul.f32 %v1482_v28, %v237_v29  ;;  %1385 = vmatmul.mubr.bf16.vlgmr.msra.gmra.mrb[12].mxu0 %v306_v25 }
 0x123   :  { %v1484_v32 = vpop.eup %1483  ;;  %447 = vmatpush1.bf16.msra.mxu0 %v1833_v31  ;;  %1388 = vmatprep.mubr.msk.bf16.mxu0 %vm1512_vm0, %v1511_v0 }
 0x124   :  { %v283_v17 = vmul.f32 %v1484_v32, %v240_v35  ;;  %v1984_v21 = vadd.f32 %v282_v30, %v142_v27  ;;  %448 = vmatprep.subr.bf16.mxu0 %v1842_v34 }
 0x126   :  { %v1987_v26 = vadd.f32 %v283_v17, %v145_v24 }
 0x127   :  { %449 = vmatpush1.bf16.msra.mxu0 %v1850_v37  ;;  %v380_v37 = vld [vmem:[%s2404_s1] sm:$0xff] }
 0x128   :  { %450 = vmatprep.subr.bf16.mxu0 %v1860_v40  ;;  %v307_v29 = vpack.c.bf16 %v1987_v26, %v1984_v21  ;;  %v381_v40 = vld [vmem:[%s2404_s1 + $0x8] sm:$0xff] }
 0x129   :  { %v1486_v36 = vpop.eup %1485 }
 0x12a   :  { %v284_v31 = vmul.f32 %v1486_v36, %v245_v51  ;;  %1389 = vmatmul.mubr.bf16.gmra.mrb[16].mxu0 %v307_v29 }
 0x12b   :  { %451 = vmatpush1.bf16.msra.mxu0 %v1868_v43  ;;  %1392 = vmatprep.mubr.msk.bf16.mxu0 %vm1512_vm0, %v1511_v0  ;;  %v416_v43 = vpack.c.bf16 %v381_v40, %v380_v37 }
 0x12c   :  { %v1996_v35 = vadd.f32 %v284_v31, %v150_v33  ;;  %452 = vmatprep.subr.bf16.mxu0 %v1878_v46  ;;  %v436_v46 = vlaneseq }
 0x12e   :  { %v308_v34 = vpack.c.bf16 %v1996_v35, %v1996_v35 }
 0x12f   :  { %453 = vmatpush1.bf16.msra.mxu0 %v1886_v49  ;;  %v437_v49 = vshrl.u32 %v436_v46, 7  ;;  %v499_v46 = vld [vmem:[%s2409_s2] sm:$0x3] }
 0x130   :  { %454 = vmatprep.subr.bf16.mxu0 %v1896_v52  ;;  %vm554_vm2 = vcmp.gt.f32.partialorder %v499_v46, 0.5 }
 0x131   :  { %v2017_v52 = vsub.s32 0, %v437_v49 }
 0x132   :  { %1393 = vmatmul.mubr.bf16.gmra.mrb[20].mxu0 %v308_v34 }
 0x133   :  { %455 = vmatpush1.bf16.msra.mxu0 %v1904_v55  ;;  %478 = vmatprep.mubr.bf16.mxu0 %v1513_v11  ;;  %v434_v55 = vld [vmem:[%s2407_s11] sm:$0x3] }
 0x134   :  { %456 = vmatprep.subr.bf16.mxu0 %v1914_v58  ;;  %v2022_v58 = vsub.s32 1, %v437_v49  ;;  %v555_v49 = vsel %vm554_vm2, 1, %v1513_v11 }
 0x137   :  { %457 = vmatpush1.bf16.msra.mxu0 %v1922_v61  ;;  %v439_v61 = vrot.slane %v434_v55, %v2017_v52 }
 0x138   :  { %458 = vmatprep.subr.bf16.mxu0 %v1932_v1  ;;  %v443_v1 = vrot.slane %v434_v55, %v2022_v58  ;;  %v559_v55 = vrot.slane %v555_v49, %v2017_v52 }
 0x13a   :  { %vm2040_vm3 = vcmp.eq.s32.totalorder %v559_v55, 1 }
 0x13b   :  { %459 = vmatpush1.bf16.msra.mxu0 %v1940_v4  ;;  %v490_v4 = vpop.f32.mrb[12].mxu1 }
 0x13c   :  { %460 = vmatprep.subr.bf16.mxu0 %v1950_v7  ;;  %v491_v7 = vadd.f32 %v490_v4, %v439_v61  ;;  %v492_v38 = vpop.f32.mrb[13].mxu1 }
 0x13d   :  { %v493_v39 = vadd.f32 %v492_v38, %v443_v1 }
 0x13f   :  { %461 = vmatpush1.bf16.msra.mxu0 %v1958_v10  ;;  %v494_v10 = vpop.f32.mrb[14].mxu1 }
 0x140   :  { %v495_v41 = vadd.f32 %v494_v10, %v439_v61  ;;  %v496_v42 = vpop.f32.mrb[15].mxu1 }
 0x141   :  { %v497_v44 = vadd.f32 %v496_v42, %v443_v1 }
 0x142   :  { %479 = vmatmul.mubr.bf16.vlgmr.msra.gmra.mrb[24].mxu0 %v416_v43  ;;  %v658_v45 = vpack.c.bf16 %v495_v41, %v491_v7 }
 0x143   :  { %v2026_v47 = vpack.c.bf16 %v497_v44, %v493_v39 }
 0x1f5   :  { %v358_v50 = vpop.f32.mrb[12].mxu0 }
 0x1f6   :  { %v1386_v51 = vpop.f32.mrb[13].mxu0  ;;  %v359_v54 = vadd.f32 %v1215_v48, %v358_v50  ;;  %v730_v50 = vrot.slane %v555_v49, %v2022_v58 }
 0x1f7   :  { %v361_v53 = vpop.f32.mrb[14].mxu0 }
 0x1f8   :  { %v362_v56 = vadd.f32 %v1215_v48, %v361_v53  ;;  %v1387_v57 = vpop.f32.mrb[15].mxu0  ;;  %vm731_vm6 = vcmp.eq.s32.totalorder %v730_v50, 1 }
 0x1fa   :  { %v500_v59 = vpack.c.bf16 %v362_v56, %v359_v54 }
 0x1fc   :  { %1398 = vmatprep.mubr.bf16.mxu1 %v500_v59 }
 0x1fd   :  { %v366_v60 = vpop.f32.mrb[16].mxu0 }
 0x1fe   :  { %v1390_v62 = vpop.f32.mrb[17].mxu0  ;;  %v367_v2 = vadd.f32 %v1215_v48, %v366_v60 }
 0x1ff   :  { %v369_v63 = vpop.f32.mrb[18].mxu0 }
 0x200   :  { %v370_v3 = vadd.f32 %v1215_v48, %v369_v63  ;;  %v1391_v5 = vpop.f32.mrb[19].mxu0  ;;  %v501_v40 = vpack.c.bf16 %v367_v2, %v367_v2 }
 0x202   :  { %v656_v6 = vpack.c.bf16 %v370_v3, %v367_v2 }
 0x204   :  { %v663_v8 = vshll.u32 %v656_v6, 16  ;;  %v661_v20 = vshrl.u32 %v656_v6, 16 }
 0x205   :  { %v374_v9 = vpop.f32.mrb[20].mxu0 }
 0x206   :  { %v375_v12 = vadd.f32 %v1215_v48, %v374_v9  ;;  %v1394_v13 = vpop.f32.mrb[21].mxu0  ;;  %v665_v15 = vrot.slane %v663_v8, 1 }
 0x207   :  { %v377_v14 = vpop.f32.mrb[22].mxu0 }
 0x208   :  { %v657_v16 = vpack.c.bf16 %v375_v12, %v375_v12  ;;  %v1395_v18 = vpop.f32.mrb[23].mxu0  ;;  %v666_v27 = vor.u32 %v665_v15, %v661_v20 }
 0x20a   :  { %v668_v22 = vshll.u32 %v657_v16, 16  ;;  %v672_v43 = vshrl.u32 %v657_v16, 16 }
 0x20c   :  { %v670_v25 = vrot.slane %v668_v22, 1 }
 0x20e   :  { %v671_v28 = vsel %vm659_vm1, %v666_v27, %v670_v25 }
 0x215   :  { %v480_v30 = vpop.f32.mrb[24].mxu0 }
 0x216   :  { %v482_v24 = vpop.f32.mrb[25].mxu0  ;;  %v481_v17 = vadd.f32 %v480_v30, %v439_v61 }
 0x217   :  { %v484_v32 = vpop.f32.mrb[26].mxu0  ;;  %v483_v36 = vadd.f32 %v482_v24, %v443_v1 }
 0x218   :  { %v485_v33 = vadd.f32 %v484_v32, %v439_v61  ;;  %v486_v29 = vpop.f32.mrb[27].mxu0 }
 0x219   :  { %v487_v31 = vadd.f32 %v486_v29, %v443_v1 }
 0x21a   :  { %v502_v34 = vpack.c.bf16 %v485_v33, %v481_v17 }
 0x21b   :  { %v601_v37 = vpack.c.bf16 %v487_v31, %v483_v36 }
 0x21c   :  { %1396 = vmatprep.subr.bf16.mxu1 %v502_v34 }
 0x21d   :  { %1397 = vmatpush3.bf16.xpose.msra.mxu1 %v502_v34  ;;  %1402 = vmatprep.subr.bf16.mxu0 %v601_v37 }
 0x21e   :  { %1403 = vmatpush3.bf16.msra.mxu0 %v601_v37  ;;  %1408 = vmatprep.subr.bf16.mxu1 %v658_v45 }
 0x21f   :  { %1414 = vmatprep.subr.bf16.mxu0 %v2026_v47 }
 0x224   :  { %1399 = vmatmul.mubr.bf16.vlgmr.msra.gmra.mrb[16].mxu1 %v501_v40 }
 0x225   :  { %1409 = vmatpush3.bf16.xpose.msra.mxu1 %v658_v45  ;;  %1410 = vmatprep.mubr.bf16.mxu1 %v671_v28 }
 0x226   :  { %1420 = vmatprep.subr.bf16.mxu1 %v1511_v0 }
 0x22c   :  { %1411 = vmatmul.mubr.bf16.vlgmr.msra.gmra.mrb[20].mxu1 %v672_v43 }
 0x22d   :  { %1436 = vmatprep.mubr.msk.bf16.mxu1 %vm1512_vm0, %v1511_v0 }
 0x2f7   :  { %v1400_v61 = vpop.f32.mrb[16].mxu1 }
 0x2f8   :  { %v553_v4 = vmul.f32 0.088388346, %v1400_v61  ;;  %v537_v7 = vpop.f32.mrb[17].mxu1 }
 0x2f9   :  { %v551_v38 = vmul.f32 0.088388346, %v537_v7  ;;  %v1401_v39 = vpop.f32.mrb[18].mxu1 }
 0x2fa   :  { %v540_v10 = vpop.f32.mrb[19].mxu1  ;;  %v563_v41 = vsel %vm2040_vm3, %v553_v4, -1e+30  ;;  %v839_v39 = vld [vmem:[%s2410_s12 + $0x8] sm:$0xff] }
 0x2fb   :  { %v552_v42 = vmul.f32 0.088388346, %v540_v10  ;;  %v572_v44 = vsel %vm571_vm4, %v563_v41, -inf  ;;  %v561_v45 = vsel %vm2040_vm3, %v551_v38, -1e+30  ;;  %v838_v38 = vld [vmem:[%s2410_s12] sm:$0xff] }
 0x2fc   :  { %573 = vmax.xlane.f32.xlu1 %v572_v44  ;;  %v565_v48 = vsel %vm564_vm5, %v561_v45, -inf  ;;  %v840_v10 = vld [vmem:[%s2410_s12 + $0x10] sm:$0xff] }
 0x2fd   :  { %566 = vmax.xlane.f32.xlu0 %v565_v48  ;;  %v562_v51 = vsel %vm2040_vm3, %v552_v42, -1e+30  ;;  %v841_v42 = vld [vmem:[%s2410_s12 + $0x18] sm:$0xff]  ;;  %v843_v48 = vld [vmem:[%s2410_s12 + $0x28] sm:$0xff] }
 0x2fe   :  { %v568_v56 = vsel %vm564_vm5, %v562_v51, -inf  ;;  %v858_v44 = vpack.c.bf16 %v841_v42, %v840_v10  ;;  %v947_v10 = vld [vmem:[%s2411_s14 + $0x48] sm:$0xff] }
 0x2ff   :  { %v1412_v53 = vpop.f32.mrb[20].mxu1 }
 0x300   :  { %v710_v54 = vpop.f32.mrb[21].mxu1  ;;  %v726_v57 = vmul.f32 0.088388346, %v1412_v53  ;;  %v845_v53 = vld [vmem:[%s2410_s12 + $0x38] sm:$0xff] }
 0x301   :  { %v724_v59 = vmul.f32 0.088388346, %v710_v54  ;;  %v1413_v60 = vpop.f32.mrb[22].mxu1  ;;  %569 = vmax.xlane.f32.xlu0 %v568_v56  ;;  %v846_v56 = vld [vmem:[%s2410_s12 + $0x40] sm:$0xff] }
 0x302   :  { %v713_v62 = vpop.f32.mrb[23].mxu1  ;;  %v734_v6 = vsel %vm731_vm6, %v726_v57, -1e+30  ;;  %v847_v57 = vld [vmem:[%s2410_s12 + $0x48] sm:$0xff]  ;;  %v848_v60 = vld [vmem:[%s2410_s12 + $0x50] sm:$0xff] }
 0x303   :  { %v725_v63 = vmul.f32 0.088388346, %v713_v62  ;;  %v732_v2 = vsel %vm731_vm6, %v724_v59, -1e+30  ;;  %v741_v9 = vsel %vm571_vm4, %v734_v6, -inf  ;;  %v861_v59 = vpack.c.bf16 %v847_v57, %v846_v56  ;;  %v849_v62 = vld [vmem:[%s2410_s12 + $0x58] sm:$0xff] }
 0x304   :  { %v735_v3 = vsel %vm564_vm5, %v732_v2, -inf  ;;  %v950_v56 = vld [vmem:[%s2411_s14 + $0x60] sm:$0xff]  ;;  %v952_v57 = vld [vmem:[%s2411_s14 + $0x70] sm:$0xff] }
 0x305   :  { %736 = vmax.xlane.f32.xlu1 %v735_v3  ;;  %v733_v5 = vsel %vm731_vm6, %v725_v63, -1e+30  ;;  %v862_v63 = vpack.c.bf16 %v849_v62, %v848_v60  ;;  %v851_v3 = vld [vmem:[%s2410_s12 + $0x68] sm:$0xff]  ;;  %v957_v60 = vld [vmem:[%s2411_s14 + $0x98] sm:$0xff]  ;;  %v979_v62 = vpack.c.bf16 %v952_v57, %v950_v56 }
 0x306   :  { %v738_v8 = vsel %vm564_vm5, %v733_v5, -inf  ;;  %v1093_v56 = vld [vmem:[%s2412_s16 + $0xa8] sm:$0xff] }
 0x307   :  { %739 = vmax.xlane.f32.xlu0 %v738_v8 }
 0x309   :  { %742 = vmax.xlane.f32.xlu1 %v741_v9 }
 0x389   :  { %v574_v12 = vpop.xlane.xlu1 %573 }
 0x38a   :  { %v577_v13 = vsub.f32 %v563_v41, %v574_v12  ;;  %v567_v14 = vpop.xlane.xlu0 %566  ;;  %v857_v41 = vpack.c.bf16 %v839_v39, %v838_v38  ;;  %v942_v38 = vld [vmem:[%s2411_s14 + $0x20] sm:$0xff]  ;;  %v944_v39 = vld [vmem:[%s2411_s14 + $0x30] sm:$0xff] }
 0x38b   :  { %v575_v15 = vsub.f32 %v561_v45, %v567_v14  ;;  %v842_v45 = vld [vmem:[%s2410_s12 + $0x20] sm:$0xff]  ;;  %v975_v42 = vpack.c.bf16 %v944_v39, %v942_v38  ;;  %v1089_v39 = vld [vmem:[%s2412_s16 + $0x88] sm:$0xff] }
 0x38c   :  { %v582_v16 = vmul.f32 1.442695, %v577_v13  ;;  %1421 = vmatpush3.bf16.msra.mxu1 %v857_v41  ;;  %v859_v50 = vpack.c.bf16 %v843_v48, %v842_v45  ;;  %v949_v41 = vld [vmem:[%s2411_s14 + $0x58] sm:$0xff]  ;;  %v946_v45 = vld [vmem:[%s2411_s14 + $0x40] sm:$0xff]  ;;  %v948_v48 = vld [vmem:[%s2411_s14 + $0x50] sm:$0xff] }
 0x38d   :  { %v578_v18 = vmul.f32 1.442695, %v575_v15  ;;  %1422 = vmatprep.subr.bf16.mxu1 %v1511_v0  ;;  %v1088_v38 = vld [vmem:[%s2412_s16 + $0x80] sm:$0xff] }
 0x38e   :  { %v570_v20 = vpop.xlane.xlu0 %569 }
 0x38f   :  { %1487 = vpow2.f32 %v578_v18  ;;  %v576_v22 = vsub.f32 %v562_v51, %v570_v20  ;;  %v844_v51 = vld [vmem:[%s2410_s12 + $0x30] sm:$0xff] }
 0x390   :  { %1489 = vpow2.f32 %v582_v16  ;;  %1423 = vmatpush3.bf16.msra.mxu1 %v858_v44  ;;  %v860_v54 = vpack.c.bf16 %v845_v53, %v844_v51  ;;  %v978_v44 = vpack.c.bf16 %v949_v41, %v947_v10  ;;  %v953_v51 = vld [vmem:[%s2411_s14 + $0x78] sm:$0xff]  ;;  %v977_v53 = vpack.c.bf16 %v948_v48, %v946_v45  ;;  %v1072_v10 = vld [vmem:[%s2412_s16] sm:$0xff] }
 0x391   :  { %v580_v25 = vmul.f32 1.442695, %v576_v22  ;;  %1424 = vmatprep.subr.bf16.mxu1 %v1511_v0  ;;  %v1118_v41 = vpack.c.bf16 %v1089_v39, %v1088_v38  ;;  %v1091_v45 = vld [vmem:[%s2412_s16 + $0x98] sm:$0xff]  ;;  %v1101_v39 = vld [vmem:[%s2412_s16 + $0xe8] sm:$0xff] }
 0x392   :  { %v737_v27 = vpop.xlane.xlu1 %736 }
 0x393   :  { %1491 = vpow2.f32 %v580_v25  ;;  %v744_v28 = vsub.f32 %v732_v2, %v737_v27  ;;  %v850_v2 = vld [vmem:[%s2410_s12 + $0x60] sm:$0xff] }
 0x394   :  { %v740_v30 = vpop.xlane.xlu0 %739  ;;  %1425 = vmatpush3.bf16.msra.mxu1 %v859_v50  ;;  %v951_v50 = vld [vmem:[%s2411_s14 + $0x68] sm:$0xff] }
 0x395   :  { %v747_v24 = vmul.f32 1.442695, %v744_v28  ;;  %v745_v32 = vsub.f32 %v733_v5, %v740_v30  ;;  %1426 = vmatprep.subr.bf16.mxu1 %v1511_v0  ;;  %v863_v5 = vpack.c.bf16 %v851_v3, %v850_v2  ;;  %v954_v2 = vld [vmem:[%s2411_s14 + $0x80] sm:$0xff]  ;;  %v956_v3 = vld [vmem:[%s2411_s14 + $0x90] sm:$0xff] }
 0x396   :  { %v743_v17 = vpop.xlane.xlu1 %742 }
 0x397   :  { %1493 = vpow2.f32 %v747_v24  ;;  %v749_v33 = vmul.f32 1.442695, %v745_v32  ;;  %v746_v29 = vsub.f32 %v734_v6, %v743_v17 }
 0x398   :  { %1427 = vmatpush3.bf16.msra.mxu1 %v860_v54  ;;  %v980_v54 = vpack.c.bf16 %v953_v51, %v951_v50  ;;  %v1074_v51 = vld [vmem:[%s2412_s16 + $0x10] sm:$0xff] }
 0x399   :  { %v2057_v36 = vpop.eup %1487  ;;  %1495 = vpow2.f32 %v749_v33  ;;  %v751_v31 = vmul.f32 1.442695, %v746_v29  ;;  %1428 = vmatprep.subr.bf16.mxu1 %v1511_v0 }
 0x39a   :  { %v584_v34 = vsel %vm564_vm5, %v2057_v36, 0.0  ;;  %v2061_v37 = vpop.eup %1489 }
 0x39b   :  { %1497 = vpow2.f32 %v751_v31  ;;  %585 = vadd.xlane.f32.xlu0 %v584_v34  ;;  %v590_v43 = vsel %vm571_vm4, %v2061_v37, 0.0  ;;  %v852_v34 = vld [vmem:[%s2410_s12 + $0x70] sm:$0xff] }
 0x39c   :  { %1429 = vmatpush3.bf16.msra.mxu1 %v861_v59  ;;  %v955_v59 = vld [vmem:[%s2411_s14 + $0x88] sm:$0xff] }
 0x39d   :  { %v2063_v40 = vpop.eup %1491  ;;  %1430 = vmatprep.subr.bf16.mxu1 %v1511_v0 }
 0x39e   :  { %v587_v46 = vsel %vm564_vm5, %v2063_v40, 0.0 }
 0x39f   :  { %591 = vadd.xlane.f32.xlu0 %v590_v43  ;;  %588 = vadd.xlane.f32.xlu1 %v587_v46  ;;  %v941_v43 = vld [vmem:[%s2411_s14 + $0x18] sm:$0xff]  ;;  %v938_v46 = vld [vmem:[%s2411_s14] sm:$0xff] }
 0x3a0   :  { %1431 = vmatpush3.bf16.msra.mxu1 %v862_v63  ;;  %v982_v63 = vpack.c.bf16 %v957_v60, %v955_v59  ;;  %v1076_v60 = vld [vmem:[%s2412_s16 + $0x20] sm:$0xff] }
 0x3a1   :  { %v2069_v49 = vpop.eup %1493  ;;  %1432 = vmatprep.subr.bf16.mxu1 %v1511_v0 }
 0x3a2   :  { %v753_v55 = vsel %vm564_vm5, %v2069_v49, 0.0 }
 0x3a3   :  { %v2073_v61 = vpop.eup %1495  ;;  %754 = vadd.xlane.f32.xlu1 %v753_v55  ;;  %v940_v55 = vld [vmem:[%s2411_s14 + $0x10] sm:$0xff] }
 0x3a4   :  { %v756_v1 = vsel %vm564_vm5, %v2073_v61, 0.0  ;;  %1433 = vmatpush3.bf16.msra.mxu1 %v863_v5  ;;  %v959_v5 = vld [vmem:[%s2411_s14 + $0xa8] sm:$0xff] }
 0x3a5   :  { %v2077_v4 = vpop.eup %1497  ;;  %757 = vadd.xlane.f32.xlu0 %v756_v1  ;;  %1434 = vmatprep.subr.bf16.mxu1 %v1511_v0  ;;  %v945_v1 = vld [vmem:[%s2411_s14 + $0x38] sm:$0xff] }
 0x3a6   :  { %v759_v7 = vsel %vm571_vm4, %v2077_v4, 0.0 }
 0x3a7   :  { %760 = vadd.xlane.f32.xlu1 %v759_v7 }
 0x428   :  { %v586_v6 = vpop.xlane.xlu0 %585 }
 0x429   :  { %1499 = vrcp.f32 %v586_v6  ;;  %v961_v6 = vld [vmem:[%s2411_s14 + $0xb8] sm:$0xff] }
 0x42c   :  { %v589_v8 = vpop.xlane.xlu1 %588  ;;  %v592_v9 = vpop.xlane.xlu0 %591 }
 0x42d   :  { %1501 = vrcp.f32 %v589_v8  ;;  %v981_v8 = vpack.c.bf16 %v956_v3, %v954_v2  ;;  %v1095_v2 = vld [vmem:[%s2412_s16 + $0xb8] sm:$0xff] }
 0x42e   :  { %1503 = vrcp.f32 %v592_v9  ;;  %v984_v9 = vpack.c.bf16 %v961_v6, %v959_v5  ;;  %v1078_v6 = vld [vmem:[%s2412_s16 + $0x30] sm:$0xff] }
 0x430   :  { %v755_v12 = vpop.xlane.xlu1 %754 }
 0x431   :  { %1505 = vrcp.f32 %v755_v12  ;;  %v958_v12 = vld [vmem:[%s2411_s14 + $0xa0] sm:$0xff] }
 0x432   :  { %v758_v13 = vpop.xlane.xlu0 %757 }
 0x433   :  { %1507 = vrcp.f32 %v758_v13  ;;  %v1500_v15 = vpop.eup %1499  ;;  %v960_v13 = vld [vmem:[%s2411_s14 + $0xb0] sm:$0xff] }
 0x434   :  { %v761_v14 = vpop.xlane.xlu1 %760  ;;  %v596_v20 = vmul.f32 %v1500_v15, %v2057_v36 }
 0x435   :  { %1509 = vrcp.f32 %v761_v14  ;;  %v983_v14 = vpack.c.bf16 %v960_v13, %v958_v12  ;;  %v1097_v12 = vld [vmem:[%s2412_s16 + $0xc8] sm:$0xff] }
 0x437   :  { %v1502_v16 = vpop.eup %1501 }
 0x438   :  { %v1504_v18 = vpop.eup %1503  ;;  %v597_v22 = vmul.f32 %v1502_v16, %v2063_v40  ;;  %v939_v40 = vld [vmem:[%s2411_s14 + $0x8] sm:$0xff] }
 0x439   :  { %v598_v25 = vmul.f32 %v1504_v18, %v2061_v37 }
 0x43a   :  { %v599_v27 = vpack.c.bf16 %v597_v22, %v596_v20 }
 0x43b   :  { %v1506_v28 = vpop.eup %1505  ;;  %v600_v30 = vpack.c.bf16 %v598_v25, %v598_v25 }
 0x43c   :  { %1404 = vmatprep.mubr.msk.bf16.mxu0 %vm564_vm5, %v599_v27  ;;  %v765_v32 = vmul.f32 %v1506_v28, %v2069_v49  ;;  %v974_v49 = vpack.c.bf16 %v941_v43, %v939_v40  ;;  %v962_v43 = vld [vmem:[%s2411_s14 + $0xc0] sm:$0xff] }
 0x43d   :  { %v1508_v24 = vpop.eup %1507  ;;  %1405 = vmatmul.mubr.msk.bf16.vlgmr.msra.gmra.mrb[28].mxu0 %vm564_vm5, %v600_v30 }
 0x43e   :  { %1415 = vmatpush3.bf16.msra.mxu0 %v2026_v47  ;;  %v766_v17 = vmul.f32 %v1508_v24, %v2073_v61  ;;  %v853_v47 = vld [vmem:[%s2410_s12 + $0x78] sm:$0xff]  ;;  %v943_v61 = vld [vmem:[%s2411_s14 + $0x28] sm:$0xff] }
 0x43f   :  { %v1510_v33 = vpop.eup %1509  ;;  %v864_v37 = vpack.c.bf16 %v853_v47, %v852_v34  ;;  %v976_v7 = vpack.c.bf16 %v945_v1, %v943_v61  ;;  %1001 = vmatprep.subr.bf16.mxu0 %v974_v49  ;;  %v963_v47 = vld [vmem:[%s2411_s14 + $0xc8] sm:$0xff]  ;;  %v966_v1 = vld [vmem:[%s2411_s14 + $0xe0] sm:$0xff] }
 0x440   :  { %v767_v29 = vmul.f32 %v1510_v33, %v2077_v4  ;;  %v768_v36 = vpack.c.bf16 %v766_v17, %v765_v32  ;;  %v973_v4 = vpack.c.bf16 %v940_v55, %v938_v46  ;;  %v964_v46 = vld [vmem:[%s2411_s14 + $0xd0] sm:$0xff]  ;;  %v967_v49 = vld [vmem:[%s2411_s14 + $0xe8] sm:$0xff]  ;;  %v969_v55 = vld [vmem:[%s2411_s14 + $0xf8] sm:$0xff] }
 0x441   :  { %1435 = vmatpush3.bf16.msra.mxu1 %v864_v37  ;;  %v965_v37 = vld [vmem:[%s2411_s14 + $0xd8] sm:$0xff]  ;;  %v988_v61 = vpack.c.bf16 %v969_v55, %v967_v49 }
 0x442   :  { %v769_v31 = vpack.c.bf16 %v767_v29, %v767_v29  ;;  %1416 = vmatprep.mubr.msk.bf16.mxu0 %vm564_vm5, %v768_v36  ;;  %v986_v40 = vpack.c.bf16 %v965_v37, %v963_v47  ;;  %1278 = vmatprep.subr.bf16.mxu1 %v1118_v41  ;;  %v1084_v41 = vld [vmem:[%s2412_s16 + $0x60] sm:$0xff] }
 0x445   :  { %1417 = vmatmul.mubr.msk.bf16.vlgmr.msra.gmra.mrb[32].mxu0 %vm564_vm5, %v769_v31 }
 0x446   :  { %1033 = vmatprep.mubr.bf16.mxu0 %v1513_v11  ;;  %1002 = vmatpush1.bf16.msra.mxu0 %v973_v4  ;;  %v968_v4 = vld [vmem:[%s2411_s14 + $0xf0] sm:$0xff] }
 0x447   :  { %1003 = vmatprep.subr.bf16.mxu0 %v976_v7  ;;  %v987_v7 = vpack.c.bf16 %v968_v4, %v966_v1 }
 0x44a   :  { %1004 = vmatpush1.bf16.msra.mxu0 %v975_v42  ;;  %v1073_v42 = vld [vmem:[%s2412_s16 + $0x8] sm:$0xff] }
 0x44b   :  { %1005 = vmatprep.subr.bf16.mxu0 %v978_v44  ;;  %v1090_v44 = vld [vmem:[%s2412_s16 + $0x90] sm:$0xff]  ;;  %v1110_v48 = vpack.c.bf16 %v1073_v42, %v1072_v10  ;;  %v1085_v42 = vld [vmem:[%s2412_s16 + $0x68] sm:$0xff] }
 0x44c   :  { %v1119_v50 = vpack.c.bf16 %v1091_v45, %v1090_v44  ;;  %v1116_v44 = vpack.c.bf16 %v1085_v42, %v1084_v41  ;;  %v1102_v45 = vld [vmem:[%s2412_s16 + $0xf0] sm:$0xff] }
 0x44e   :  { %1006 = vmatpush1.bf16.msra.mxu0 %v977_v53  ;;  %v1075_v53 = vld [vmem:[%s2412_s16 + $0x18] sm:$0xff] }
 0x44f   :  { %1007 = vmatprep.subr.bf16.mxu0 %v980_v54  ;;  %v1092_v54 = vld [vmem:[%s2412_s16 + $0xa0] sm:$0xff]  ;;  %v1111_v57 = vpack.c.bf16 %v1075_v53, %v1074_v51  ;;  %v1086_v51 = vld [vmem:[%s2412_s16 + $0x70] sm:$0xff]  ;;  %v1087_v53 = vld [vmem:[%s2412_s16 + $0x78] sm:$0xff] }
 0x450   :  { %v1120_v59 = vpack.c.bf16 %v1093_v56, %v1092_v54  ;;  %v1117_v54 = vpack.c.bf16 %v1087_v53, %v1086_v51  ;;  %v989_v56 = vld [vmem:[%s2414_s15] sm:$0x3] }
 0x452   :  { %1008 = vmatpush1.bf16.msra.mxu0 %v979_v62  ;;  %v1077_v62 = vld [vmem:[%s2412_s16 + $0x28] sm:$0xff] }
 0x453   :  { %1009 = vmatprep.subr.bf16.mxu0 %v982_v63  ;;  %v1094_v63 = vld [vmem:[%s2412_s16 + $0xb0] sm:$0xff]  ;;  %v1112_v3 = vpack.c.bf16 %v1077_v62, %v1076_v60 }
 0x454   :  { %v1121_v5 = vpack.c.bf16 %v1095_v2, %v1094_v63 }
 0x456   :  { %1010 = vmatpush1.bf16.msra.mxu0 %v981_v8  ;;  %v1079_v8 = vld [vmem:[%s2412_s16 + $0x38] sm:$0xff] }
 0x457   :  { %1011 = vmatprep.subr.bf16.mxu0 %v984_v9  ;;  %v1096_v9 = vld [vmem:[%s2412_s16 + $0xc0] sm:$0xff]  ;;  %v1113_v13 = vpack.c.bf16 %v1079_v8, %v1078_v6 }
 0x45a   :  { %1012 = vmatpush1.bf16.msra.mxu0 %v983_v14  ;;  %v1122_v14 = vpack.c.bf16 %v1097_v12, %v1096_v9 }
 0x45b   :  { %1013 = vmatprep.subr.bf16.mxu0 %v986_v40 }
 0x510   :  { %v1406_v15 = vpop.f32.mrb[28].mxu0 }
 0x511   :  { %v642_v16 = vpop.f32.mrb[29].mxu0 }
 0x512   :  { %v1407_v18 = vpop.f32.mrb[30].mxu0 }
 0x513   :  { %v645_v20 = vpop.f32.mrb[31].mxu0  ;;  %v1098_v18 = vld [vmem:[%s2412_s16 + $0xd0] sm:$0xff] }
 0x514   :  { %v854_v22 = vpack.c.bf16 %v645_v20, %v642_v16  ;;  %v1081_v16 = vld [vmem:[%s2412_s16 + $0x48] sm:$0xff]  ;;  %v1099_v20 = vld [vmem:[%s2412_s16 + $0xd8] sm:$0xff] }
 0x516   :  { %1437 = vmatmul.mubr.bf16.vlgmr.msra.gmra.mrb[24].mxu1 %v854_v22 }
 0x517   :  { %1440 = vmatprep.mubr.msk.bf16.mxu1 %vm1512_vm0, %v1511_v0  ;;  %1279 = vmatpush3.bf16.msra.mxu1 %v1110_v48  ;;  %v1103_v48 = vld [vmem:[%s2412_s16 + $0xf8] sm:$0xff] }
 0x518   :  { %v1418_v25 = vpop.f32.mrb[32].mxu0  ;;  %1280 = vmatprep.subr.bf16.mxu1 %v1119_v50  ;;  %v1125_v50 = vpack.c.bf16 %v1103_v48, %v1102_v45 }
 0x519   :  { %v811_v27 = vpop.f32.mrb[33].mxu0  ;;  %v832_v32 = vrot.slane %v1418_v25, 7  ;;  %v1123_v25 = vpack.c.bf16 %v1099_v20, %v1098_v18 }
 0x51a   :  { %v829_v28 = vrot.slane %v811_v27, 7  ;;  %v1419_v30 = vpop.f32.mrb[34].mxu0 }
 0x51b   :  { %v814_v24 = vpop.f32.mrb[35].mxu0  ;;  %1281 = vmatpush3.bf16.msra.mxu1 %v1111_v57  ;;  %v994_v57 = vrot.slane %v989_v56, %v2017_v52 }
 0x51c   :  { %v830_v17 = vrot.slane %v814_v24, 7  ;;  %v837_v33 = vsel %vm828_vm7, %v1406_v15, %v829_v28  ;;  %1282 = vmatprep.subr.bf16.mxu1 %v1120_v59  ;;  %v1080_v15 = vld [vmem:[%s2412_s16 + $0x40] sm:$0xff]  ;;  %v998_v59 = vrot.slane %v989_v56, %v2022_v58 }
 0x51d   :  { %v1114_v22 = vpack.c.bf16 %v1081_v16, %v1080_v15  ;;  %v1220_v24 = vld [vmem:[%s2413_s13] ss:$0 sm:$0xff] }
 0x51e   :  { %v831_v29 = vsel %vm828_vm7, %v829_v28, %v830_v17  ;;  %v833_v36 = vsel %vm828_vm7, %v830_v17, %v832_v32 }
 0x51f   :  { %v855_v31 = vpack.c.bf16 %v831_v29, %v837_v33  ;;  %v856_v34 = vpack.c.bf16 %v833_v36, %v833_v36  ;;  %1283 = vmatpush3.bf16.msra.mxu1 %v1112_v3 }
 0x520   :  { %1284 = vmatprep.subr.bf16.mxu1 %v1121_v5 }
 0x521   :  { %1441 = vmatmul.mubr.bf16.gmra.mrb[28].mxu1 %v855_v31 }
 0x522   :  { %1444 = vmatprep.mubr.msk.bf16.mxu1 %vm1512_vm0, %v1511_v0  ;;  %v985_v0 = vpack.c.bf16 %v964_v46, %v962_v43 }
 0x523   :  { %1285 = vmatpush3.bf16.msra.mxu1 %v1113_v13 }
 0x524   :  { %1014 = vmatpush1.bf16.msra.mxu0 %v985_v0  ;;  %1286 = vmatprep.subr.bf16.mxu1 %v1122_v14 }
 0x525   :  { %1015 = vmatprep.subr.bf16.mxu0 %v988_v61 }
 0x527   :  { %1287 = vmatpush3.bf16.msra.mxu1 %v1114_v22 }
 0x528   :  { %1016 = vmatpush1.bf16.msra.mxu0 %v987_v7  ;;  %1288 = vmatprep.subr.bf16.mxu1 %v1123_v25  ;;  %v1082_v7 = vld [vmem:[%s2412_s16 + $0x50] sm:$0xff] }
 0x529   :  { %1445 = vmatmul.mubr.bf16.gmra.mrb[32].mxu1 %v856_v34 }
 0x5e9   :  { %v899_v27 = vpop.f32.mrb[24].mxu1 }
 0x5ea   :  { %v921_v28 = vadd.f32 %v899_v27, %v1975_v19  ;;  %v1438_v30 = vpop.f32.mrb[25].mxu1 }
 0x5eb   :  { %v902_v32 = vpop.f32.mrb[26].mxu1 }
 0x5ec   :  { %v922_v17 = vadd.f32 %v902_v32, %v1977_v23  ;;  %v1439_v33 = vpop.f32.mrb[27].mxu1  ;;  %v2319_v29 = vadd.f32 %v1220_v24, %v921_v28 }
 0x5ee   :  { %v2321_v36 = vadd.f32 %v1220_v24, %v922_v17 }
 0x5f0   :  { %v970_v31 = vpack.c.bf16 %v2321_v36, %v2319_v29 }
 0x5f2   :  { %1034 = vmatmul.mubr.bf16.vlgmr.msra.gmra.mrb[36].mxu0 %v970_v31 }
 0x5f3   :  { %1043 = vmatprep.mubr.bf16.mxu0 %v1513_v11 }
 0x5f4   :  { %v907_v19 = vpop.f32.mrb[28].mxu1 }
 0x5f5   :  { %v923_v34 = vadd.f32 %v907_v19, %v1984_v21  ;;  %v1442_v47 = vpop.f32.mrb[29].mxu1 }
 0x5f6   :  { %v910_v37 = vpop.f32.mrb[30].mxu1 }
 0x5f7   :  { %v924_v40 = vadd.f32 %v910_v37, %v1987_v26  ;;  %v1443_v43 = vpop.f32.mrb[31].mxu1  ;;  %v2328_v23 = vadd.f32 %v1220_v24, %v923_v34 }
 0x5f9   :  { %v2330_v46 = vadd.f32 %v1220_v24, %v924_v40 }
 0x5fb   :  { %v971_v0 = vpack.c.bf16 %v2330_v46, %v2328_v23 }
 0x5fc   :  { %v915_v49 = vpop.f32.mrb[32].mxu1 }
 0x5fd   :  { %v925_v55 = vadd.f32 %v915_v49, %v1996_v35  ;;  %v1446_v61 = vpop.f32.mrb[33].mxu1  ;;  %1044 = vmatmul.mubr.bf16.gmra.mrb[40].mxu0 %v971_v0  ;;  %v1083_v35 = vld [vmem:[%s2412_s16 + $0x58] sm:$0xff] }
 0x5fe   :  { %v918_v1 = vpop.f32.mrb[34].mxu1  ;;  %1053 = vmatprep.mubr.bf16.mxu0 %v1513_v11  ;;  %v1115_v38 = vpack.c.bf16 %v1083_v35, %v1082_v7  ;;  %v1100_v11 = vld [vmem:[%s2412_s16 + $0xe0] sm:$0xff] }
 0x5ff   :  { %v2336_v21 = vadd.f32 %v1220_v24, %v925_v55  ;;  %v1447_v4 = vpop.f32.mrb[35].mxu1  ;;  %v1124_v10 = vpack.c.bf16 %v1101_v39, %v1100_v11  ;;  %v1221_v35 = vld [vmem:[%s2415_s17] ss:$0 sm:$0xff] }
 0x600   :  { %1289 = vmatpush3.bf16.msra.mxu1 %v1115_v38 }
 0x601   :  { %v972_v26 = vpack.c.bf16 %v2336_v21, %v2336_v21  ;;  %1290 = vmatprep.subr.bf16.mxu1 %v1124_v10 }
 0x604   :  { %1291 = vmatpush3.bf16.msra.mxu1 %v1116_v44 }
 0x605   :  { %1054 = vmatmul.mubr.bf16.gmra.mrb[44].mxu0 %v972_v26  ;;  %1292 = vmatprep.subr.bf16.mxu1 %v1125_v50 }
 0x608   :  { %1293 = vmatpush3.bf16.msra.mxu1 %v1117_v54 }
 0x6c5   :  { %v1035_v60 = vpop.f32.mrb[36].mxu0 }
 0x6c6   :  { %v1036_v62 = vadd.f32 %v1035_v60, %v994_v57  ;;  %v1037_v63 = vpop.f32.mrb[37].mxu0 }
 0x6c7   :  { %v1038_v2 = vadd.f32 %v1037_v63, %v998_v59  ;;  %v1039_v3 = vpop.f32.mrb[38].mxu0 }
 0x6c8   :  { %v1040_v5 = vadd.f32 %v1039_v3, %v994_v57  ;;  %v1041_v6 = vpop.f32.mrb[39].mxu0  ;;  %v1062_v9 = vmax.f32 %v1036_v62, 0.0 }
 0x6c9   :  { %v1042_v8 = vadd.f32 %v1041_v6, %v998_v59  ;;  %v1063_v13 = vmax.f32 %v1038_v2, 0.0 }
 0x6ca   :  { %v1064_v12 = vmax.f32 %v1040_v5, 0.0 }
 0x6cb   :  { %v1065_v14 = vmax.f32 %v1042_v8, 0.0 }
 0x6cc   :  { %v1104_v15 = vpack.c.bf16 %v1064_v12, %v1062_v9 }
 0x6cd   :  { %v1105_v16 = vpack.c.bf16 %v1065_v14, %v1063_v13 }
 0x6cf   :  { %1158 = vmatprep.mubr.bf16.mxu1 %v1105_v16 }
 0x6d0   :  { %v1045_v18 = vpop.f32.mrb[40].mxu0  ;;  %1159 = vmatmul.mubr.bf16.vlgmr.msra.gmra.mrb[36].mxu1 %v1104_v15 }
 0x6d1   :  { %v1046_v52 = vadd.f32 %v1045_v18, %v994_v57  ;;  %v1047_v20 = vpop.f32.mrb[41].mxu0 }
 0x6d2   :  { %v1048_v58 = vadd.f32 %v1047_v20, %v998_v59  ;;  %v1049_v22 = vpop.f32.mrb[42].mxu0 }
 0x6d3   :  { %v1050_v25 = vadd.f32 %v1049_v22, %v994_v57  ;;  %v1051_v27 = vpop.f32.mrb[43].mxu0  ;;  %v1066_v30 = vmax.f32 %v1046_v52, 0.0 }
 0x6d4   :  { %v1052_v28 = vadd.f32 %v1051_v27, %v998_v59  ;;  %v1067_v32 = vmax.f32 %v1048_v58, 0.0 }
 0x6d5   :  { %v1068_v24 = vmax.f32 %v1050_v25, 0.0 }
 0x6d6   :  { %v1069_v17 = vmax.f32 %v1052_v28, 0.0 }
 0x6d7   :  { %v1106_v33 = vpack.c.bf16 %v1068_v24, %v1066_v30 }
 0x6d8   :  { %v1107_v31 = vpack.c.bf16 %v1069_v17, %v1067_v32  ;;  %v1055_v19 = vpop.f32.mrb[44].mxu0 }
 0x6d9   :  { %v1056_v34 = vadd.f32 %v1055_v19, %v994_v57  ;;  %v1057_v47 = vpop.f32.mrb[45].mxu0 }
 0x6da   :  { %v1058_v37 = vadd.f32 %v1057_v47, %v998_v59  ;;  %v1059_v40 = vpop.f32.mrb[46].mxu0  ;;  %1166 = vmatprep.mubr.bf16.mxu1 %v1107_v31 }
 0x6db   :  { %v1060_v43 = vpop.f32.mrb[47].mxu0  ;;  %1167 = vmatmul.mubr.bf16.gmra.mrb[40].mxu1 %v1106_v33  ;;  %v1070_v49 = vmax.f32 %v1056_v34, 0.0 }
 0x6dc   :  { %v1071_v0 = vmax.f32 %v1058_v37, 0.0 }
 0x6dd   :  { %v1108_v61 = vpack.c.bf16 %v1070_v49, %v1070_v49 }
 0x6de   :  { %v1109_v55 = vpack.c.bf16 %v1071_v0, %v1071_v0 }
 0x6e0   :  { %1174 = vmatprep.mubr.bf16.mxu1 %v1109_v55 }
 0x6e3   :  { %1175 = vmatmul.mubr.bf16.gmra.mrb[44].mxu1 %v1108_v61 }
 0x7a3   :  { %v1294_v1 = vpop.f32.mrb[36].mxu1 }
 0x7a4   :  { %v1295_v4 = vpop.f32.mrb[37].mxu1 }
 0x7a5   :  { %v1296_v26 = vadd.f32 %v1295_v4, %v1294_v1  ;;  %v1297_v7 = vpop.f32.mrb[38].mxu1 }
 0x7a6   :  { %v1298_v38 = vpop.f32.mrb[39].mxu1 }
 0x7a7   :  { %v1182_v11 = vadd.f32 %v1296_v26, %v2319_v29  ;;  %v1299_v39 = vadd.f32 %v1298_v38, %v1297_v7 }
 0x7a9   :  { %v1194_v10 = vadd.f32 %v1221_v35, %v1182_v11  ;;  %v1183_v41 = vadd.f32 %v1299_v39, %v2321_v36 }
 0x7ab   :  { %1199 = vst [vmem:[%s2416_s18] sm:$0xff] %v1194_v10  ;;  %v1195_v42 = vadd.f32 %v1221_v35, %v1183_v41 }
 0x7ad   :  { %1200 = vst [vmem:[%s2416_s18 + $0x8] sm:$0xff] %v1195_v42 }
 0x7ae   :  { %v1300_v44 = vpop.f32.mrb[40].mxu1 }
 0x7af   :  { %v1301_v45 = vpop.f32.mrb[41].mxu1 }
 0x7b0   :  { %v1302_v48 = vadd.f32 %v1301_v45, %v1300_v44  ;;  %v1303_v50 = vpop.f32.mrb[42].mxu1 }
 0x7b1   :  { %v1304_v51 = vpop.f32.mrb[43].mxu1 }
 0x7b2   :  { %v1184_v29 = vadd.f32 %v1302_v48, %v2328_v23  ;;  %v1305_v53 = vadd.f32 %v1304_v51, %v1303_v50 }
 0x7b4   :  { %v1196_v54 = vadd.f32 %v1221_v35, %v1184_v29  ;;  %v1185_v36 = vadd.f32 %v1305_v53, %v2330_v46 }
 0x7b6   :  { %1201 = vst [vmem:[%s2416_s18 + $0x10] sm:$0xff] %v1196_v54  ;;  %v1197_v56 = vadd.f32 %v1221_v35, %v1185_v36  ;;  %v1306_v57 = vpop.f32.mrb[44].mxu1 }
 0x7b7   :  { %v1307_v59 = vpop.f32.mrb[45].mxu1 }
 0x7b8   :  { %1202 = vst [vmem:[%s2416_s18 + $0x18] sm:$0xff] %v1197_v56  ;;  %v1308_v60 = vadd.f32 %v1307_v59, %v1306_v57  ;;  %v1309_v62 = vpop.f32.mrb[46].mxu1 }
 0x7b9   :  { %v1310_v63 = vpop.f32.mrb[47].mxu1 }
 0x7ba   :  { %v1186_v23 = vadd.f32 %v1308_v60, %v2336_v21 }
 0x7bc   :  { %v1198_v2 = vadd.f32 %v1221_v35, %v1186_v23 }
 0x7be   :  { %1203 = vst [vmem:[%s2416_s18 + $0x20] sm:$0x3] %v1198_v2 }

// kernel: run.5
= control target key start
LH: loop header
LB: loop body
LE: loop exit
PB: predicated region body
PF: predicated region fallthrough
CT: control target
= control target key end

     0   :  { %s2429_s0 = inlined_call_operand.vmem [shape: s32[2], index: 0, kind: input, shape index: {}]   ;;  %s2430_s1 = inlined_call_operand.vmem [shape: f32[2,1,2176], index: 1, kind: input, shape index: {}]   ;;  %s2431_s2 = inlined_call_operand.vmem [shape: f32[2,1,128], index: 2, kind: input, shape index: {}]   ;;  %s2432_s3 = inlined_call_operand.vmem [shape: f32[2,1,128], index: 3, kind: input, shape index: {}]   ;;  %s2433_s4 = inlined_call_operand.hbm [shape: f32[4,2176,128], index: 4, kind: input, shape index: {}]   ;;  %s2434_s5 = inlined_call_operand.vmem [shape: f32[4,1,128], index: 5, kind: input, shape index: {}, may-alias: {5,7}]   ;;  %s2435_s6 = inlined_call_operand.vmem [shape: f32[4,128,128], index: 6, kind: input, shape index: {}]   ;;  %s2436_s7 = inlined_call_operand.vmem [shape: f32[4,1,128], index: 7, kind: input, shape index: {}, may-alias: {5,7}]   ;;  %s2437_s8 = inlined_call_operand.vmem [shape: f32[2,1,128], index: 8, kind: output, shape index: {}]  }
   0x1   :  { %s13_s29 = sshll.u32 %s2429_s0, 4  ;;  %s14_s29 = int_to_ptr.vmem [resolvable:$true] %s13_s29 }
   0x2   :  { %s1787_s30 = scalar_lea.vmem %s14_s29, 16  ;;  %p1792_p1 = scmp.lt.s32.totalorder %s14_s29, %s14_s29 }
   0x3   :  { %p1788_p0 = scmp.ne.s32.totalorder %s14_s29, %s1787_s30  ;;  %p1793_p2 = scmp.lt.s32.totalorder %s1787_s30, %s1787_s30 }
   0x5   :  { %p1794_p3 = por %p1793_p2, %p1792_p1 }
   0x7   :  { %p1795_p4 = pnand %p1794_p3, %p1788_p0 }
   0x9   :  { %1798 = shalt.err (!%p1795_p4)  }
   0xa   :  { %s1867_s9 = smov [#allocation3]  }
   0xb   :  { %16 = dma.vmem_to_smem %s14_s29, 16, %s1867_s9, [#allocation2] }
   0xc   :  { %1845 = dma.done.wait [#allocation2], 16 }
   0xd   :  { %1846 = vsyncadd [#allocation2], 4294967280 }
   0xe   :  { %18 = sfence }
   0xf   :  { %19 = vsyncpa [#allocation5], 0 }
  0x10   :  { %21 = vsyncpa [#allocation5 + $0x1], 0  ;;  %s1921_s10 = smov 0   ;;  %s1923_s11 = smov 0  }
  0x11   :  { %s1925_s0 = smov 0   ;;  %s1927_s12 = smov 0  }
  0x12 LB: > { %s1937_s13 = sadd.s32 4294967295, %s1865_s12   ;;  %s1939_s14 = sadd.s32 1, %s1865_s12   ;;  %s1865_s12 = sphi %s1927_s12, %s2446_s12   ;;  %s1861_s0 = sphi %s1925_s0, %s2445_s0   ;;  %s1857_s11 = sphi %s1923_s11, %s2444_s11   ;;  %s1853_s10 = sphi %s1921_s10, %s2443_s10  }
  0x13   : > { %s109_s15 = sld [smem:[#allocation3 + %s1865_s12]]  ;;  %p121_p5 = scmp.ne.s32.totalorder %s1861_s0, %s1857_s11 }
  0x14   : > { %s110_s16 = sld [smem:[#allocation3 + %s1939_s14]]  ;;  %p122_p6 = scmp.eq.s32.totalorder %s1865_s12, 0 }
  0x15   : > { %p127_p7 = scmp.ne.s32.totalorder %s1857_s11, %s1853_s10  ;;  %p128_p8 = scmp.eq.s32.totalorder %s1937_s13, 0 }
  0x16   : > { %s114_s17 = sadd.s32 1, %s1861_s0  ;;  %p123_p9 = por %p122_p6, %p121_p5 }
  0x17   : > { %p1947_p10 = por %p128_p8, %p127_p7  ;;  %s280_s19 = sand.u32 1, %s1861_s0  }
  0x18   : > { %p1749_p11 = scmp.lt.s32.totalorder %s1865_s12, 2  ;;  %s1735_s21 = smul.u32 2176, %s280_s19 }
  0x19   : > { %s2439_s18 = scalar_select %p1947_p10, 1, 0 }
  0x1a   : > { %s111_s20 = ssub.s32 %s109_s15, %s110_s16  ;;  %p1955_p13 = pnand %p1749_p11, %p123_p9 }
  0x1b   : > { %p112_p12 = scmp.eq.s32.totalorder %s111_s20, 0  ;;  %s284_s27 = scalar_lea.vmem [#allocation4], %s1735_s21 }
  0x1c   : > { %s1739_s22 = scalar_select %p123_p9, [#allocation3], [#allocation6] }
  0x1d   : > { %s1953_s23 = scalar_select %p112_p12, %s1861_s0, %s114_s17  }
  0x1e   : > { %s1740_s25 = scalar_select %p123_p9, %s1865_s12, 0 }
  0x1f   : > { %s2448_s22 = smov (!%p1749_p11, %s1739_s22), [#allocation7]  ;;  %s292_s28 = sshll.u32 %s284_s27, 4  ;;  %s1963_s28 = int_to_ptr.vmem [resolvable:$true] %s292_s28 }
  0x20   : > { %s2450_s25 = smov (!%p1749_p11, %s1740_s25), 0  ;;  %p1494_p0 = scmp.ge.s32.totalorder %s1865_s12, 1 }
  0x21   : > { %s285_s26 = sld [smem:[%s2448_s22 + %s2450_s25]]  ;;  %p326_p1 = scmp.lt.s32.totalorder %s1865_s12, 3 }
  0x22   : > { %s1970_s16 = scalar_lea.sflag [#allocation5], %s280_s19  ;;  %p1801_p4 = pneg %p1955_p13 }
  0x23   : > { %p1959_p2 = pnand %p1494_p0, %p326_p1  ;;  %s1804_s21 = scalar_lea.hbm %s2433_s4, 139264 }
  0x27   : > { %s1736_s30 = smul.u32 34816, %s285_s26 }
  0x29   : > { %s1968_s15 = scalar_lea.hbm %s2433_s4, %s1736_s30 }
  0x2a   : > { %s1799_s17 = scalar_lea.hbm %s1968_s15, 34816  ;;  %p1805_p7 = scmp.lt.u32.totalorder %s1968_s15, %s2433_s4 }
  0x2b   : > { %p1800_p3 = scmp.ne.s32.totalorder %s1968_s15, %s1799_s17  ;;  %p1806_p8 = scmp.lt.u32.totalorder %s1804_s21, %s1799_s17 }
  0x2c   : > { %p1808_p11 = scmp.lt.u32.totalorder %s1799_s17, %s1968_s15 }
  0x2d   : > { %p1802_p5 = pnand %p1801_p4, %p1800_p3  ;;  %p1807_p9 = por %p1806_p8, %p1805_p7 }
  0x2f   : > { %p1803_p6 = pneg %p1802_p5  ;;  %p1809_p12 = por %p1808_p11, %p1807_p9 }
  0x31   : > { %p1810_p0 = pnand %p1809_p12, %p1803_p6 }
  0x33   : > { %1813 = shalt.err (!%p1810_p0)
}
  0x34   : > { %s1814_s19 = scalar_lea.vmem %s1963_s28, 34816  ;;  %s1868_s26 = smov [#allocation4]  }
  0x35   : > { %p1815_p1 = scmp.ne.s32.totalorder %s1963_s28, %s1814_s19  ;;  %s1819_s27 = sshll.u32 %s1868_s26, 4  ;;  %s1820_s27 = int_to_ptr.vmem [resolvable:$false] %s1819_s27 }
  0x36   : > { %s1821_s30 = scalar_lea.vmem %s1820_s27, 69632  ;;  %p1822_p10 = scmp.lt.s32.totalorder %s1963_s28, %s1820_s27 }
  0x37   : > { %p1817_p3 = pnand %p1815_p1, %p1801_p4  ;;  %p1823_p7 = scmp.lt.s32.totalorder %s1821_s30, %s1814_s19 }
  0x39   : > { %p1818_p5 = pneg %p1817_p3  ;;  %p1824_p8 = por %p1823_p7, %p1822_p10 }
  0x3b   : > { %p1825_p9 = pnand %p1824_p8, %p1818_p5 }
  0x3d   : > { %1828 = shalt.err (!%p1825_p9)
}
  0x3e   : > { %s1869_s9 = smov 128   ;;  %s1870_s10 = smov 8  }
  0x3f   : > { %1748 = dma.hbm_to_vmem [thread:$0]  (!%p1955_p13), %s1968_s15, 34816, %s1963_s28, %s1970_s16, %s1869_s9, %s1869_s9, %s1870_s10  }
  0x40   : > { %330 = sbr.rel (%p1959_p2) target bundleno = 674 (0x2a2), region = 48  ;;  %s332_s17 = sand.u32 (!%p1959_p2), 1, %s1857_s11  }
  0x41   : > { %s1737_s12 = smul.u32 (!%p1959_p2), 2176, %s332_s17  ;;  %s333_s20 = scalar_lea.sflag (!%p1959_p2), [#allocation5], %s332_s17 }
  0x42   : > { %p2442_p10 = scmp.ne.s32.totalorder (!%p1959_p2), %s2439_s18, 0 }
  0x43   : > { %s2001_s21 = scalar_lea.vmem (!%p1959_p2), [#allocation4], %s1737_s12 }
  0x47   : > { %1848 = dma.done.wait (%p2442_p10), %s333_s20, 34816  }
  0x48   : > { %1850 = vsyncadd (%p2442_p10), %s333_s20, 4294932480  ;;  %v440_v0 = vld [vmem:[%s2001_s21 + $0x80] sm:$0xff]  ;;  %v441_v1 = vld [vmem:[%s2001_s21 + $0x88] sm:$0xff]  ;;  %p389_p13 = scmp.lt.s32.totalorder %s1937_s13, 1  ;;  %v699_v43 = vlaneseq  ;;  %vm1872_vm0 = vmmov 0   ;;  %s405_s16 = sld [smem:[#allocation3 + %s1937_s13]] }
  0x49   : > { %v424_v2 = vld [vmem:[%s2001_s21] sm:$0xff]  ;;  %v809_v3 = vpack.c.bf16 %v441_v1, %v440_v0  ;;  %v425_v4 = vld [vmem:[%s2001_s21 + $0x8] sm:$0xff]  ;;  %v442_v11 = vld [vmem:[%s2001_s21 + $0x90] sm:$0xff]  ;;  %s400_s27 = sld [smem:[#allocation3 + %s1937_s13]] }
  0x4a   : > { %v472_v5 = vld [vmem:[%s2001_s21 + $0x180] sm:$0xff]  ;;  %v473_v6 = vld [vmem:[%s2001_s21 + $0x188] sm:$0xff]  ;;  %v801_v7 = vpack.c.bf16 %v425_v4, %v424_v2  ;;  %v443_v13 = vld [vmem:[%s2001_s21 + $0x98] sm:$0xff]  ;;  %s2041_s18 = scalar_select %p389_p13, %s1937_s13, 1  ;;  %v2053_v57 = vshrl.u32 %v699_v43, 7 }
  0x4b   : > { %v825_v8 = vpack.c.bf16 %v473_v6, %v472_v5  ;;  %v456_v9 = vld [vmem:[%s2001_s21 + $0x100] sm:$0xff]  ;;  %v457_v10 = vld [vmem:[%s2001_s21 + $0x108] sm:$0xff]  ;;  %1501 = vmatprep.subr.bf16.mxu0 %v809_v3  ;;  %v426_v14 = vld [vmem:[%s2001_s21 + $0x10] sm:$0xff]  ;;  %v810_v16 = vpack.c.bf16 %v443_v13, %v442_v11  ;;  %s412_s17 = sld [smem:[#allocation3 + %s1937_s13]] }
  0x4c   : > { %v817_v12 = vpack.c.bf16 %v457_v10, %v456_v9  ;;  %v427_v15 = vld [vmem:[%s2001_s21 + $0x18] sm:$0xff]  ;;  %1502 = vmatpush3.bf16.msra.mxu0 %v801_v7  ;;  %v474_v18 = vld [vmem:[%s2001_s21 + $0x190] sm:$0xff]  ;;  %v444_v23 = vld [vmem:[%s2001_s21 + $0xa0] sm:$0xff]  ;;  %s1738_s24 = smul.u32 17, %s2041_s18  ;;  %v705_v6 = vsub.s32 1, %v2053_v57  ;;  %v713_v11 = vsub.s32 3, %v2053_v57  ;;  %s395_s29 = scalar_lea.vmem %s2431_s2, %s2041_s18 }
  0x4d   : > { %1523 = vmatprep.subr.bf16.mxu1 %v825_v8  ;;  %v802_v17 = vpack.c.bf16 %v427_v15, %v426_v14  ;;  %v475_v19 = vld [vmem:[%s2001_s21 + $0x198] sm:$0xff]  ;;  %v458_v20 = vld [vmem:[%s2001_s21 + $0x110] sm:$0xff]  ;;  %v445_v24 = vld [vmem:[%s2001_s21 + $0xa8] sm:$0xff]  ;;  %1503 = vmatprep.subr.bf16.mxu0 %v810_v16  ;;  %v721_v43 = vsub.s32 5, %v2053_v57  ;;  %s419_s19 = scalar_lea.vmem %s2437_s8, %s2041_s18 }
  0x4e   : > { %1524 = vmatpush3.bf16.msra.mxu1 %v817_v12  ;;  %v826_v21 = vpack.c.bf16 %v475_v19, %v474_v18  ;;  %v459_v22 = vld [vmem:[%s2001_s21 + $0x118] sm:$0xff]  ;;  %v811_v26 = vpack.c.bf16 %v445_v24, %v444_v23  ;;  %v428_v27 = vld [vmem:[%s2001_s21 + $0x20] sm:$0xff]  ;;  %v429_v28 = vld [vmem:[%s2001_s21 + $0x28] sm:$0xff]  ;;  %s2066_s15 = scalar_lea.vmem %s2430_s1, %s1738_s24  ;;  %p406_p2 = scmp.lt.s32.totalorder %s405_s16, 3 }
  0x4f   : > { %v818_v25 = vpack.c.bf16 %v459_v22, %v458_v20  ;;  %v476_v29 = vld [vmem:[%s2001_s21 + $0x1a0] sm:$0xff]  ;;  %v477_v30 = vld [vmem:[%s2001_s21 + $0x1a8] sm:$0xff]  ;;  %v803_v33 = vpack.c.bf16 %v429_v28, %v428_v27  ;;  %v446_v35 = vld [vmem:[%s2001_s21 + $0xb0] sm:$0xff]  ;;  %p401_p4 = scmp.lt.s32.totalorder %s400_s27, 3 }
  0x50   : > { %1525 = vmatprep.subr.bf16.mxu1 %v826_v21  ;;  %v460_v31 = vld [vmem:[%s2001_s21 + $0x120] sm:$0xff]  ;;  %v461_v32 = vld [vmem:[%s2001_s21 + $0x128] sm:$0xff]  ;;  %1504 = vmatpush3.bf16.msra.mxu0 %v802_v17  ;;  %v827_v34 = vpack.c.bf16 %v477_v30, %v476_v29  ;;  %v447_v36 = vld [vmem:[%s2001_s21 + $0xb8] sm:$0xff]  ;;  %v701_v30 = vsub.s32 0, %v2053_v57  ;;  %s2452_s16 = smov (!%p406_p2, %s405_s16), 3 }
  0x51   : > { %v430_v37 = vld [vmem:[%s2001_s21 + $0x30] sm:$0xff]  ;;  %1505 = vmatprep.subr.bf16.mxu0 %v811_v26  ;;  %v819_v38 = vpack.c.bf16 %v461_v32, %v460_v31  ;;  %v812_v39 = vpack.c.bf16 %v447_v36, %v446_v35  ;;  %v431_v40 = vld [vmem:[%s2001_s21 + $0x38] sm:$0xff]  ;;  %v448_v47 = vld [vmem:[%s2001_s21 + $0xc0] sm:$0xff]  ;;  %s1500_s22 = sshll.u32 %s2452_s16, 7  ;;  %s2454_s27 = smov (!%p401_p4, %s400_s27), 3 }
  0x52   : > { %1526 = vmatpush3.bf16.msra.mxu1 %v818_v25  ;;  %v478_v41 = vld [vmem:[%s2001_s21 + $0x1b0] sm:$0xff]  ;;  %v479_v42 = vld [vmem:[%s2001_s21 + $0x1b8] sm:$0xff]  ;;  %v449_v48 = vld [vmem:[%s2001_s21 + $0xc8] sm:$0xff]  ;;  %v804_v49 = vpack.c.bf16 %v431_v40, %v430_v37  ;;  %s2371_s26 = scalar_lea.vmem %s2435_s6, %s1500_s22  ;;  %s403_s10 = scalar_lea.vmem %s2434_s5, %s2454_s27 }
  0x53   : > { %1527 = vmatprep.subr.bf16.mxu1 %v827_v34  ;;  %v828_v44 = vpack.c.bf16 %v479_v42, %v478_v41  ;;  %v462_v45 = vld [vmem:[%s2001_s21 + $0x130] sm:$0xff]  ;;  %v463_v46 = vld [vmem:[%s2001_s21 + $0x138] sm:$0xff]  ;;  %v480_v50 = vld [vmem:[%s2001_s21 + $0x1c0] sm:$0xff]  ;;  %v813_v53 = vpack.c.bf16 %v449_v48, %v448_v47  ;;  %v729_v47 = vsub.s32 7, %v2053_v57  ;;  %p413_p6 = scmp.lt.s32.totalorder %s412_s17, 3  ;;  %s398_s22 = scalar_lea.vmem %s2432_s3, %s2041_s18 }
  0x54   : > { %1506 = vmatpush3.bf16.msra.mxu0 %v803_v33  ;;  %v481_v51 = vld [vmem:[%s2001_s21 + $0x1c8] sm:$0xff]  ;;  %v820_v52 = vpack.c.bf16 %v463_v46, %v462_v45  ;;  %v432_v54 = vld [vmem:[%s2001_s21 + $0x40] sm:$0xff]  ;;  %v450_v60 = vld [vmem:[%s2001_s21 + $0xd0] sm:$0xff]  ;;  %v709_v33 = vsub.s32 2, %v2053_v57 }
  0x55   : > { %1507 = vmatprep.subr.bf16.mxu0 %v812_v39  ;;  %v433_v55 = vld [vmem:[%s2001_s21 + $0x48] sm:$0xff]  ;;  %v464_v56 = vld [vmem:[%s2001_s21 + $0x140] sm:$0xff]  ;;  %v829_v58 = vpack.c.bf16 %v481_v51, %v480_v50  ;;  %v451_v61 = vld [vmem:[%s2001_s21 + $0xd8] sm:$0xff]  ;;  %s2456_s17 = smov (!%p413_p6, %s412_s17), 3 }
  0x56   : > { %1528 = vmatpush3.bf16.msra.mxu1 %v819_v38  ;;  %v465_v59 = vld [vmem:[%s2001_s21 + $0x148] sm:$0xff]  ;;  %v482_v62 = vld [vmem:[%s2001_s21 + $0x1d0] sm:$0xff]  ;;  %v483_v63 = vld [vmem:[%s2001_s21 + $0x1d8] sm:$0xff]  ;;  %v805_v0 = vpack.c.bf16 %v433_v55, %v432_v54  ;;  %v814_v2 = vpack.c.bf16 %v451_v61, %v450_v60 }
  0x57   : > { %1529 = vmatprep.subr.bf16.mxu1 %v828_v44  ;;  %v821_v1 = vpack.c.bf16 %v465_v59, %v464_v56  ;;  %v434_v3 = vld [vmem:[%s2001_s21 + $0x50] sm:$0xff]  ;;  %v435_v4 = vld [vmem:[%s2001_s21 + $0x58] sm:$0xff]  ;;  %v830_v7 = vpack.c.bf16 %v483_v63, %v482_v62  ;;  %v452_v9 = vld [vmem:[%s2001_s21 + $0xe0] sm:$0xff] }
  0x58   : > { %1508 = vmatpush3.bf16.msra.mxu0 %v804_v49  ;;  %v466_v5 = vld [vmem:[%s2001_s21 + $0x150] sm:$0xff]  ;;  %v467_v8 = vld [vmem:[%s2001_s21 + $0x158] sm:$0xff]  ;;  %v453_v10 = vld [vmem:[%s2001_s21 + $0xe8] sm:$0xff]  ;;  %v806_v14 = vpack.c.bf16 %v435_v4, %v434_v3 }
  0x59   : > { %1509 = vmatprep.subr.bf16.mxu0 %v813_v53  ;;  %v484_v12 = vld [vmem:[%s2001_s21 + $0x1e0] sm:$0xff]  ;;  %v485_v13 = vld [vmem:[%s2001_s21 + $0x1e8] sm:$0xff]  ;;  %v822_v16 = vpack.c.bf16 %v467_v8, %v466_v5  ;;  %v815_v17 = vpack.c.bf16 %v453_v10, %v452_v9  ;;  %v454_v24 = vld [vmem:[%s2001_s21 + $0xf0] sm:$0xff] }
  0x5a   : > { %1530 = vmatpush3.bf16.msra.mxu1 %v820_v52  ;;  %v2076_v15 = vld [vmem:[%s2066_s15] sm:$0xff]  ;;  %v437_v19 = vld [vmem:[%s2001_s21 + $0x68] sm:$0xff]  ;;  %v831_v22 = vpack.c.bf16 %v485_v13, %v484_v12  ;;  %v455_v25 = vld [vmem:[%s2001_s21 + $0xf8] sm:$0xff] }
  0x5b   : > { %1531 = vmatprep.subr.bf16.mxu1 %v829_v58  ;;  %v436_v18 = vld [vmem:[%s2001_s21 + $0x60] sm:$0xff]  ;;  %v706_v21 = vrot.slane %v2076_v15, %v705_v6  ;;  %v469_v23 = vld [vmem:[%s2001_s21 + $0x168] sm:$0xff]  ;;  %v714_v26 = vrot.slane %v2076_v15, %v713_v11  ;;  %v486_v27 = vld [vmem:[%s2001_s21 + $0x1f0] sm:$0xff]  ;;  %v816_v35 = vpack.c.bf16 %v455_v25, %v454_v24  ;;  %v702_v44 = vrot.slane %v2076_v15, %v701_v30 }
  0x5c   : > { %1510 = vmatpush3.bf16.msra.mxu0 %v805_v0  ;;  %v468_v20 = vld [vmem:[%s2001_s21 + $0x160] sm:$0xff]  ;;  %v487_v28 = vld [vmem:[%s2001_s21 + $0x1f8] sm:$0xff]  ;;  %v807_v31 = vpack.c.bf16 %v437_v19, %v436_v18  ;;  %v438_v36 = vld [vmem:[%s2001_s21 + $0x70] sm:$0xff]  ;;  %v710_v49 = vrot.slane %v2076_v15, %v709_v33  ;;  %v722_v60 = vrot.slane %v2076_v15, %v721_v43  ;;  %v730_v0 = vrot.slane %v2076_v15, %v729_v47 }
  0x5d   : > { %1511 = vmatprep.subr.bf16.mxu0 %v814_v2  ;;  %v785_v29 = vpack.c.bf16 %v706_v21, %v706_v21  ;;  %v787_v32 = vpack.c.bf16 %v714_v26, %v714_v26  ;;  %v823_v34 = vpack.c.bf16 %v469_v23, %v468_v20  ;;  %v439_v37 = vld [vmem:[%s2001_s21 + $0x78] sm:$0xff]  ;;  %v470_v38 = vld [vmem:[%s2001_s21 + $0x170] sm:$0xff]  ;;  %v832_v39 = vpack.c.bf16 %v487_v28, %v486_v27  ;;  %v504_v41 = vld [vmem:[%s2001_s21 + $0x280] sm:$0xff] }
  0x5e   : > { %1532 = vmatpush3.bf16.msra.mxu1 %v821_v1  ;;  %v471_v40 = vld [vmem:[%s2001_s21 + $0x178] sm:$0xff]  ;;  %v505_v42 = vld [vmem:[%s2001_s21 + $0x288] sm:$0xff]  ;;  %v536_v45 = vld [vmem:[%s2001_s21 + $0x380] sm:$0xff]  ;;  %v808_v48 = vpack.c.bf16 %v439_v37, %v438_v36  ;;  %v784_v61 = vpack.c.bf16 %v702_v44, %v702_v44  ;;  %v786_v2 = vpack.c.bf16 %v710_v49, %v710_v49  ;;  %v791_v18 = vpack.c.bf16 %v730_v0, %v730_v0 }
  0x5f   : > { %1533 = vmatprep.subr.bf16.mxu1 %v830_v7  ;;  %970 = vmatprep.mubr.bf16.mxu0 %v785_v29  ;;  %v537_v46 = vld [vmem:[%s2001_s21 + $0x388] sm:$0xff]  ;;  %v824_v50 = vpack.c.bf16 %v471_v40, %v470_v38  ;;  %v841_v51 = vpack.c.bf16 %v505_v42, %v504_v41  ;;  %v488_v52 = vld [vmem:[%s2001_s21 + $0x200] sm:$0xff]  ;;  %v506_v58 = vld [vmem:[%s2001_s21 + $0x290] sm:$0xff] }
  0x60   : > { %1512 = vmatpush3.bf16.msra.mxu0 %v806_v14  ;;  %1010 = vmatprep.mubr.bf16.mxu1 %v787_v32  ;;  %v489_v53 = vld [vmem:[%s2001_s21 + $0x208] sm:$0xff]  ;;  %v520_v54 = vld [vmem:[%s2001_s21 + $0x300] sm:$0xff]  ;;  %v857_v55 = vpack.c.bf16 %v537_v46, %v536_v45  ;;  %v507_v59 = vld [vmem:[%s2001_s21 + $0x298] sm:$0xff]  ;;  %v789_v14 = vpack.c.bf16 %v722_v60, %v722_v60 }
  0x61   : > { %1513 = vmatprep.subr.bf16.mxu0 %v815_v17  ;;  %v521_v56 = vld [vmem:[%s2001_s21 + $0x308] sm:$0xff]  ;;  %v538_v62 = vld [vmem:[%s2001_s21 + $0x390] sm:$0xff]  ;;  %v539_v63 = vld [vmem:[%s2001_s21 + $0x398] sm:$0xff]  ;;  %v833_v1 = vpack.c.bf16 %v489_v53, %v488_v52  ;;  %v842_v4 = vpack.c.bf16 %v507_v59, %v506_v58 }
  0x62   : > { %1534 = vmatpush3.bf16.msra.mxu1 %v822_v16  ;;  %v849_v3 = vpack.c.bf16 %v521_v56, %v520_v54  ;;  %v490_v5 = vld [vmem:[%s2001_s21 + $0x210] sm:$0xff]  ;;  %v491_v7 = vld [vmem:[%s2001_s21 + $0x218] sm:$0xff]  ;;  %v858_v9 = vpack.c.bf16 %v539_v63, %v538_v62  ;;  %v508_v12 = vld [vmem:[%s2001_s21 + $0x2a0] sm:$0xff] }
  0x63   : > { %1535 = vmatprep.subr.bf16.mxu1 %v831_v22  ;;  %v522_v8 = vld [vmem:[%s2001_s21 + $0x310] sm:$0xff]  ;;  %v523_v10 = vld [vmem:[%s2001_s21 + $0x318] sm:$0xff]  ;;  %v509_v13 = vld [vmem:[%s2001_s21 + $0x2a8] sm:$0xff]  ;;  %v834_v19 = vpack.c.bf16 %v491_v7, %v490_v5 }
  0x64   : > { %1514 = vmatpush3.bf16.msra.mxu0 %v807_v31  ;;  %v540_v16 = vld [vmem:[%s2001_s21 + $0x3a0] sm:$0xff]  ;;  %v541_v17 = vld [vmem:[%s2001_s21 + $0x3a8] sm:$0xff]  ;;  %v850_v20 = vpack.c.bf16 %v523_v10, %v522_v8  ;;  %v843_v21 = vpack.c.bf16 %v509_v13, %v508_v12  ;;  %v510_v27 = vld [vmem:[%s2001_s21 + $0x2b0] sm:$0xff] }
  0x65   : > { %1515 = vmatprep.subr.bf16.mxu0 %v816_v35  ;;  %v492_v22 = vld [vmem:[%s2001_s21 + $0x220] sm:$0xff]  ;;  %v493_v23 = vld [vmem:[%s2001_s21 + $0x228] sm:$0xff]  ;;  %v859_v25 = vpack.c.bf16 %v541_v17, %v540_v16  ;;  %v511_v28 = vld [vmem:[%s2001_s21 + $0x2b8] sm:$0xff] }
  0x66   : > { %1536 = vmatpush3.bf16.msra.mxu1 %v823_v34  ;;  %v524_v24 = vld [vmem:[%s2001_s21 + $0x320] sm:$0xff]  ;;  %v525_v26 = vld [vmem:[%s2001_s21 + $0x328] sm:$0xff]  ;;  %v542_v29 = vld [vmem:[%s2001_s21 + $0x3b0] sm:$0xff]  ;;  %v835_v32 = vpack.c.bf16 %v493_v23, %v492_v22  ;;  %v844_v35 = vpack.c.bf16 %v511_v28, %v510_v27  ;;  %v717_v23 = vsub.s32 4, %v2053_v57 }
  0x67   : > { %1537 = vmatprep.subr.bf16.mxu1 %v832_v39  ;;  %v543_v31 = vld [vmem:[%s2001_s21 + $0x3b8] sm:$0xff]  ;;  %v851_v34 = vpack.c.bf16 %v525_v26, %v524_v24  ;;  %v494_v36 = vld [vmem:[%s2001_s21 + $0x230] sm:$0xff]  ;;  %v512_v41 = vld [vmem:[%s2001_s21 + $0x2c0] sm:$0xff] }
  0x68   : > { %1516 = vmatpush3.bf16.msra.mxu0 %v808_v48  ;;  %v495_v37 = vld [vmem:[%s2001_s21 + $0x238] sm:$0xff]  ;;  %v526_v38 = vld [vmem:[%s2001_s21 + $0x330] sm:$0xff]  ;;  %v860_v39 = vpack.c.bf16 %v543_v31, %v542_v29  ;;  %v513_v42 = vld [vmem:[%s2001_s21 + $0x2c8] sm:$0xff] }
  0x69   : > { %1545 = vmatprep.subr.bf16.mxu0 %v841_v51  ;;  %v527_v40 = vld [vmem:[%s2001_s21 + $0x338] sm:$0xff]  ;;  %v544_v44 = vld [vmem:[%s2001_s21 + $0x3c0] sm:$0xff]  ;;  %v545_v45 = vld [vmem:[%s2001_s21 + $0x3c8] sm:$0xff]  ;;  %v836_v46 = vpack.c.bf16 %v495_v37, %v494_v36  ;;  %v845_v49 = vpack.c.bf16 %v513_v42, %v512_v41  ;;  %v718_v37 = vrot.slane %v2076_v15, %v717_v23 }
  0x6a   : > { %1538 = vmatpush3.bf16.msra.mxu1 %v824_v50  ;;  %v852_v48 = vpack.c.bf16 %v527_v40, %v526_v38  ;;  %v496_v50 = vld [vmem:[%s2001_s21 + $0x240] sm:$0xff]  ;;  %v497_v51 = vld [vmem:[%s2001_s21 + $0x248] sm:$0xff]  ;;  %v861_v53 = vpack.c.bf16 %v545_v45, %v544_v44  ;;  %v515_v56 = vld [vmem:[%s2001_s21 + $0x2d8] sm:$0xff] }
  0x6b   : > { %1567 = vmatprep.subr.bf16.mxu1 %v857_v55  ;;  %971 = vmatmul.mubr.bf16.vlgmr.msra.gmra.mrb[0].mxu0 %v784_v61  ;;  %v528_v52 = vld [vmem:[%s2001_s21 + $0x340] sm:$0xff]  ;;  %v529_v54 = vld [vmem:[%s2001_s21 + $0x348] sm:$0xff]  ;;  %v514_v55 = vld [vmem:[%s2001_s21 + $0x2d0] sm:$0xff]  ;;  %v837_v60 = vpack.c.bf16 %v497_v51, %v496_v50 }
  0x6c   : > { %1546 = vmatpush3.bf16.msra.mxu0 %v833_v1  ;;  %1050 = vmatprep.mubr.bf16.mxu0 %v789_v14  ;;  %v546_v58 = vld [vmem:[%s2001_s21 + $0x3d0] sm:$0xff]  ;;  %v547_v59 = vld [vmem:[%s2001_s21 + $0x3d8] sm:$0xff]  ;;  %v853_v61 = vpack.c.bf16 %v529_v54, %v528_v52  ;;  %v846_v62 = vpack.c.bf16 %v515_v56, %v514_v55  ;;  %v517_v5 = vld [vmem:[%s2001_s21 + $0x2e8] sm:$0xff] }
  0x6d   : > { %1011 = vmatmul.mubr.bf16.vlgmr.msra.gmra.mrb[0].mxu1 %v786_v2  ;;  %1547 = vmatprep.subr.bf16.mxu0 %v842_v4  ;;  %v498_v63 = vld [vmem:[%s2001_s21 + $0x250] sm:$0xff]  ;;  %v499_v0 = vld [vmem:[%s2001_s21 + $0x258] sm:$0xff]  ;;  %v862_v2 = vpack.c.bf16 %v547_v59, %v546_v58  ;;  %v516_v4 = vld [vmem:[%s2001_s21 + $0x2e0] sm:$0xff] }
  0x6e   : > { %1568 = vmatpush3.bf16.msra.mxu1 %v849_v3  ;;  %1090 = vmatprep.mubr.bf16.mxu1 %v791_v18  ;;  %v530_v1 = vld [vmem:[%s2001_s21 + $0x350] sm:$0xff]  ;;  %v531_v3 = vld [vmem:[%s2001_s21 + $0x358] sm:$0xff]  ;;  %v548_v7 = vld [vmem:[%s2001_s21 + $0x3e0] sm:$0xff]  ;;  %v847_v12 = vpack.c.bf16 %v517_v5, %v516_v4 }
  0x6f   : > { %1569 = vmatprep.subr.bf16.mxu1 %v858_v9  ;;  %v549_v8 = vld [vmem:[%s2001_s21 + $0x3e8] sm:$0xff]  ;;  %v838_v9 = vpack.c.bf16 %v499_v0, %v498_v63  ;;  %v854_v10 = vpack.c.bf16 %v531_v3, %v530_v1  ;;  %v500_v13 = vld [vmem:[%s2001_s21 + $0x260] sm:$0xff]  ;;  %v551_v22 = vld [vmem:[%s2001_s21 + $0x3f8] sm:$0xff] }
  0x70   : > { %1548 = vmatpush3.bf16.msra.mxu0 %v834_v19  ;;  %v501_v14 = vld [vmem:[%s2001_s21 + $0x268] sm:$0xff]  ;;  %v532_v16 = vld [vmem:[%s2001_s21 + $0x360] sm:$0xff]  ;;  %v863_v17 = vpack.c.bf16 %v549_v8, %v548_v7  ;;  %v518_v19 = vld [vmem:[%s2001_s21 + $0x2f0] sm:$0xff] }
  0x71   : > { %1549 = vmatprep.subr.bf16.mxu0 %v843_v21  ;;  %v533_v18 = vld [vmem:[%s2001_s21 + $0x368] sm:$0xff]  ;;  %v550_v21 = vld [vmem:[%s2001_s21 + $0x3f0] sm:$0xff]  ;;  %v839_v24 = vpack.c.bf16 %v501_v14, %v500_v13  ;;  %v503_v29 = vld [vmem:[%s2001_s21 + $0x278] sm:$0xff] }
  0x72   : > { %1570 = vmatpush3.bf16.msra.mxu1 %v850_v20  ;;  %v519_v20 = vld [vmem:[%s2001_s21 + $0x2f8] sm:$0xff]  ;;  %v855_v26 = vpack.c.bf16 %v533_v18, %v532_v16  ;;  %v502_v28 = vld [vmem:[%s2001_s21 + $0x270] sm:$0xff]  ;;  %v569_v36 = vld [vmem:[%s2001_s21 + $0x488] sm:$0xff] }
  0x73   : > { %1571 = vmatprep.subr.bf16.mxu1 %v859_v25  ;;  %v725_v25 = vsub.s32 6, %v2053_v57  ;;  %v848_v27 = vpack.c.bf16 %v519_v20, %v518_v19  ;;  %v534_v31 = vld [vmem:[%s2001_s21 + $0x370] sm:$0xff]  ;;  %v600_v38 = vld [vmem:[%s2001_s21 + $0x580] sm:$0xff]  ;;  %v840_v40 = vpack.c.bf16 %v503_v29, %v502_v28  ;;  %v585_v50 = vld [vmem:[%s2001_s21 + $0x508] sm:$0xff] }
  0x74   : > { %1550 = vmatpush3.bf16.msra.mxu0 %v835_v32  ;;  %v864_v32 = vpack.c.bf16 %v551_v22, %v550_v21  ;;  %v552_v45 = vld [vmem:[%s2001_s21 + $0x400] sm:$0xff]  ;;  %v570_v51 = vld [vmem:[%s2001_s21 + $0x490] sm:$0xff]  ;;  %v571_v52 = vld [vmem:[%s2001_s21 + $0x498] sm:$0xff] }
  0x75   : > { %1551 = vmatprep.subr.bf16.mxu0 %v844_v35  ;;  %v568_v35 = vld [vmem:[%s2001_s21 + $0x480] sm:$0xff]  ;;  %v726_v41 = vrot.slane %v2076_v15, %v725_v25  ;;  %v602_v54 = vld [vmem:[%s2001_s21 + $0x590] sm:$0xff]  ;;  %v603_v55 = vld [vmem:[%s2001_s21 + $0x598] sm:$0xff] }
  0x76   : > { %1572 = vmatpush3.bf16.msra.mxu1 %v851_v34  ;;  %v535_v34 = vld [vmem:[%s2001_s21 + $0x378] sm:$0xff]  ;;  %v873_v44 = vpack.c.bf16 %v569_v36, %v568_v35  ;;  %v2197_v15 = vld [vmem:[%s2066_s15 + $0x8] sm:$0xff]  ;;  %v554_v63 = vld [vmem:[%s2001_s21 + $0x410] sm:$0xff] }
  0x77   : > { %1573 = vmatprep.subr.bf16.mxu1 %v860_v39  ;;  %v601_v39 = vld [vmem:[%s2001_s21 + $0x588] sm:$0xff]  ;;  %v856_v42 = vpack.c.bf16 %v535_v34, %v534_v31  ;;  %v790_v58 = vpack.c.bf16 %v726_v41, %v726_v41  ;;  %v738_v59 = vrot.slane %v2197_v15, %v705_v6  ;;  %v555_v0 = vld [vmem:[%s2001_s21 + $0x418] sm:$0xff]  ;;  %v586_v1 = vld [vmem:[%s2001_s21 + $0x510] sm:$0xff] }
  0x78   : > { %1552 = vmatpush3.bf16.msra.mxu0 %v836_v46  ;;  %v553_v46 = vld [vmem:[%s2001_s21 + $0x408] sm:$0xff]  ;;  %v587_v3 = vld [vmem:[%s2001_s21 + $0x518] sm:$0xff]  ;;  %v572_v4 = vld [vmem:[%s2001_s21 + $0x4a0] sm:$0xff] }
  0x79   : > { %1553 = vmatprep.subr.bf16.mxu0 %v845_v49  ;;  %v889_v49 = vpack.c.bf16 %v601_v39, %v600_v38  ;;  %v865_v56 = vpack.c.bf16 %v553_v46, %v552_v45  ;;  %v573_v6 = vld [vmem:[%s2001_s21 + $0x4a8] sm:$0xff]  ;;  %v793_v5 = vpack.c.bf16 %v738_v59, %v738_v59  ;;  %v556_v13 = vld [vmem:[%s2001_s21 + $0x420] sm:$0xff]  ;;  %v574_v19 = vld [vmem:[%s2001_s21 + $0x4b0] sm:$0xff] }
  0x7a   : > { %1574 = vmatpush3.bf16.msra.mxu1 %v852_v48  ;;  %v584_v48 = vld [vmem:[%s2001_s21 + $0x500] sm:$0xff]  ;;  %v605_v7 = vld [vmem:[%s2001_s21 + $0x5a8] sm:$0xff]  ;;  %v575_v20 = vld [vmem:[%s2001_s21 + $0x4b8] sm:$0xff] }
  0x7b   : > { %1575 = vmatprep.subr.bf16.mxu1 %v861_v53  ;;  %v788_v53 = vpack.c.bf16 %v718_v37, %v718_v37  ;;  %v557_v14 = vld [vmem:[%s2001_s21 + $0x428] sm:$0xff]  ;;  %v588_v16 = vld [vmem:[%s2001_s21 + $0x520] sm:$0xff]  ;;  %v606_v21 = vld [vmem:[%s2001_s21 + $0x5b0] sm:$0xff] }
  0x7c   : > { %1554 = vmatpush3.bf16.msra.mxu0 %v837_v60  ;;  %v746_v60 = vrot.slane %v2197_v15, %v713_v11  ;;  %v604_v11 = vld [vmem:[%s2001_s21 + $0x5a0] sm:$0xff]  ;;  %v589_v18 = vld [vmem:[%s2001_s21 + $0x528] sm:$0xff]  ;;  %v607_v22 = vld [vmem:[%s2001_s21 + $0x5b8] sm:$0xff] }
  0x7d   : > { %1555 = vmatprep.subr.bf16.mxu0 %v846_v62  ;;  %v874_v62 = vpack.c.bf16 %v571_v52, %v570_v51  ;;  %v558_v28 = vld [vmem:[%s2001_s21 + $0x430] sm:$0xff]  ;;  %v559_v29 = vld [vmem:[%s2001_s21 + $0x438] sm:$0xff]  ;;  %v576_v35 = vld [vmem:[%s2001_s21 + $0x4c0] sm:$0xff] }
  0x7e   : > { %1576 = vmatpush3.bf16.msra.mxu1 %v853_v61  ;;  %v881_v61 = vpack.c.bf16 %v585_v50, %v584_v48  ;;  %v795_v8 = vpack.c.bf16 %v746_v60, %v746_v60  ;;  %v590_v31 = vld [vmem:[%s2001_s21 + $0x530] sm:$0xff]  ;;  %v591_v34 = vld [vmem:[%s2001_s21 + $0x538] sm:$0xff]  ;;  %v577_v36 = vld [vmem:[%s2001_s21 + $0x4c8] sm:$0xff]  ;;  %v868_v39 = vpack.c.bf16 %v559_v29, %v558_v28 }
  0x7f   : > { %1577 = vmatprep.subr.bf16.mxu1 %v862_v2  ;;  %v890_v2 = vpack.c.bf16 %v603_v55, %v602_v54  ;;  %v608_v37 = vld [vmem:[%s2001_s21 + $0x5c0] sm:$0xff]  ;;  %v609_v38 = vld [vmem:[%s2001_s21 + $0x5c8] sm:$0xff]  ;;  %v877_v41 = vpack.c.bf16 %v577_v36, %v576_v35  ;;  %v579_v50 = vld [vmem:[%s2001_s21 + $0x4d8] sm:$0xff] }
  0x80   : > { %1556 = vmatpush3.bf16.msra.mxu0 %v838_v9  ;;  %v866_v9 = vpack.c.bf16 %v555_v0, %v554_v63  ;;  %v592_v45 = vld [vmem:[%s2001_s21 + $0x540] sm:$0xff]  ;;  %v893_v46 = vpack.c.bf16 %v609_v38, %v608_v37  ;;  %v593_v48 = vld [vmem:[%s2001_s21 + $0x548] sm:$0xff]  ;;  %v610_v51 = vld [vmem:[%s2001_s21 + $0x5d0] sm:$0xff] }
  0x81   : > { %1557 = vmatprep.subr.bf16.mxu0 %v847_v12  ;;  %v875_v12 = vpack.c.bf16 %v573_v6, %v572_v4  ;;  %v611_v52 = vld [vmem:[%s2001_s21 + $0x5d8] sm:$0xff]  ;;  %v885_v54 = vpack.c.bf16 %v593_v48, %v592_v45  ;;  %v594_v59 = vld [vmem:[%s2001_s21 + $0x550] sm:$0xff]  ;;  %v581_v63 = vld [vmem:[%s2001_s21 + $0x4e8] sm:$0xff] }
  0x82   : > { %1578 = vmatpush3.bf16.msra.mxu1 %v854_v10  ;;  %v882_v10 = vpack.c.bf16 %v587_v3, %v586_v1  ;;  %v894_v60 = vpack.c.bf16 %v611_v52, %v610_v51  ;;  %v612_v0 = vld [vmem:[%s2001_s21 + $0x5e0] sm:$0xff]  ;;  %v613_v1 = vld [vmem:[%s2001_s21 + $0x5e8] sm:$0xff]  ;;  %v667_v45 = vld [vmem:[%s2001_s21 + $0x798] sm:$0xff] }
  0x83   : > { %1579 = vmatprep.subr.bf16.mxu1 %v863_v17  ;;  %v891_v17 = vpack.c.bf16 %v605_v7, %v604_v11  ;;  %v564_v6 = vld [vmem:[%s2001_s21 + $0x460] sm:$0xff]  ;;  %v895_v7 = vpack.c.bf16 %v613_v1, %v612_v0  ;;  %v665_v29 = vld [vmem:[%s2001_s21 + $0x788] sm:$0xff]  ;;  %v619_v52 = vld [vmem:[%s2001_s21 + $0x618] sm:$0xff] }
  0x84   : > { %1558 = vmatpush3.bf16.msra.mxu0 %v839_v24  ;;  %v867_v24 = vpack.c.bf16 %v557_v14, %v556_v13  ;;  %v596_v11 = vld [vmem:[%s2001_s21 + $0x560] sm:$0xff]  ;;  %v615_v13 = vld [vmem:[%s2001_s21 + $0x5f8] sm:$0xff]  ;;  %v617_v37 = vld [vmem:[%s2001_s21 + $0x608] sm:$0xff] }
  0x85   : > { %1559 = vmatprep.subr.bf16.mxu0 %v848_v27  ;;  %v876_v27 = vpack.c.bf16 %v575_v20, %v574_v19  ;;  %v567_v19 = vld [vmem:[%s2001_s21 + $0x478] sm:$0xff]  ;;  %v598_v20 = vld [vmem:[%s2001_s21 + $0x570] sm:$0xff]  ;;  %v664_v28 = vld [vmem:[%s2001_s21 + $0x780] sm:$0xff] }
  0x86   : > { %1580 = vmatpush3.bf16.msra.mxu1 %v855_v26  ;;  %v883_v26 = vpack.c.bf16 %v589_v18, %v588_v16  ;;  %v566_v18 = vld [vmem:[%s2001_s21 + $0x470] sm:$0xff]  ;;  %v616_v36 = vld [vmem:[%s2001_s21 + $0x600] sm:$0xff] }
  0x87   : > { %1581 = vmatprep.subr.bf16.mxu1 %v864_v32  ;;  %v892_v32 = vpack.c.bf16 %v607_v22, %v606_v21  ;;  %v599_v22 = vld [vmem:[%s2001_s21 + $0x578] sm:$0xff]  ;;  %v648_v38 = vld [vmem:[%s2001_s21 + $0x700] sm:$0xff]  ;;  %v897_v48 = vpack.c.bf16 %v617_v37, %v616_v36  ;;  %v674_v37 = vld [vmem:[%s2001_s21 + $0x7d0] sm:$0xff] }
  0x88   : > { %1560 = vmatpush3.bf16.msra.mxu0 %v840_v40  ;;  %v884_v40 = vpack.c.bf16 %v591_v34, %v590_v31  ;;  %v872_v31 = vpack.c.bf16 %v567_v19, %v566_v18  ;;  %v888_v34 = vpack.c.bf16 %v599_v22, %v598_v20  ;;  %v620_v1 = vld [vmem:[%s2001_s21 + $0x620] sm:$0xff]  ;;  %v655_v18 = vld [vmem:[%s2001_s21 + $0x738] sm:$0xff]  ;;  %v641_v20 = vld [vmem:[%s2001_s21 + $0x6c8] sm:$0xff] }
  0x89   : > { %1589 = vmatprep.subr.bf16.mxu0 %v873_v44  ;;  %v561_v44 = vld [vmem:[%s2001_s21 + $0x448] sm:$0xff]  ;;  %v640_v19 = vld [vmem:[%s2001_s21 + $0x6c0] sm:$0xff]  ;;  %v643_v36 = vld [vmem:[%s2001_s21 + $0x6d8] sm:$0xff] }
  0x8a   : > { %1582 = vmatpush3.bf16.msra.mxu1 %v856_v42  ;;  %v560_v42 = vld [vmem:[%s2001_s21 + $0x440] sm:$0xff]  ;;  %v673_v22 = vld [vmem:[%s2001_s21 + $0x7c8] sm:$0xff]  ;;  %v682_v57 = vld [vmem:[%s2001_s21 + $0x810] sm:$0xff] }
  0x8b   : > { %1611 = vmatprep.subr.bf16.mxu1 %v889_v49  ;;  %1051 = vmatmul.mubr.bf16.vlgmr.msra.gmra.mrb[4].mxu0 %v788_v53  ;;  %v578_v49 = vld [vmem:[%s2001_s21 + $0x4d0] sm:$0xff]  ;;  %v869_v53 = vpack.c.bf16 %v561_v44, %v560_v42 }
  0x8c   : > { %1590 = vmatpush3.bf16.msra.mxu0 %v865_v56  ;;  %1130 = vmatprep.mubr.bf16.mxu0 %v793_v5  ;;  %v878_v55 = vpack.c.bf16 %v579_v50, %v578_v49  ;;  %v562_v56 = vld [vmem:[%s2001_s21 + $0x450] sm:$0xff]  ;;  %v565_v5 = vld [vmem:[%s2001_s21 + $0x468] sm:$0xff] }
  0x8d   : > { %1091 = vmatmul.mubr.bf16.vlgmr.msra.gmra.mrb[4].mxu1 %v790_v58  ;;  %1591 = vmatprep.subr.bf16.mxu0 %v874_v62  ;;  %v563_v58 = vld [vmem:[%s2001_s21 + $0x458] sm:$0xff]  ;;  %v580_v62 = vld [vmem:[%s2001_s21 + $0x4e0] sm:$0xff]  ;;  %v871_v14 = vpack.c.bf16 %v565_v5, %v564_v6  ;;  %v666_v44 = vld [vmem:[%s2001_s21 + $0x790] sm:$0xff] }
  0x8e   : > { %1612 = vmatpush3.bf16.msra.mxu1 %v881_v61  ;;  %1170 = vmatprep.mubr.bf16.mxu1 %v795_v8  ;;  %v595_v61 = vld [vmem:[%s2001_s21 + $0x558] sm:$0xff]  ;;  %v879_v4 = vpack.c.bf16 %v581_v63, %v580_v62  ;;  %v597_v8 = vld [vmem:[%s2001_s21 + $0x568] sm:$0xff]  ;;  %v638_v5 = vld [vmem:[%s2001_s21 + $0x6b0] sm:$0xff] }
  0x8f   : > { %1613 = vmatprep.subr.bf16.mxu1 %v890_v2  ;;  %v870_v2 = vpack.c.bf16 %v563_v58, %v562_v56  ;;  %v886_v3 = vpack.c.bf16 %v595_v61, %v594_v59  ;;  %v887_v16 = vpack.c.bf16 %v597_v8, %v596_v11  ;;  %v636_v56 = vld [vmem:[%s2001_s21 + $0x6a0] sm:$0xff]  ;;  %v653_v6 = vld [vmem:[%s2001_s21 + $0x728] sm:$0xff]  ;;  %v639_v11 = vld [vmem:[%s2001_s21 + $0x6b8] sm:$0xff] }
  0x90   : > { %1592 = vmatpush3.bf16.msra.mxu0 %v866_v9  ;;  %v582_v9 = vld [vmem:[%s2001_s21 + $0x4f0] sm:$0xff]  ;;  %v668_v59 = vld [vmem:[%s2001_s21 + $0x7a0] sm:$0xff]  ;;  %v671_v8 = vld [vmem:[%s2001_s21 + $0x7b8] sm:$0xff] }
  0x91   : > { %1593 = vmatprep.subr.bf16.mxu0 %v875_v12  ;;  %v614_v12 = vld [vmem:[%s2001_s21 + $0x5f0] sm:$0xff] }
  0x92   : > { %1614 = vmatpush3.bf16.msra.mxu1 %v882_v10  ;;  %v583_v10 = vld [vmem:[%s2001_s21 + $0x4f8] sm:$0xff]  ;;  %v896_v21 = vpack.c.bf16 %v615_v13, %v614_v12  ;;  %v908_v12 = vpack.c.bf16 %v639_v11, %v638_v5  ;;  %v622_v13 = vld [vmem:[%s2001_s21 + $0x630] sm:$0xff]  ;;  %v750_v5 = vrot.slane %v2197_v15, %v717_v23 }
  0x93   : > { %1615 = vmatprep.subr.bf16.mxu1 %v891_v17  ;;  %v880_v17 = vpack.c.bf16 %v583_v10, %v582_v9 }
  0x94   : > { %1594 = vmatpush3.bf16.msra.mxu0 %v867_v24  ;;  %v632_v24 = vld [vmem:[%s2001_s21 + $0x680] sm:$0xff] }
  0x95   : > { %1595 = vmatprep.subr.bf16.mxu0 %v876_v27  ;;  %v734_v27 = vrot.slane %v2197_v15, %v701_v30  ;;  %v921_v30 = vpack.c.bf16 %v665_v29, %v664_v28  ;;  %v624_v28 = vld [vmem:[%s2001_s21 + $0x640] sm:$0xff]  ;;  %v625_v29 = vld [vmem:[%s2001_s21 + $0x648] sm:$0xff] }
  0x96   : > { %1616 = vmatpush3.bf16.msra.mxu1 %v883_v26  ;;  %v633_v26 = vld [vmem:[%s2001_s21 + $0x688] sm:$0xff] }
  0x97   : > { %1617 = vmatprep.subr.bf16.mxu1 %v892_v32  ;;  %v742_v32 = vrot.slane %v2197_v15, %v709_v33  ;;  %v905_v35 = vpack.c.bf16 %v633_v26, %v632_v24  ;;  %v754_v33 = vrot.slane %v2197_v15, %v721_v43  ;;  %v792_v42 = vpack.c.bf16 %v734_v27, %v734_v27  ;;  %v618_v43 = vld [vmem:[%s2001_s21 + $0x610] sm:$0xff] }
  0x98   : > { %1596 = vmatpush3.bf16.msra.mxu0 %v868_v39  ;;  %v649_v39 = vld [vmem:[%s2001_s21 + $0x708] sm:$0xff]  ;;  %v898_v62 = vpack.c.bf16 %v619_v52, %v618_v43  ;;  %v909_v27 = vpack.c.bf16 %v641_v20, %v640_v19  ;;  %v686_v19 = vld [vmem:[%s2001_s21 + $0x830] sm:$0xff]  ;;  %v687_v20 = vld [vmem:[%s2001_s21 + $0x838] sm:$0xff] }
  0x99   : > { %1597 = vmatprep.subr.bf16.mxu0 %v877_v41  ;;  %v635_v41 = vld [vmem:[%s2001_s21 + $0x698] sm:$0xff]  ;;  %v794_v49 = vpack.c.bf16 %v742_v32, %v742_v32  ;;  %v913_v50 = vpack.c.bf16 %v649_v39, %v648_v38  ;;  %v797_v58 = vpack.c.bf16 %v754_v33, %v754_v33 }
  0x9a   : > { %1618 = vmatpush3.bf16.msra.mxu1 %v884_v40  ;;  %v634_v40 = vld [vmem:[%s2001_s21 + $0x690] sm:$0xff]  ;;  %v675_v38 = vld [vmem:[%s2001_s21 + $0x7d8] sm:$0xff] }
  0x9b   : > { %1619 = vmatprep.subr.bf16.mxu1 %v893_v46  ;;  %v762_v46 = vrot.slane %v2197_v15, %v729_v47  ;;  %v906_v51 = vpack.c.bf16 %v635_v41, %v634_v40  ;;  %v637_v47 = vld [vmem:[%s2001_s21 + $0x6a8] sm:$0xff]  ;;  %v626_v41 = vld [vmem:[%s2001_s21 + $0x650] sm:$0xff]  ;;  %v627_v33 = vld [vmem:[%s2001_s21 + $0x658] sm:$0xff] }
  0x9c   : > { %1598 = vmatpush3.bf16.msra.mxu0 %v869_v53  ;;  %v650_v53 = vld [vmem:[%s2001_s21 + $0x710] sm:$0xff]  ;;  %v907_v0 = vpack.c.bf16 %v637_v47, %v636_v56  ;;  %v661_v47 = vld [vmem:[%s2001_s21 + $0x768] sm:$0xff] }
  0x9d   : > { %1599 = vmatprep.subr.bf16.mxu0 %v878_v55  ;;  %v651_v55 = vld [vmem:[%s2001_s21 + $0x718] sm:$0xff]  ;;  %v799_v61 = vpack.c.bf16 %v762_v46, %v762_v46  ;;  %v644_v46 = vld [vmem:[%s2001_s21 + $0x6e0] sm:$0xff] }
  0x9e   : > { %1620 = vmatpush3.bf16.msra.mxu1 %v885_v54  ;;  %v922_v54 = vpack.c.bf16 %v667_v45, %v666_v44  ;;  %v914_v63 = vpack.c.bf16 %v651_v55, %v650_v53  ;;  %v926_v44 = vpack.c.bf16 %v675_v38, %v674_v37  ;;  %v659_v45 = vld [vmem:[%s2001_s21 + $0x758] sm:$0xff]  ;;  %v628_v53 = vld [vmem:[%s2001_s21 + $0x660] sm:$0xff]  ;;  %v1497_v38 = vld [vmem:[%s2066_s15 + $0x10] ss:$0 sm:$0xff] }
  0x9f   : > { %1621 = vmatprep.subr.bf16.mxu1 %v894_v60  ;;  %v669_v60 = vld [vmem:[%s2001_s21 + $0x7a8] sm:$0xff]  ;;  %v660_v55 = vld [vmem:[%s2001_s21 + $0x760] sm:$0xff] }
  0xa0   : > { %1600 = vmatpush3.bf16.msra.mxu0 %v870_v2  ;;  %v621_v2 = vld [vmem:[%s2001_s21 + $0x628] sm:$0xff] }
  0xa1   : > { %1601 = vmatprep.subr.bf16.mxu0 %v879_v4  ;;  %v923_v4 = vpack.c.bf16 %v669_v60, %v668_v59  ;;  %v899_v9 = vpack.c.bf16 %v621_v2, %v620_v1  ;;  %v647_v59 = vld [vmem:[%s2001_s21 + $0x6f8] sm:$0xff]  ;;  %v678_v60 = vld [vmem:[%s2001_s21 + $0x7f0] sm:$0xff] }
  0xa2   : > { %1622 = vmatpush3.bf16.msra.mxu1 %v886_v3  ;;  %v652_v3 = vld [vmem:[%s2001_s21 + $0x720] sm:$0xff]  ;;  %v630_v1 = vld [vmem:[%s2001_s21 + $0x670] sm:$0xff]  ;;  %v631_v2 = vld [vmem:[%s2001_s21 + $0x678] sm:$0xff] }
  0xa3   : > { %1623 = vmatprep.subr.bf16.mxu1 %v895_v7  ;;  %v670_v7 = vld [vmem:[%s2001_s21 + $0x7b0] sm:$0xff]  ;;  %v915_v10 = vpack.c.bf16 %v653_v6, %v652_v3  ;;  %v663_v6 = vld [vmem:[%s2001_s21 + $0x778] sm:$0xff]  ;;  %v904_v11 = vpack.c.bf16 %v631_v2, %v630_v1 }
  0xa4   : > { %1602 = vmatpush3.bf16.msra.mxu0 %v871_v14  ;;  %v623_v14 = vld [vmem:[%s2001_s21 + $0x638] sm:$0xff] }
  0xa5   : > { %1603 = vmatprep.subr.bf16.mxu0 %v880_v17  ;;  %v924_v17 = vpack.c.bf16 %v671_v8, %v670_v7  ;;  %v900_v24 = vpack.c.bf16 %v623_v14, %v622_v13  ;;  %v758_v7 = vrot.slane %v2197_v15, %v725_v25  ;;  %v1871_v14 = vmov 0.0   ;;  %v684_v15 = vld [vmem:[%s2001_s21 + $0x820] sm:$0xff]  ;;  %v1314_v1 = vld [vmem:[%s2371_s26 + $0x78] sm:$0xff] }
  0xa6   : > { %1624 = vmatpush3.bf16.msra.mxu1 %v887_v16  ;;  %v654_v16 = vld [vmem:[%s2001_s21 + $0x730] sm:$0xff] }
  0xa7   : > { %1625 = vmatprep.subr.bf16.mxu1 %v896_v21  ;;  %v672_v21 = vld [vmem:[%s2001_s21 + $0x7c0] sm:$0xff]  ;;  %v916_v26 = vpack.c.bf16 %v655_v18, %v654_v16  ;;  %v798_v23 = vpack.c.bf16 %v758_v7, %v758_v7  ;;  %v683_v16 = vld [vmem:[%s2001_s21 + $0x818] sm:$0xff] }
  0xa8   : > { %1604 = vmatpush3.bf16.msra.mxu0 %v872_v31  ;;  %v656_v31 = vld [vmem:[%s2001_s21 + $0x740] sm:$0xff]  ;;  %v925_v32 = vpack.c.bf16 %v673_v22, %v672_v21  ;;  %v930_v25 = vpack.c.bf16 %v683_v16, %v682_v57  ;;  %v932_v21 = vpack.c.bf16 %v687_v20, %v686_v19 }
  0xa9   : > { %1633 = vmatprep.subr.bf16.mxu0 %v905_v35  ;;  %v642_v35 = vld [vmem:[%s2001_s21 + $0x6d0] sm:$0xff]  ;;  %v688_v22 = vld [vmem:[%s2001_s21 + $0x840] sm:$0xff] }
  0xaa   : > { %1626 = vmatpush3.bf16.msra.mxu1 %v888_v34  ;;  %v657_v34 = vld [vmem:[%s2001_s21 + $0x748] sm:$0xff]  ;;  %v910_v40 = vpack.c.bf16 %v643_v36, %v642_v35  ;;  %v694_v35 = vld [vmem:[%s2001_s21 + $0x870] sm:$0xff]  ;;  %v695_v36 = vld [vmem:[%s2001_s21 + $0x878] sm:$0xff] }
  0xab   : > { %1655 = vmatprep.subr.bf16.mxu1 %v921_v30  ;;  %1131 = vmatmul.mubr.bf16.vlgmr.msra.gmra.mrb[8].mxu0 %v792_v42  ;;  %v901_v30 = vpack.c.bf16 %v625_v29, %v624_v28  ;;  %v917_v39 = vpack.c.bf16 %v657_v34, %v656_v31  ;;  %v658_v42 = vld [vmem:[%s2001_s21 + $0x750] sm:$0xff]  ;;  %v691_v28 = vld [vmem:[%s2001_s21 + $0x858] sm:$0xff]  ;;  %v692_v31 = vld [vmem:[%s2001_s21 + $0x860] sm:$0xff]  ;;  %v936_v37 = vpack.c.bf16 %v695_v36, %v694_v35 }
  0xac   : > { %1634 = vmatpush3.bf16.msra.mxu0 %v897_v48  ;;  %1210 = vmatprep.mubr.bf16.mxu0 %v797_v58  ;;  %v645_v48 = vld [vmem:[%s2001_s21 + $0x6e8] sm:$0xff]  ;;  %v918_v43 = vpack.c.bf16 %v659_v45, %v658_v42  ;;  %v646_v58 = vld [vmem:[%s2001_s21 + $0x6f0] sm:$0xff]  ;;  %v1302_v42 = vld [vmem:[%s2371_s26 + $0x18] sm:$0xff] }
  0xad   : > { %1171 = vmatmul.mubr.bf16.vlgmr.msra.gmra.mrb[8].mxu1 %v794_v49  ;;  %1635 = vmatprep.subr.bf16.mxu0 %v906_v51  ;;  %v676_v49 = vld [vmem:[%s2001_s21 + $0x7e0] sm:$0xff]  ;;  %v902_v51 = vpack.c.bf16 %v627_v33, %v626_v41  ;;  %v911_v52 = vpack.c.bf16 %v645_v48, %v644_v46  ;;  %v1301_v41 = vld [vmem:[%s2371_s26 + $0x10] sm:$0xff]  ;;  %v1304_v46 = vld [vmem:[%s2371_s26 + $0x28] sm:$0xff] }
  0xae   : > { %1656 = vmatpush3.bf16.msra.mxu1 %v913_v50  ;;  %1250 = vmatprep.mubr.bf16.mxu1 %v799_v61  ;;  %v677_v50 = vld [vmem:[%s2001_s21 + $0x7e8] sm:$0xff]  ;;  %v679_v61 = vld [vmem:[%s2001_s21 + $0x7f8] sm:$0xff]  ;;  %v1303_v45 = vld [vmem:[%s2371_s26 + $0x20] sm:$0xff] }
  0xaf   : > { %1657 = vmatprep.subr.bf16.mxu1 %v922_v54  ;;  %v629_v54 = vld [vmem:[%s2001_s21 + $0x668] sm:$0xff]  ;;  %v927_v56 = vpack.c.bf16 %v677_v50, %v676_v49  ;;  %v928_v3 = vpack.c.bf16 %v679_v61, %v678_v60  ;;  %v1318_v48 = vpack.c.bf16 %v1304_v46, %v1303_v45  ;;  %v1305_v49 = vld [vmem:[%s2371_s26 + $0x30] sm:$0xff]  ;;  %v1306_v50 = vld [vmem:[%s2371_s26 + $0x38] sm:$0xff] }
  0xb0   : > { %1636 = vmatpush3.bf16.msra.mxu0 %v898_v62  ;;  %v903_v62 = vpack.c.bf16 %v629_v54, %v628_v53  ;;  %v1309_v54 = vld [vmem:[%s2371_s26 + $0x50] sm:$0xff]  ;;  %v937_v61 = vld [vmem:[%s403_s10] sm:$0x1] }
  0xb1   : > { %1637 = vmatprep.subr.bf16.mxu0 %v907_v0  ;;  %v912_v0 = vpack.c.bf16 %v647_v59, %v646_v58  ;;  %v1312_v58 = vld [vmem:[%s2371_s26 + $0x68] sm:$0xff] }
  0xb2   : > { %1658 = vmatpush3.bf16.msra.mxu1 %v914_v63  ;;  %v919_v63 = vpack.c.bf16 %v661_v47, %v660_v55  ;;  %v1310_v55 = vld [vmem:[%s2371_s26 + $0x58] sm:$0xff]  ;;  %v1311_v47 = vld [vmem:[%s2371_s26 + $0x60] sm:$0xff] }
  0xb3   : > { %1659 = vmatprep.subr.bf16.mxu1 %v923_v4  ;;  %v662_v4 = vld [vmem:[%s2001_s21 + $0x770] sm:$0xff]  ;;  %v1322_v59 = vpack.c.bf16 %v1312_v58, %v1311_v47  ;;  %v1365_v47 = vld [vmem:[%s395_s29] sm:$0x1] }
  0xb4   : > { %1638 = vmatpush3.bf16.msra.mxu0 %v899_v9  ;;  %v920_v8 = vpack.c.bf16 %v663_v6, %v662_v4  ;;  %v680_v9 = vld [vmem:[%s2001_s21 + $0x800] sm:$0xff] }
  0xb5   : > { %1639 = vmatprep.subr.bf16.mxu0 %v908_v12  ;;  %v796_v12 = vpack.c.bf16 %v750_v5, %v750_v5 }
  0xb6   : > { %1660 = vmatpush3.bf16.msra.mxu1 %v915_v10  ;;  %v681_v10 = vld [vmem:[%s2001_s21 + $0x808] sm:$0xff] }
  0xb7   : > { %1661 = vmatprep.subr.bf16.mxu1 %v924_v17  ;;  %v929_v13 = vpack.c.bf16 %v681_v10, %v680_v9  ;;  %v685_v17 = vld [vmem:[%s2001_s21 + $0x828] sm:$0xff] }
  0xb8   : > { %1640 = vmatpush3.bf16.msra.mxu0 %v900_v24  ;;  %v931_v18 = vpack.c.bf16 %v685_v17, %v684_v15  ;;  %v689_v24 = vld [vmem:[%s2001_s21 + $0x848] sm:$0xff] }
  0xb9   : > { %1641 = vmatprep.subr.bf16.mxu0 %v909_v27  ;;  %v690_v27 = vld [vmem:[%s2001_s21 + $0x850] sm:$0xff] }
  0xba   : > { %1662 = vmatpush3.bf16.msra.mxu1 %v916_v26  ;;  %v933_v26 = vpack.c.bf16 %v689_v24, %v688_v22  ;;  %v934_v29 = vpack.c.bf16 %v691_v28, %v690_v27 }
  0xbb   : > { %1663 = vmatprep.subr.bf16.mxu1 %v925_v32  ;;  %v693_v32 = vld [vmem:[%s2001_s21 + $0x868] sm:$0xff]  ;;  %s415_s21 = scalar_lea.vmem %s2436_s7, %s2456_s17 }
  0xbc   : > { %1642 = vmatpush3.bf16.msra.mxu0 %v901_v30  ;;  %v935_v34 = vpack.c.bf16 %v693_v32, %v692_v31  ;;  %v800_v30 = vpack.c.bf16 %v1497_v38, %v1497_v38 }
  0xbd   : > { %1643 = vmatprep.subr.bf16.mxu0 %v910_v40  ;;  %v1300_v40 = vld [vmem:[%s2371_s26 + $0x8] sm:$0xff] }
  0xbe   : > { %1664 = vmatpush3.bf16.msra.mxu1 %v917_v39  ;;  %v1299_v39 = vld [vmem:[%s2371_s26] sm:$0xff] }
  0xbf   : > { %1665 = vmatprep.subr.bf16.mxu1 %v926_v44  ;;  %v1316_v33 = vpack.c.bf16 %v1300_v40, %v1299_v39  ;;  %v1317_v44 = vpack.c.bf16 %v1302_v42, %v1301_v41 }
  0xc0   : > { %1644 = vmatpush3.bf16.msra.mxu0 %v902_v51  ;;  %v1319_v51 = vpack.c.bf16 %v1306_v50, %v1305_v49 }
  0xc1   : > { %1645 = vmatprep.subr.bf16.mxu0 %v911_v52  ;;  %v1308_v52 = vld [vmem:[%s2371_s26 + $0x48] sm:$0xff] }
  0xc2   : > { %1666 = vmatpush3.bf16.msra.mxu1 %v918_v43  ;;  %v1307_v43 = vld [vmem:[%s2371_s26 + $0x40] sm:$0xff] }
  0xc3   : > { %1667 = vmatprep.subr.bf16.mxu1 %v927_v56  ;;  %v1320_v53 = vpack.c.bf16 %v1308_v52, %v1307_v43  ;;  %v1321_v56 = vpack.c.bf16 %v1310_v55, %v1309_v54  ;;  %v1324_v55 = vld [vmem:[%s415_s21] sm:$0x1] }
  0xc4   : > { %1646 = vmatpush3.bf16.msra.mxu0 %v903_v62 }
  0xc5   : > { %1647 = vmatprep.subr.bf16.mxu0 %v912_v0  ;;  %v1313_v0 = vld [vmem:[%s2371_s26 + $0x70] sm:$0xff] }
  0xc6   : > { %1668 = vmatpush3.bf16.msra.mxu1 %v919_v63  ;;  %v1323_v6 = vpack.c.bf16 %v1314_v1, %v1313_v0 }
  0xc7   : > { %1669 = vmatprep.subr.bf16.mxu1 %v928_v3 }
  0xc8   : > { %1648 = vmatpush3.bf16.msra.mxu0 %v904_v11 }
  0xc9   : > { %1695 = vmatprep.subr.bf16.mxu0 %v1871_v14 }
  0xca   : > { %1670 = vmatpush3.bf16.msra.mxu1 %v920_v8 }
  0xcb   : > { %1715 = vmatprep.subr.bf16.mxu1 %v1871_v14  ;;  %1211 = vmatmul.mubr.bf16.vlgmr.msra.gmra.mrb[12].mxu0 %v796_v12 }
  0xcc   : > { %1696 = vmatpush3.bf16.msra.mxu0 %v929_v13  ;;  %1711 = vmatprep.mubr.msk.bf16.mxu0 %vm1872_vm0, %v1871_v14 }
  0xcd   : > { %1251 = vmatmul.mubr.bf16.vlgmr.msra.gmra.mrb[12].mxu1 %v798_v23  ;;  %1697 = vmatprep.subr.bf16.mxu0 %v1871_v14 }
  0xce   : > { %1731 = vmatprep.mubr.msk.bf16.mxu1 %vm1872_vm0, %v1871_v14  ;;  %1716 = vmatpush3.bf16.msra.mxu1 %v1316_v33 }
  0xcf   : > { %1717 = vmatprep.subr.bf16.mxu1 %v1871_v14 }
  0xd0   : > { %1698 = vmatpush3.bf16.msra.mxu0 %v930_v25 }
  0xd1   : > { %1699 = vmatprep.subr.bf16.mxu0 %v1871_v14 }
  0xd2   : > { %1718 = vmatpush3.bf16.msra.mxu1 %v1317_v44 }
  0xd3   : > { %1719 = vmatprep.subr.bf16.mxu1 %v1871_v14 }
  0xd4   : > { %1700 = vmatpush3.bf16.msra.mxu0 %v931_v18 }
  0xd5   : > { %1701 = vmatprep.subr.bf16.mxu0 %v1871_v14 }
  0xd6   : > { %1720 = vmatpush3.bf16.msra.mxu1 %v1318_v48 }
  0xd7   : > { %1721 = vmatprep.subr.bf16.mxu1 %v1871_v14 }
  0xd8   : > { %1702 = vmatpush3.bf16.msra.mxu0 %v932_v21 }
  0xd9   : > { %1703 = vmatprep.subr.bf16.mxu0 %v1871_v14 }
  0xda   : > { %1722 = vmatpush3.bf16.msra.mxu1 %v1319_v51 }
  0xdb   : > { %1723 = vmatprep.subr.bf16.mxu1 %v1871_v14 }
  0xdc   : > { %1704 = vmatpush3.bf16.msra.mxu0 %v933_v26 }
  0xdd   : > { %1705 = vmatprep.subr.bf16.mxu0 %v1871_v14 }
  0xde   : > { %1724 = vmatpush3.bf16.msra.mxu1 %v1320_v53 }
  0xdf   : > { %1725 = vmatprep.subr.bf16.mxu1 %v1871_v14 }
  0xe0   : > { %1706 = vmatpush3.bf16.msra.mxu0 %v934_v29 }
  0xe1   : > { %1707 = vmatprep.subr.bf16.mxu0 %v1871_v14 }
  0xe2   : > { %1726 = vmatpush3.bf16.msra.mxu1 %v1321_v56 }
  0xe3   : > { %1727 = vmatprep.subr.bf16.mxu1 %v1871_v14 }
  0xe4   : > { %1708 = vmatpush3.bf16.msra.mxu0 %v935_v34 }
  0xe5   : > { %1709 = vmatprep.subr.bf16.mxu0 %v1871_v14 }
  0xe6   : > { %1728 = vmatpush3.bf16.msra.mxu1 %v1322_v59 }
  0xe7   : > { %1729 = vmatprep.subr.bf16.mxu1 %v1871_v14 }
  0xe8   : > { %1710 = vmatpush3.bf16.msra.mxu0 %v936_v37 }
  0xea   : > { %1730 = vmatpush3.bf16.msra.mxu1 %v1323_v6 }
  0xeb   : > { %1712 = vmatmul.mubr.bf16.vlgmr.msra.gmra.mrb[16].mxu0 %v800_v30 }
 0x13e   : > { %v1517_v60 = vpop.f32.mrb[0].mxu0 }
 0x13f   : > { %v1518_v62 = vpop.f32.mrb[1].mxu0 }
 0x140   : > { %v1539_v63 = vpop.f32.mrb[0].mxu1  ;;  %v1519_v2 = vadd.f32 %v1518_v62, %v1517_v60  ;;  %v1520_v3 = vpop.f32.mrb[2].mxu0 }
 0x141   : > { %v1540_v4 = vpop.f32.mrb[1].mxu1  ;;  %v1521_v5 = vpop.f32.mrb[3].mxu0 }
 0x142   : > { %v1541_v11 = vadd.f32 %v1540_v4, %v1539_v63  ;;  %v1542_v7 = vpop.f32.mrb[2].mxu1  ;;  %v973_v8 = vadd.f32 %v1519_v2, %v937_v61  ;;  %v1368_v63 = vld [vmem:[%s398_s22] sm:$0x1] }
 0x143   : > { %v1543_v9 = vpop.f32.mrb[3].mxu1 }
 0x144   : > { %v1013_v10 = vadd.f32 %v1541_v11, %v973_v8 }
 0x15e   : > { %v1561_v12 = vpop.f32.mrb[4].mxu0 }
 0x15f   : > { %v1562_v13 = vpop.f32.mrb[5].mxu0 }
 0x160   : > { %v1583_v23 = vpop.f32.mrb[4].mxu1  ;;  %v1563_v57 = vadd.f32 %v1562_v13, %v1561_v12  ;;  %v1564_v16 = vpop.f32.mrb[6].mxu0 }
 0x161   : > { %v1584_v25 = vpop.f32.mrb[5].mxu1  ;;  %v1565_v14 = vpop.f32.mrb[7].mxu0 }
 0x162   : > { %v1585_v15 = vadd.f32 %v1584_v25, %v1583_v23  ;;  %v1586_v17 = vpop.f32.mrb[6].mxu1  ;;  %v1053_v18 = vadd.f32 %v1563_v57, %v1013_v10 }
 0x163   : > { %v1587_v19 = vpop.f32.mrb[7].mxu1 }
 0x164   : > { %v1093_v20 = vadd.f32 %v1585_v15, %v1053_v18 }
 0x17e   : > { %v1605_v21 = vpop.f32.mrb[8].mxu0 }
 0x17f   : > { %v1606_v22 = vpop.f32.mrb[9].mxu0 }
 0x180   : > { %v1627_v24 = vpop.f32.mrb[8].mxu1  ;;  %v1607_v26 = vadd.f32 %v1606_v22, %v1605_v21  ;;  %v1608_v27 = vpop.f32.mrb[10].mxu0 }
 0x181   : > { %v1628_v28 = vpop.f32.mrb[9].mxu1  ;;  %v1609_v29 = vpop.f32.mrb[11].mxu0 }
 0x182   : > { %v1629_v31 = vadd.f32 %v1628_v28, %v1627_v24  ;;  %v1630_v32 = vpop.f32.mrb[10].mxu1  ;;  %v1133_v34 = vadd.f32 %v1607_v26, %v1093_v20 }
 0x183   : > { %v1631_v35 = vpop.f32.mrb[11].mxu1 }
 0x184   : > { %v1173_v36 = vadd.f32 %v1629_v31, %v1133_v34 }
 0x19e   : > { %v1649_v37 = vpop.f32.mrb[12].mxu0 }
 0x19f   : > { %v1650_v38 = vpop.f32.mrb[13].mxu0 }
 0x1a0   : > { %v1671_v30 = vpop.f32.mrb[12].mxu1  ;;  %v1651_v39 = vadd.f32 %v1650_v38, %v1649_v37  ;;  %v1652_v40 = vpop.f32.mrb[14].mxu0 }
 0x1a1   : > { %v1672_v41 = vpop.f32.mrb[13].mxu1  ;;  %v1653_v33 = vpop.f32.mrb[15].mxu0 }
 0x1a2   : > { %v1673_v42 = vadd.f32 %v1672_v41, %v1671_v30  ;;  %v1674_v44 = vpop.f32.mrb[14].mxu1  ;;  %v1213_v45 = vadd.f32 %v1651_v39, %v1173_v36 }
 0x1a3   : > { %v1675_v46 = vpop.f32.mrb[15].mxu1 }
 0x1a4   : > { %v1253_v48 = vadd.f32 %v1673_v42, %v1213_v45 }
 0x1be   : > { %v1292_v49 = vpop.f32.mrb[16].mxu0 }
 0x1bf   : > { %v1293_v50 = vadd.f32 %v1292_v49, %v1253_v48  ;;  %v1713_v51 = vpop.f32.mrb[17].mxu0 }
 0x1c0   : > { %v1295_v43 = vpop.f32.mrb[18].mxu0 }
 0x1c1   : > { %v1298_v52 = vmax.f32 %v1293_v50, 0.0  ;;  %v1714_v53 = vpop.f32.mrb[19].mxu0 }
 0x1c3   : > { %v1315_v54 = vpack.c.bf16 %v1298_v52, %v1298_v52 }
 0x1c5   : > { %1732 = vmatmul.mubr.bf16.vlgmr.msra.gmra.mrb[16].mxu1 %v1315_v54 }
 0x298   : > { %v1359_v56 = vpop.f32.mrb[16].mxu1 }
 0x299   : > { %v1360_v58 = vadd.f32 %v1359_v56, %v1324_v55  ;;  %v1733_v59 = vpop.f32.mrb[17].mxu1 }
 0x29a   : > { %v1362_v60 = vpop.f32.mrb[18].mxu1 }
 0x29b   : > { %v1366_v61 = vsub.f32 %v1360_v58, %v1365_v47  ;;  %v1734_v62 = vpop.f32.mrb[19].mxu1 }
 0x29d   : > { %v1367_v0 = vmul.f32 %v1366_v61, %v1366_v61 }
 0x29f   : > { %v1369_v1 = vmul.f32 %v1368_v63, %v1367_v0 }
 0x2a1   : > { %1370 = vst [vmem:[%s419_s19] sm:$0x1] %v1369_v1 }
 0x2a2 PF: > { %p24_p11 = scmp.ge.s32.totalorder %s1939_s14, 4   ;;  %s2443_s10 = smov %s1857_s11 }
 0x2a3   : > { %s2444_s11 = smov %s1861_s0  ;;  %s2445_s0 = smov %s1953_s23 }
 0x2a4   : > { %s2446_s12 = smov %s1939_s14  ;;  %26 = sbr.rel (!%p24_p11) target bundleno = 18 (0x12), region = 106 }
 0x2ab   :  { %1388 = vsyncpa [#allocation5], 1 }
 0x2ac   :  { %1390 = vsyncpa [#allocation5 + $0x1], 1 }

</bundles_post_ra>
